<compile_context>
chip_gen: v7x
topology: tpu7x:2x2x1
jax: 0.10.0
libtpu: 0.0.40
codegen_flags: <defaults>
</compile_context>

<pallas_src>
import functools
import math

import numpy as np
import jax
import jax.numpy as jnp
from jax.experimental import pallas as pl
from jax.experimental.pallas import tpu as pltpu

# ------------------------- small config (consistent with the module) --------
IMG = 16          # img_size
PATCH = 4         # patch_size
IN_CH = 3         # in_chans
EMBED = 32        # embed_dim
DEPTH = 2         # depth
HEADS = 4         # num_heads
DEC_EMBED = 32    # decoder_embed_dim
DEC_DEPTH = 2     # decoder_depth
DEC_HEADS = 4     # decoder_num_heads
MLP_RATIO = 4.0
LN_EPS = 1e-5     # nn.LayerNorm default eps
MASK_RATIO = 0.75
NORM_PIX_LOSS = False  # module default

GRID = IMG // PATCH
NUM_PATCHES = GRID * GRID
PATCH_DIM = PATCH * PATCH * IN_CH
LEN_KEEP = int(NUM_PATCHES * (1 - MASK_RATIO))


# ------------------------- in-kernel math helpers ----------------------------
def _ln(x, w, b):
    """LayerNorm over the last dim (biased var), matches nn.LayerNorm."""
    mu = jnp.mean(x, axis=-1, keepdims=True)
    var = jnp.mean(jnp.square(x - mu), axis=-1, keepdims=True)
    return (x - mu) * jax.lax.rsqrt(var + LN_EPS) * w + b


def _erf(x):
    # Abramowitz & Stegun 7.1.26 (|err| < 1.5e-7 ~ f32 eps); exp/abs/poly only,
    # guaranteed to lower in Mosaic.
    a1, a2, a3, a4, a5 = 0.254829592, -0.284496736, 1.421413741, -1.453152027, 1.061405429
    p = 0.3275911
    s = jnp.where(x < 0.0, -1.0, 1.0)
    ax = jnp.abs(x)
    t = 1.0 / (1.0 + p * ax)
    poly = ((((a5 * t + a4) * t + a3) * t + a2) * t + a1) * t
    return s * (1.0 - poly * jnp.exp(-ax * ax))


def _gelu(x):
    # exact (erf) GELU, as used by nn.GELU default in timm's Mlp
    return 0.5 * x * (1.0 + _erf(x * (1.0 / math.sqrt(2.0))))


def _split_heads(m, num_heads, hd, off):
    """(N, >=off+H*hd) value -> (H, N, hd) by slicing lanes and stacking on a
    leading (untiled) axis."""
    rows = [m[:, off + i * hd: off + (i + 1) * hd][None] for i in range(num_heads)]
    return jnp.concatenate(rows, axis=0)


def _attention(x, qkvw, qkvb, projw, projb, num_heads):
    """timm Block attention, all heads batched on a leading axis."""
    N, D = x.shape
    hd = D // num_heads
    qkv = jnp.dot(x, qkvw, preferred_element_type=jnp.float32) + qkvb      # (N, 3D)
    q = _split_heads(qkv, num_heads, hd, 0) * (hd ** -0.5)                 # (H, N, hd)
    k = _split_heads(qkv, num_heads, hd, D)
    v = _split_heads(qkv, num_heads, hd, 2 * D)
    s = jnp.einsum("hqd,hkd->hqk", q, k, preferred_element_type=jnp.float32)
    s = s - jnp.max(s, axis=-1, keepdims=True)
    p = jnp.exp(s)
    p = p * pl.reciprocal(jnp.sum(p, axis=-1, keepdims=True), approx=True)
    ctx = jnp.einsum("hqk,hkd->hqd", p, v, preferred_element_type=jnp.float32)
    ctx = jnp.concatenate([ctx[i] for i in range(num_heads)], axis=-1)     # (N, D)
    return jnp.dot(ctx, projw, preferred_element_type=jnp.float32) + projb


_BLK_KEYS = ("ln1_w", "ln1_b", "qkv_w", "qkv_b", "proj_w", "proj_b",
             "ln2_w", "ln2_b", "fc1_w", "fc1_b", "fc2_w", "fc2_b")


def _run_block(x, blk_refs, layer, num_heads):
    """One pre-norm ViT block; blk_refs are depth-stacked refs, `layer` static."""
    (ln1w, ln1b, qkvw, qkvb, projw, projb,
     ln2w, ln2b, fc1w, fc1b, fc2w, fc2b) = blk_refs
    h = _ln(x, ln1w[layer], ln1b[layer])
    x = x + _attention(h, qkvw[layer], qkvb[layer], projw[layer], projb[layer],
                       num_heads)
    h = _ln(x, ln2w[layer], ln2b[layer])
    h = jnp.dot(h, fc1w[layer], preferred_element_type=jnp.float32) + fc1b[layer]
    h = _gelu(h)
    h = jnp.dot(h, fc2w[layer], preferred_element_type=jnp.float32) + fc2b[layer]
    return x + h


# ------------------------- the fused kernel ----------------------------------
def _mae_kernel(patches_ref, target_ref, mask_ref, selk_ref, selr_ref, *rest):
    """Processes one batch element (grid over batch).

    rest = 39 weight refs (fixed order, see _weight_list) + (pred_ref, lp_ref).
    """
    pred_ref, lp_ref = rest[-2:]
    wr = rest[:-2]
    patch_w, patch_b, cls_tok, pos_cls, pos_patch = wr[0:5]
    enc_blk = wr[5:17]
    enc_nw, enc_nb, demb_w, demb_b, mask_tok, dec_pos = wr[17:23]
    dec_blk = wr[23:35]
    dec_nw, dec_nb, dpred_w, dpred_b = wr[35:39]

    # ---------------- encoder ----------------
    xp = patches_ref[0]                                                     # (L, PATCH_DIM)
    x = jnp.dot(xp, patch_w[...], preferred_element_type=jnp.float32) + patch_b[...]
    x = x + pos_patch[...]                                                  # (L, EMBED)
    # random-masking keep-gather as a one-hot matmul (tokens stay in VMEM)
    x_keep = jnp.dot(selk_ref[0], x, preferred_element_type=jnp.float32)    # (KEEP, EMBED)
    cls = cls_tok[...] + pos_cls[...]                                       # (1, EMBED)
    tok = jnp.concatenate([cls, x_keep], axis=0)                            # (1+KEEP, EMBED)
    for layer in range(DEPTH):
        tok = _run_block(tok, enc_blk, layer, HEADS)
    tok = _ln(tok, enc_nw[...], enc_nb[...])                                # latent

    # ---------------- decoder ----------------
    xd = jnp.dot(tok, demb_w[...], preferred_element_type=jnp.float32) + demb_b[...]
    mtoks = jnp.broadcast_to(mask_tok[...], (NUM_PATCHES - LEN_KEEP, DEC_EMBED))
    x_ = jnp.concatenate([xd[1:, :], mtoks], axis=0)                        # (L, DEC_EMBED)
    # ids_restore unshuffle as a one-hot matmul
    x_ = jnp.dot(selr_ref[0], x_, preferred_element_type=jnp.float32)       # (L, DEC_EMBED)
    xd = jnp.concatenate([xd[:1, :], x_], axis=0) + dec_pos[...]            # (L+1, DEC_EMBED)
    for layer in range(DEC_DEPTH):
        xd = _run_block(xd, dec_blk, layer, DEC_HEADS)
    xd = _ln(xd, dec_nw[...], dec_nb[...])
    pred = jnp.dot(xd, dpred_w[...], preferred_element_type=jnp.float32) + dpred_b[...]
    pred = pred[1:, :]                                                      # drop cls row
    pred_ref[0] = pred

    # ---------------- loss partials (fused into the kernel tail) -------------
    # TODO(synk): norm_pix_loss=True branch not implemented (module default False).
    d = pred - target_ref[0]
    per = jnp.mean(d * d, axis=-1, keepdims=True)                           # (L, 1)
    m = mask_ref[0]                                                         # (L, 1)
    num = jnp.sum(per * m, axis=0, keepdims=True)                           # (1, 1)
    den = jnp.sum(m, axis=0, keepdims=True)                                 # (1, 1)
    lp_ref[0] = jnp.concatenate([num, den], axis=1)                         # (1, 2)


# ------------------------- BlockSpec helpers ---------------------------------
def _full_spec(shape):
    nd = len(shape)
    return pl.BlockSpec(tuple(shape), lambda b, nd=nd: (0,) * nd)


def _batch_spec(shape):
    nd = len(shape)
    return pl.BlockSpec((1,) + tuple(shape[1:]),
                        lambda b, nd=nd: (b,) + (0,) * (nd - 1))


# ------------------------- parameter construction ---------------------------
def _xavier(key, fan_out, fan_in):
    lim = math.sqrt(6.0 / (fan_in + fan_out))
    # stored as (in, out) so kernels compute x @ W (== torch x @ W.T)
    return jax.random.uniform(key, (fan_in, fan_out), jnp.float32, -lim, lim)


def _get_1d_sincos(embed_dim, pos):
    omega = np.arange(embed_dim // 2, dtype=np.float64) / (embed_dim / 2.0)
    omega = 1.0 / 10000 ** omega
    pos = pos.reshape(-1)
    out = np.einsum("m,d->md", pos, omega)
    return np.concatenate([np.sin(out), np.cos(out)], axis=1)


def _get_2d_sincos_pos_embed(embed_dim, grid_size, cls_token=False):
    grid_h = np.arange(grid_size, dtype=np.float32)
    grid_w = np.arange(grid_size, dtype=np.float32)
    grid = np.meshgrid(grid_w, grid_h)         # w goes first (MAE convention)
    grid = np.stack(grid, axis=0).reshape([2, 1, grid_size, grid_size])
    emb_h = _get_1d_sincos(embed_dim // 2, grid[0])
    emb_w = _get_1d_sincos(embed_dim // 2, grid[1])
    pe = np.concatenate([emb_h, emb_w], axis=1)
    if cls_token:
        pe = np.concatenate([np.zeros([1, embed_dim]), pe], axis=0)
    return pe.astype(np.float32)


def _make_block_params(key, dim, mlp_ratio):
    hidden = int(dim * mlp_ratio)
    ks = jax.random.split(key, 4)
    return {
        "ln1_w": jnp.ones((1, dim), jnp.float32),
        "ln1_b": jnp.zeros((1, dim), jnp.float32),
        "qkv_w": _xavier(ks[0], 3 * dim, dim),            # (dim, 3*dim)
        "qkv_b": jnp.zeros((1, 3 * dim), jnp.float32),
        "proj_w": _xavier(ks[1], dim, dim),               # (dim, dim)
        "proj_b": jnp.zeros((1, dim), jnp.float32),
        "ln2_w": jnp.ones((1, dim), jnp.float32),
        "ln2_b": jnp.zeros((1, dim), jnp.float32),
        "fc1_w": _xavier(ks[2], hidden, dim),             # (dim, hidden)
        "fc1_b": jnp.zeros((1, hidden), jnp.float32),
        "fc2_w": _xavier(ks[3], dim, hidden),             # (hidden, dim)
        "fc2_b": jnp.zeros((1, dim), jnp.float32),
    }


def _stack_blocks(key, depth, dim, mlp_ratio):
    per = [_make_block_params(k, dim, mlp_ratio) for k in jax.random.split(key, depth)]
    return {k: jnp.stack([p[k] for p in per], axis=0) for k in _BLK_KEYS}


def init_params(key):
    keys = jax.random.split(key, 7)
    params = {}
    params["patch_w"] = _xavier(keys[0], EMBED, PATCH_DIM)        # (PATCH_DIM, EMBED)
    params["patch_b"] = jnp.zeros((1, EMBED), jnp.float32)
    params["cls_token"] = 0.02 * jax.random.normal(keys[1], (1, EMBED), jnp.float32)
    params["mask_token"] = 0.02 * jax.random.normal(keys[2], (1, DEC_EMBED), jnp.float32)
    pe = jnp.asarray(_get_2d_sincos_pos_embed(EMBED, GRID, cls_token=True))     # (L+1, E)
    params["pos_cls"] = pe[:1]
    params["pos_patch"] = pe[1:]
    params["dec_pos"] = jnp.asarray(
        _get_2d_sincos_pos_embed(DEC_EMBED, GRID, cls_token=True))              # (L+1, Dd)
    params["enc"] = _stack_blocks(keys[3], DEPTH, EMBED, MLP_RATIO)
    params["enc_norm_w"] = jnp.ones((1, EMBED), jnp.float32)
    params["enc_norm_b"] = jnp.zeros((1, EMBED), jnp.float32)
    params["dec_embed_w"] = _xavier(keys[4], DEC_EMBED, EMBED)
    params["dec_embed_b"] = jnp.zeros((1, DEC_EMBED), jnp.float32)
    params["dec"] = _stack_blocks(keys[5], DEC_DEPTH, DEC_EMBED, MLP_RATIO)
    params["dec_norm_w"] = jnp.ones((1, DEC_EMBED), jnp.float32)
    params["dec_norm_b"] = jnp.zeros((1, DEC_EMBED), jnp.float32)
    params["dec_pred_w"] = _xavier(keys[6], PATCH_DIM, DEC_EMBED)
    params["dec_pred_b"] = jnp.zeros((1, PATCH_DIM), jnp.float32)
    return params


def _weight_list(params):
    w = [params["patch_w"], params["patch_b"], params["cls_token"],
         params["pos_cls"], params["pos_patch"]]
    w += [params["enc"][k] for k in _BLK_KEYS]
    w += [params["enc_norm_w"], params["enc_norm_b"],
          params["dec_embed_w"], params["dec_embed_b"],
          params["mask_token"], params["dec_pos"]]
    w += [params["dec"][k] for k in _BLK_KEYS]
    w += [params["dec_norm_w"], params["dec_norm_b"],
          params["dec_pred_w"], params["dec_pred_b"]]
    return w


# ------------------------- glue (layout plumbing only) -----------------------
def patchify(imgs):
    """(B, 3, H, W) -> (B, L, p*p*3), feature order (ph, pw, c) as in the module."""
    B, C, H, W = imgs.shape
    p = PATCH
    h, w = H // p, W // p
    x = imgs.reshape(B, C, h, p, w, p)
    x = jnp.transpose(x, (0, 2, 4, 3, 5, 1))   # n h w p q c
    return x.reshape(B, h * w, p * p * C)


def _extract_conv_patches(imgs):
    """(B, 3, H, W) -> (B, L, c*p*p), feature order (c, ph, pw) = Conv2d weight layout."""
    B, C, H, W = imgs.shape
    p = PATCH
    h, w = H // p, W // p
    x = imgs.reshape(B, C, h, p, w, p)
    x = jnp.transpose(x, (0, 2, 4, 1, 3, 5))   # n h w c p q
    return x.reshape(B, h * w, C * p * p)


# ------------------------- MAE forward --------------------------------------
@functools.partial(jax.jit, static_argnums=(2,))
def mae_forward(params, imgs, mask_ratio, mask_key):
    B = imgs.shape[0]
    L = NUM_PATCHES
    len_keep = int(L * (1 - mask_ratio))
    assert len_keep == LEN_KEEP  # kernel is specialized at the default mask ratio

    # layout plumbing + random masking indices (argsort has no Pallas equivalent)
    patches = _extract_conv_patches(imgs)            # (B, L, PATCH_DIM) conv layout
    target = patchify(imgs)                          # (B, L, PATCH_DIM) patchify layout
    noise = jax.random.uniform(mask_key, (B, L))
    ids_shuffle = jnp.argsort(noise, axis=1)
    ids_restore = jnp.argsort(ids_shuffle, axis=1)
    ids_keep = ids_shuffle[:, :len_keep]
    mask = jnp.ones((B, L), jnp.float32).at[:, :len_keep].set(0.0)
    mask = jnp.take_along_axis(mask, ids_restore, axis=1)
    # one-hot gather matrices so the in-kernel gathers are plain MXU matmuls
    sel_keep = jax.nn.one_hot(ids_keep, L, dtype=jnp.float32)         # (B, KEEP, L)
    sel_restore = jax.nn.one_hot(ids_restore, L, dtype=jnp.float32)   # (B, L, L)

    weights = _weight_list(params)
    data = [patches, target, mask[:, :, None], sel_keep, sel_restore]
    in_specs = [_batch_spec(a.shape) for a in data] + [_full_spec(w.shape) for w in weights]
    out_shape = (jax.ShapeDtypeStruct((B, L, PATCH_DIM), jnp.float32),
                 jax.ShapeDtypeStruct((B, 1, 2), jnp.float32))
    out_specs = (_batch_spec((B, L, PATCH_DIM)), _batch_spec((B, 1, 2)))

    pred, loss_parts = pl.pallas_call(
        _mae_kernel,
        out_shape=out_shape,
        grid=(B,),
        in_specs=in_specs,
        out_specs=out_specs,
        compiler_params=pltpu.CompilerParams(dimension_semantics=("parallel",)),
    )(*data, *weights)

    # trivial cross-batch scalar combine (2 sums + 1 divide); kept outside so the
    # batch grid axis can stay "parallel" for v7x megacore.
    loss = jnp.sum(loss_parts[:, 0, 0]) / jnp.sum(loss_parts[:, 0, 1])
    return loss, pred, mask


# ------------------------- main ----------------------------------------------
if __name__ == "__main__":
    root = jax.random.PRNGKey(0)
    k_param, k_img, k_mask = jax.random.split(root, 3)

    params = init_params(k_param)
    imgs = jax.random.normal(k_img, (2, IN_CH, IMG, IMG), jnp.float32)  # (N, C, H, W)

    loss, pred, mask = mae_forward(params, imgs, MASK_RATIO, k_mask)
    jax.block_until_ready((loss, pred, mask))

    assert pred.shape == (2, NUM_PATCHES, PATCH_DIM)
    assert mask.shape == (2, NUM_PATCHES)
    assert bool(jnp.isfinite(loss))
    print("KERNEL_OK")
</pallas_src>

<mosaic_0001>
module attributes {stable_mosaic.version = 11 : i64} {
  func.func @_mae_kernel(%arg0: i32, %arg1: memref<1x16x48xf32, #tpu.memory_space<vmem>>, %arg2: memref<1x16x48xf32, #tpu.memory_space<vmem>>, %arg3: memref<1x16x1xf32, #tpu.memory_space<vmem>>, %arg4: memref<1x4x16xf32, #tpu.memory_space<vmem>>, %arg5: memref<1x16x16xf32, #tpu.memory_space<vmem>>, %arg6: memref<48x32xf32, #tpu.memory_space<vmem>>, %arg7: memref<1x32xf32, #tpu.memory_space<vmem>>, %arg8: memref<1x32xf32, #tpu.memory_space<vmem>>, %arg9: memref<1x32xf32, #tpu.memory_space<vmem>>, %arg10: memref<16x32xf32, #tpu.memory_space<vmem>>, %arg11: memref<2x1x32xf32, #tpu.memory_space<vmem>>, %arg12: memref<2x1x32xf32, #tpu.memory_space<vmem>>, %arg13: memref<2x32x96xf32, #tpu.memory_space<vmem>>, %arg14: memref<2x1x96xf32, #tpu.memory_space<vmem>>, %arg15: memref<2x32x32xf32, #tpu.memory_space<vmem>>, %arg16: memref<2x1x32xf32, #tpu.memory_space<vmem>>, %arg17: memref<2x1x32xf32, #tpu.memory_space<vmem>>, %arg18: memref<2x1x32xf32, #tpu.memory_space<vmem>>, %arg19: memref<2x32x128xf32, #tpu.memory_space<vmem>>, %arg20: memref<2x1x128xf32, #tpu.memory_space<vmem>>, %arg21: memref<2x128x32xf32, #tpu.memory_space<vmem>>, %arg22: memref<2x1x32xf32, #tpu.memory_space<vmem>>, %arg23: memref<1x32xf32, #tpu.memory_space<vmem>>, %arg24: memref<1x32xf32, #tpu.memory_space<vmem>>, %arg25: memref<32x32xf32, #tpu.memory_space<vmem>>, %arg26: memref<1x32xf32, #tpu.memory_space<vmem>>, %arg27: memref<1x32xf32, #tpu.memory_space<vmem>>, %arg28: memref<17x32xf32, #tpu.memory_space<vmem>>, %arg29: memref<2x1x32xf32, #tpu.memory_space<vmem>>, %arg30: memref<2x1x32xf32, #tpu.memory_space<vmem>>, %arg31: memref<2x32x96xf32, #tpu.memory_space<vmem>>, %arg32: memref<2x1x96xf32, #tpu.memory_space<vmem>>, %arg33: memref<2x32x32xf32, #tpu.memory_space<vmem>>, %arg34: memref<2x1x32xf32, #tpu.memory_space<vmem>>, %arg35: memref<2x1x32xf32, #tpu.memory_space<vmem>>, %arg36: memref<2x1x32xf32, #tpu.memory_space<vmem>>, %arg37: memref<2x32x128xf32, #tpu.memory_space<vmem>>, %arg38: memref<2x1x128xf32, #tpu.memory_space<vmem>>, %arg39: memref<2x128x32xf32, #tpu.memory_space<vmem>>, %arg40: memref<2x1x32xf32, #tpu.memory_space<vmem>>, %arg41: memref<1x32xf32, #tpu.memory_space<vmem>>, %arg42: memref<1x32xf32, #tpu.memory_space<vmem>>, %arg43: memref<32x48xf32, #tpu.memory_space<vmem>>, %arg44: memref<1x48xf32, #tpu.memory_space<vmem>>, %arg45: memref<1x16x48xf32, #tpu.memory_space<vmem>>, %arg46: memref<1x1x2xf32, #tpu.memory_space<vmem>>) attributes {dimension_semantics = [#tpu.dimension_semantics<parallel>], iteration_bounds = array<i64: 2>, scalar_prefetch = 0 : i64, scratch_operands = 0 : i64, tpu.core_type = #tpu.core_type<tc>, window_params = [{transform_indices = @transform_0, window_bounds = array<i64: 1, 16, 48>}, {transform_indices = @transform_1, window_bounds = array<i64: 1, 16, 48>}, {transform_indices = @transform_2, window_bounds = array<i64: 1, 16, 1>}, {transform_indices = @transform_3, window_bounds = array<i64: 1, 4, 16>}, {transform_indices = @transform_4, window_bounds = array<i64: 1, 16, 16>}, {pipeline_mode = #tpu.pipeline_mode<synchronous>, transform_indices = @transform_5, window_bounds = array<i64: 48, 32>}, {pipeline_mode = #tpu.pipeline_mode<synchronous>, transform_indices = @transform_6, window_bounds = array<i64: 1, 32>}, {pipeline_mode = #tpu.pipeline_mode<synchronous>, transform_indices = @transform_7, window_bounds = array<i64: 1, 32>}, {pipeline_mode = #tpu.pipeline_mode<synchronous>, transform_indices = @transform_8, window_bounds = array<i64: 1, 32>}, {pipeline_mode = #tpu.pipeline_mode<synchronous>, transform_indices = @transform_9, window_bounds = array<i64: 16, 32>}, {pipeline_mode = #tpu.pipeline_mode<synchronous>, transform_indices = @transform_10, window_bounds = array<i64: 2, 1, 32>}, {pipeline_mode = #tpu.pipeline_mode<synchronous>, transform_indices = @transform_11, window_bounds = array<i64: 2, 1, 32>}, {pipeline_mode = #tpu.pipeline_mode<synchronous>, transform_indices = @transform_12, window_bounds = array<i64: 2, 32, 96>}, {pipeline_mode = #tpu.pipeline_mode<synchronous>, transform_indices = @transform_13, window_bounds = array<i64: 2, 1, 96>}, {pipeline_mode = #tpu.pipeline_mode<synchronous>, transform_indices = @transform_14, window_bounds = array<i64: 2, 32, 32>}, {pipeline_mode = #tpu.pipeline_mode<synchronous>, transform_indices = @transform_15, window_bounds = array<i64: 2, 1, 32>}, {pipeline_mode = #tpu.pipeline_mode<synchronous>, transform_indices = @transform_16, window_bounds = array<i64: 2, 1, 32>}, {pipeline_mode = #tpu.pipeline_mode<synchronous>, transform_indices = @transform_17, window_bounds = array<i64: 2, 1, 32>}, {pipeline_mode = #tpu.pipeline_mode<synchronous>, transform_indices = @transform_18, window_bounds = array<i64: 2, 32, 128>}, {pipeline_mode = #tpu.pipeline_mode<synchronous>, transform_indices = @transform_19, window_bounds = array<i64: 2, 1, 128>}, {pipeline_mode = #tpu.pipeline_mode<synchronous>, transform_indices = @transform_20, window_bounds = array<i64: 2, 128, 32>}, {pipeline_mode = #tpu.pipeline_mode<synchronous>, transform_indices = @transform_21, window_bounds = array<i64: 2, 1, 32>}, {pipeline_mode = #tpu.pipeline_mode<synchronous>, transform_indices = @transform_22, window_bounds = array<i64: 1, 32>}, {pipeline_mode = #tpu.pipeline_mode<synchronous>, transform_indices = @transform_23, window_bounds = array<i64: 1, 32>}, {pipeline_mode = #tpu.pipeline_mode<synchronous>, transform_indices = @transform_24, window_bounds = array<i64: 32, 32>}, {pipeline_mode = #tpu.pipeline_mode<synchronous>, transform_indices = @transform_25, window_bounds = array<i64: 1, 32>}, {pipeline_mode = #tpu.pipeline_mode<synchronous>, transform_indices = @transform_26, window_bounds = array<i64: 1, 32>}, {pipeline_mode = #tpu.pipeline_mode<synchronous>, transform_indices = @transform_27, window_bounds = array<i64: 17, 32>}, {pipeline_mode = #tpu.pipeline_mode<synchronous>, transform_indices = @transform_28, window_bounds = array<i64: 2, 1, 32>}, {pipeline_mode = #tpu.pipeline_mode<synchronous>, transform_indices = @transform_29, window_bounds = array<i64: 2, 1, 32>}, {pipeline_mode = #tpu.pipeline_mode<synchronous>, transform_indices = @transform_30, window_bounds = array<i64: 2, 32, 96>}, {pipeline_mode = #tpu.pipeline_mode<synchronous>, transform_indices = @transform_31, window_bounds = array<i64: 2, 1, 96>}, {pipeline_mode = #tpu.pipeline_mode<synchronous>, transform_indices = @transform_32, window_bounds = array<i64: 2, 32, 32>}, {pipeline_mode = #tpu.pipeline_mode<synchronous>, transform_indices = @transform_33, window_bounds = array<i64: 2, 1, 32>}, {pipeline_mode = #tpu.pipeline_mode<synchronous>, transform_indices = @transform_34, window_bounds = array<i64: 2, 1, 32>}, {pipeline_mode = #tpu.pipeline_mode<synchronous>, transform_indices = @transform_35, window_bounds = array<i64: 2, 1, 32>}, {pipeline_mode = #tpu.pipeline_mode<synchronous>, transform_indices = @transform_36, window_bounds = array<i64: 2, 32, 128>}, {pipeline_mode = #tpu.pipeline_mode<synchronous>, transform_indices = @transform_37, window_bounds = array<i64: 2, 1, 128>}, {pipeline_mode = #tpu.pipeline_mode<synchronous>, transform_indices = @transform_38, window_bounds = array<i64: 2, 128, 32>}, {pipeline_mode = #tpu.pipeline_mode<synchronous>, transform_indices = @transform_39, window_bounds = array<i64: 2, 1, 32>}, {pipeline_mode = #tpu.pipeline_mode<synchronous>, transform_indices = @transform_40, window_bounds = array<i64: 1, 32>}, {pipeline_mode = #tpu.pipeline_mode<synchronous>, transform_indices = @transform_41, window_bounds = array<i64: 1, 32>}, {pipeline_mode = #tpu.pipeline_mode<synchronous>, transform_indices = @transform_42, window_bounds = array<i64: 32, 48>}, {pipeline_mode = #tpu.pipeline_mode<synchronous>, transform_indices = @transform_43, window_bounds = array<i64: 1, 48>}, {transform_indices = @transform_44, window_bounds = array<i64: 1, 16, 48>}, {transform_indices = @transform_45, window_bounds = array<i64: 1, 1, 2>}]} {
    %c0 = arith.constant 0 : index
    %c0_0 = arith.constant 0 : index
    %c0_1 = arith.constant 0 : index
    %0 = vector.load %arg1[%c0, %c0_0, %c0_1] : memref<1x16x48xf32, #tpu.memory_space<vmem>>, vector<1x16x48xf32>
    %1 = vector.shape_cast %0 : vector<1x16x48xf32> to vector<16x48xf32>
    %c0_2 = arith.constant 0 : index
    %c0_3 = arith.constant 0 : index
    %2 = vector.load %arg6[%c0_2, %c0_3] : memref<48x32xf32, #tpu.memory_space<vmem>>, vector<48x32xf32>
    %cst = arith.constant dense<0.000000e+00> : vector<16x32xf32>
    %3 = tpu.matmul %1, %2, %cst {dimension_numbers = #tpu.dot_dimension_numbers<[1], [0], [0], [1], [0, 0, 1, 1], [], []>} : vector<16x48xf32>, vector<48x32xf32>, vector<16x32xf32> -> vector<16x32xf32>
    %c0_4 = arith.constant 0 : index
    %c0_5 = arith.constant 0 : index
    %4 = vector.load %arg7[%c0_4, %c0_5] : memref<1x32xf32, #tpu.memory_space<vmem>>, vector<1x32xf32>
    %5 = vector.broadcast %4 : vector<1x32xf32> to vector<16x32xf32>
    %6 = arith.addf %3, %5 : vector<16x32xf32>
    %c0_6 = arith.constant 0 : index
    %c0_7 = arith.constant 0 : index
    %7 = vector.load %arg10[%c0_6, %c0_7] : memref<16x32xf32, #tpu.memory_space<vmem>>, vector<16x32xf32>
    %8 = arith.addf %6, %7 : vector<16x32xf32>
    %c0_8 = arith.constant 0 : index
    %c0_9 = arith.constant 0 : index
    %c0_10 = arith.constant 0 : index
    %9 = vector.load %arg4[%c0_8, %c0_9, %c0_10] : memref<1x4x16xf32, #tpu.memory_space<vmem>>, vector<1x4x16xf32>
    %10 = vector.shape_cast %9 : vector<1x4x16xf32> to vector<4x16xf32>
    %cst_11 = arith.constant dense<0.000000e+00> : vector<4x32xf32>
    %11 = tpu.matmul %10, %8, %cst_11 {dimension_numbers = #tpu.dot_dimension_numbers<[1], [0], [0], [1], [0, 0, 1, 1], [], []>} : vector<4x16xf32>, vector<16x32xf32>, vector<4x32xf32> -> vector<4x32xf32>
    %c0_12 = arith.constant 0 : index
    %c0_13 = arith.constant 0 : index
    %12 = vector.load %arg8[%c0_12, %c0_13] : memref<1x32xf32, #tpu.memory_space<vmem>>, vector<1x32xf32>
    %c0_14 = arith.constant 0 : index
    %c0_15 = arith.constant 0 : index
    %13 = vector.load %arg9[%c0_14, %c0_15] : memref<1x32xf32, #tpu.memory_space<vmem>>, vector<1x32xf32>
    %14 = arith.addf %12, %13 : vector<1x32xf32>
    %15 = tpu.concatenate %14, %11 in 0 : vector<1x32xf32>, vector<4x32xf32> -> vector<5x32xf32>
    %c0_16 = arith.constant 0 : index
    %c0_17 = arith.constant 0 : index
    %c0_18 = arith.constant 0 : index
    %16 = vector.load %arg11[%c0_16, %c0_17, %c0_18] : memref<2x1x32xf32, #tpu.memory_space<vmem>>, vector<1x1x32xf32>
    %17 = vector.shape_cast %16 : vector<1x1x32xf32> to vector<1x32xf32>
    %c0_19 = arith.constant 0 : index
    %c0_20 = arith.constant 0 : index
    %c0_21 = arith.constant 0 : index
    %18 = vector.load %arg12[%c0_19, %c0_20, %c0_21] : memref<2x1x32xf32, #tpu.memory_space<vmem>>, vector<1x1x32xf32>
    %19 = vector.shape_cast %18 : vector<1x1x32xf32> to vector<1x32xf32>
    %cst_22 = arith.constant dense<0.000000e+00> : vector<5xf32>
    %20 = vector.multi_reduction <add>, %15, %cst_22 [1] : vector<5x32xf32> to vector<5xf32>
    %21 = vector.shape_cast %20 : vector<5xf32> to vector<5x1xf32>
    %cst_23 = arith.constant 3.200000e+01 : f32
    %22 = vector.broadcast %cst_23 : f32 to vector<5x1xf32>
    %23 = arith.divf %21, %22 : vector<5x1xf32>
    %24 = vector.broadcast %23 : vector<5x1xf32> to vector<5x32xf32>
    %25 = arith.subf %15, %24 : vector<5x32xf32>
    %26 = arith.mulf %25, %25 : vector<5x32xf32>
    %cst_24 = arith.constant dense<0.000000e+00> : vector<5xf32>
    %27 = vector.multi_reduction <add>, %26, %cst_24 [1] : vector<5x32xf32> to vector<5xf32>
    %28 = vector.shape_cast %27 : vector<5xf32> to vector<5x1xf32>
    %cst_25 = arith.constant 3.200000e+01 : f32
    %29 = vector.broadcast %cst_25 : f32 to vector<5x1xf32>
    %30 = arith.divf %28, %29 : vector<5x1xf32>
    %31 = vector.broadcast %23 : vector<5x1xf32> to vector<5x32xf32>
    %32 = arith.subf %15, %31 : vector<5x32xf32>
    %cst_26 = arith.constant 9.99999974E-6 : f32
    %33 = vector.broadcast %cst_26 : f32 to vector<5x1xf32>
    %34 = arith.addf %30, %33 : vector<5x1xf32>
    %35 = math.rsqrt %34 : vector<5x1xf32>
    %36 = vector.broadcast %35 : vector<5x1xf32> to vector<5x32xf32>
    %37 = arith.mulf %32, %36 : vector<5x32xf32>
    %38 = vector.broadcast %17 : vector<1x32xf32> to vector<5x32xf32>
    %39 = arith.mulf %37, %38 : vector<5x32xf32>
    %40 = vector.broadcast %19 : vector<1x32xf32> to vector<5x32xf32>
    %41 = arith.addf %39, %40 : vector<5x32xf32>
    %c0_27 = arith.constant 0 : index
    %c0_28 = arith.constant 0 : index
    %c0_29 = arith.constant 0 : index
    %42 = vector.load %arg13[%c0_27, %c0_28, %c0_29] : memref<2x32x96xf32, #tpu.memory_space<vmem>>, vector<1x32x96xf32>
    %43 = vector.shape_cast %42 : vector<1x32x96xf32> to vector<32x96xf32>
    %c0_30 = arith.constant 0 : index
    %c0_31 = arith.constant 0 : index
    %c0_32 = arith.constant 0 : index
    %44 = vector.load %arg14[%c0_30, %c0_31, %c0_32] : memref<2x1x96xf32, #tpu.memory_space<vmem>>, vector<1x1x96xf32>
    %45 = vector.shape_cast %44 : vector<1x1x96xf32> to vector<1x96xf32>
    %c0_33 = arith.constant 0 : index
    %c0_34 = arith.constant 0 : index
    %c0_35 = arith.constant 0 : index
    %46 = vector.load %arg15[%c0_33, %c0_34, %c0_35] : memref<2x32x32xf32, #tpu.memory_space<vmem>>, vector<1x32x32xf32>
    %47 = vector.shape_cast %46 : vector<1x32x32xf32> to vector<32x32xf32>
    %c0_36 = arith.constant 0 : index
    %c0_37 = arith.constant 0 : index
    %c0_38 = arith.constant 0 : index
    %48 = vector.load %arg16[%c0_36, %c0_37, %c0_38] : memref<2x1x32xf32, #tpu.memory_space<vmem>>, vector<1x1x32xf32>
    %49 = vector.shape_cast %48 : vector<1x1x32xf32> to vector<1x32xf32>
    %cst_39 = arith.constant dense<0.000000e+00> : vector<5x96xf32>
    %50 = tpu.matmul %41, %43, %cst_39 {dimension_numbers = #tpu.dot_dimension_numbers<[1], [0], [0], [1], [0, 0, 1, 1], [], []>} : vector<5x32xf32>, vector<32x96xf32>, vector<5x96xf32> -> vector<5x96xf32>
    %51 = vector.broadcast %45 : vector<1x96xf32> to vector<5x96xf32>
    %52 = arith.addf %50, %51 : vector<5x96xf32>
    %53 = vector.extract_strided_slice %52 {offsets = [0, 0], sizes = [5, 8], strides = [1, 1]} : vector<5x96xf32> to vector<5x8xf32>
    %54 = vector.shape_cast %53 : vector<5x8xf32> to vector<1x5x8xf32>
    %55 = vector.extract_strided_slice %52 {offsets = [0, 8], sizes = [5, 8], strides = [1, 1]} : vector<5x96xf32> to vector<5x8xf32>
    %56 = vector.shape_cast %55 : vector<5x8xf32> to vector<1x5x8xf32>
    %57 = vector.extract_strided_slice %52 {offsets = [0, 16], sizes = [5, 8], strides = [1, 1]} : vector<5x96xf32> to vector<5x8xf32>
    %58 = vector.shape_cast %57 : vector<5x8xf32> to vector<1x5x8xf32>
    %59 = vector.extract_strided_slice %52 {offsets = [0, 24], sizes = [5, 8], strides = [1, 1]} : vector<5x96xf32> to vector<5x8xf32>
    %60 = vector.shape_cast %59 : vector<5x8xf32> to vector<1x5x8xf32>
    %61 = tpu.concatenate %54, %56, %58, %60 in 0 : vector<1x5x8xf32>, vector<1x5x8xf32>, vector<1x5x8xf32>, vector<1x5x8xf32> -> vector<4x5x8xf32>
    %cst_40 = arith.constant 0.353553385 : f32
    %62 = vector.broadcast %cst_40 : f32 to vector<4x5x8xf32>
    %63 = arith.mulf %61, %62 : vector<4x5x8xf32>
    %64 = vector.extract_strided_slice %52 {offsets = [0, 32], sizes = [5, 8], strides = [1, 1]} : vector<5x96xf32> to vector<5x8xf32>
    %65 = vector.shape_cast %64 : vector<5x8xf32> to vector<1x5x8xf32>
    %66 = vector.extract_strided_slice %52 {offsets = [0, 40], sizes = [5, 8], strides = [1, 1]} : vector<5x96xf32> to vector<5x8xf32>
    %67 = vector.shape_cast %66 : vector<5x8xf32> to vector<1x5x8xf32>
    %68 = vector.extract_strided_slice %52 {offsets = [0, 48], sizes = [5, 8], strides = [1, 1]} : vector<5x96xf32> to vector<5x8xf32>
    %69 = vector.shape_cast %68 : vector<5x8xf32> to vector<1x5x8xf32>
    %70 = vector.extract_strided_slice %52 {offsets = [0, 56], sizes = [5, 8], strides = [1, 1]} : vector<5x96xf32> to vector<5x8xf32>
    %71 = vector.shape_cast %70 : vector<5x8xf32> to vector<1x5x8xf32>
    %72 = tpu.concatenate %65, %67, %69, %71 in 0 : vector<1x5x8xf32>, vector<1x5x8xf32>, vector<1x5x8xf32>, vector<1x5x8xf32> -> vector<4x5x8xf32>
    %73 = vector.extract_strided_slice %52 {offsets = [0, 64], sizes = [5, 8], strides = [1, 1]} : vector<5x96xf32> to vector<5x8xf32>
    %74 = vector.shape_cast %73 : vector<5x8xf32> to vector<1x5x8xf32>
    %75 = vector.extract_strided_slice %52 {offsets = [0, 72], sizes = [5, 8], strides = [1, 1]} : vector<5x96xf32> to vector<5x8xf32>
    %76 = vector.shape_cast %75 : vector<5x8xf32> to vector<1x5x8xf32>
    %77 = vector.extract_strided_slice %52 {offsets = [0, 80], sizes = [5, 8], strides = [1, 1]} : vector<5x96xf32> to vector<5x8xf32>
    %78 = vector.shape_cast %77 : vector<5x8xf32> to vector<1x5x8xf32>
    %79 = vector.extract_strided_slice %52 {offsets = [0, 88], sizes = [5, 8], strides = [1, 1]} : vector<5x96xf32> to vector<5x8xf32>
    %80 = vector.shape_cast %79 : vector<5x8xf32> to vector<1x5x8xf32>
    %81 = tpu.concatenate %74, %76, %78, %80 in 0 : vector<1x5x8xf32>, vector<1x5x8xf32>, vector<1x5x8xf32>, vector<1x5x8xf32> -> vector<4x5x8xf32>
    "tpu.trace_start"() <{level = 10 : i32, message = "hqd,hkd->hqk"}> : () -> ()
    %cst_41 = arith.constant dense<0.000000e+00> : vector<4x5x5xf32>
    %82 = tpu.matmul %63, %72, %cst_41 {dimension_numbers = #tpu.dot_dimension_numbers<[2], [2], [1], [1], [0, 0, 0, 1, 1, 1], [0], [0]>} : vector<4x5x8xf32>, vector<4x5x8xf32>, vector<4x5x5xf32> -> vector<4x5x5xf32>
    "tpu.trace_stop"() : () -> ()
    %cst_42 = arith.constant dense<0xFF800000> : vector<4x5xf32>
    %83 = vector.multi_reduction <maximumf>, %82, %cst_42 [2] : vector<4x5x5xf32> to vector<4x5xf32>
    %84 = vector.shape_cast %83 : vector<4x5xf32> to vector<4x5x1xf32>
    %85 = vector.broadcast %84 : vector<4x5x1xf32> to vector<4x5x5xf32>
    %86 = arith.subf %82, %85 : vector<4x5x5xf32>
    %87 = math.exp %86 : vector<4x5x5xf32>
    %cst_43 = arith.constant dense<0.000000e+00> : vector<4x5xf32>
    %88 = vector.multi_reduction <add>, %87, %cst_43 [2] : vector<4x5x5xf32> to vector<4x5xf32>
    %89 = vector.shape_cast %88 : vector<4x5xf32> to vector<4x5x1xf32>
    %90 = tpu.reciprocal %89 {approx = true} : vector<4x5x1xf32> -> vector<4x5x1xf32>
    %91 = vector.broadcast %90 : vector<4x5x1xf32> to vector<4x5x5xf32>
    %92 = arith.mulf %87, %91 : vector<4x5x5xf32>
    "tpu.trace_start"() <{level = 10 : i32, message = "hqk,hkd->hqd"}> : () -> ()
    %cst_44 = arith.constant dense<0.000000e+00> : vector<4x5x8xf32>
    %93 = tpu.matmul %92, %81, %cst_44 {dimension_numbers = #tpu.dot_dimension_numbers<[2], [1], [1], [2], [0, 0, 0, 1, 1, 2], [0], [0]>} : vector<4x5x5xf32>, vector<4x5x8xf32>, vector<4x5x8xf32> -> vector<4x5x8xf32>
    "tpu.trace_stop"() : () -> ()
    %94 = vector.extract_strided_slice %93 {offsets = [0, 0, 0], sizes = [1, 5, 8], strides = [1, 1, 1]} : vector<4x5x8xf32> to vector<1x5x8xf32>
    %95 = vector.shape_cast %94 : vector<1x5x8xf32> to vector<5x8xf32>
    %96 = vector.extract_strided_slice %93 {offsets = [1, 0, 0], sizes = [1, 5, 8], strides = [1, 1, 1]} : vector<4x5x8xf32> to vector<1x5x8xf32>
    %97 = vector.shape_cast %96 : vector<1x5x8xf32> to vector<5x8xf32>
    %98 = vector.extract_strided_slice %93 {offsets = [2, 0, 0], sizes = [1, 5, 8], strides = [1, 1, 1]} : vector<4x5x8xf32> to vector<1x5x8xf32>
    %99 = vector.shape_cast %98 : vector<1x5x8xf32> to vector<5x8xf32>
    %100 = vector.extract_strided_slice %93 {offsets = [3, 0, 0], sizes = [1, 5, 8], strides = [1, 1, 1]} : vector<4x5x8xf32> to vector<1x5x8xf32>
    %101 = vector.shape_cast %100 : vector<1x5x8xf32> to vector<5x8xf32>
    %102 = tpu.concatenate %95, %97, %99, %101 in 1 : vector<5x8xf32>, vector<5x8xf32>, vector<5x8xf32>, vector<5x8xf32> -> vector<5x32xf32>
    %cst_45 = arith.constant dense<0.000000e+00> : vector<5x32xf32>
    %103 = tpu.matmul %102, %47, %cst_45 {dimension_numbers = #tpu.dot_dimension_numbers<[1], [0], [0], [1], [0, 0, 1, 1], [], []>} : vector<5x32xf32>, vector<32x32xf32>, vector<5x32xf32> -> vector<5x32xf32>
    %104 = vector.broadcast %49 : vector<1x32xf32> to vector<5x32xf32>
    %105 = arith.addf %103, %104 : vector<5x32xf32>
    %106 = arith.addf %15, %105 : vector<5x32xf32>
    %c0_46 = arith.constant 0 : index
    %c0_47 = arith.constant 0 : index
    %c0_48 = arith.constant 0 : index
    %107 = vector.load %arg17[%c0_46, %c0_47, %c0_48] : memref<2x1x32xf32, #tpu.memory_space<vmem>>, vector<1x1x32xf32>
    %108 = vector.shape_cast %107 : vector<1x1x32xf32> to vector<1x32xf32>
    %c0_49 = arith.constant 0 : index
    %c0_50 = arith.constant 0 : index
    %c0_51 = arith.constant 0 : index
    %109 = vector.load %arg18[%c0_49, %c0_50, %c0_51] : memref<2x1x32xf32, #tpu.memory_space<vmem>>, vector<1x1x32xf32>
    %110 = vector.shape_cast %109 : vector<1x1x32xf32> to vector<1x32xf32>
    %cst_52 = arith.constant dense<0.000000e+00> : vector<5xf32>
    %111 = vector.multi_reduction <add>, %106, %cst_52 [1] : vector<5x32xf32> to vector<5xf32>
    %112 = vector.shape_cast %111 : vector<5xf32> to vector<5x1xf32>
    %cst_53 = arith.constant 3.200000e+01 : f32
    %113 = vector.broadcast %cst_53 : f32 to vector<5x1xf32>
    %114 = arith.divf %112, %113 : vector<5x1xf32>
    %115 = vector.broadcast %114 : vector<5x1xf32> to vector<5x32xf32>
    %116 = arith.subf %106, %115 : vector<5x32xf32>
    %117 = arith.mulf %116, %116 : vector<5x32xf32>
    %cst_54 = arith.constant dense<0.000000e+00> : vector<5xf32>
    %118 = vector.multi_reduction <add>, %117, %cst_54 [1] : vector<5x32xf32> to vector<5xf32>
    %119 = vector.shape_cast %118 : vector<5xf32> to vector<5x1xf32>
    %cst_55 = arith.constant 3.200000e+01 : f32
    %120 = vector.broadcast %cst_55 : f32 to vector<5x1xf32>
    %121 = arith.divf %119, %120 : vector<5x1xf32>
    %122 = vector.broadcast %114 : vector<5x1xf32> to vector<5x32xf32>
    %123 = arith.subf %106, %122 : vector<5x32xf32>
    %cst_56 = arith.constant 9.99999974E-6 : f32
    %124 = vector.broadcast %cst_56 : f32 to vector<5x1xf32>
    %125 = arith.addf %121, %124 : vector<5x1xf32>
    %126 = math.rsqrt %125 : vector<5x1xf32>
    %127 = vector.broadcast %126 : vector<5x1xf32> to vector<5x32xf32>
    %128 = arith.mulf %123, %127 : vector<5x32xf32>
    %129 = vector.broadcast %108 : vector<1x32xf32> to vector<5x32xf32>
    %130 = arith.mulf %128, %129 : vector<5x32xf32>
    %131 = vector.broadcast %110 : vector<1x32xf32> to vector<5x32xf32>
    %132 = arith.addf %130, %131 : vector<5x32xf32>
    %c0_57 = arith.constant 0 : index
    %c0_58 = arith.constant 0 : index
    %c0_59 = arith.constant 0 : index
    %133 = vector.load %arg19[%c0_57, %c0_58, %c0_59] : memref<2x32x128xf32, #tpu.memory_space<vmem>>, vector<1x32x128xf32>
    %134 = vector.shape_cast %133 : vector<1x32x128xf32> to vector<32x128xf32>
    %cst_60 = arith.constant dense<0.000000e+00> : vector<5x128xf32>
    %135 = tpu.matmul %132, %134, %cst_60 {dimension_numbers = #tpu.dot_dimension_numbers<[1], [0], [0], [1], [0, 0, 1, 1], [], []>} : vector<5x32xf32>, vector<32x128xf32>, vector<5x128xf32> -> vector<5x128xf32>
    %c0_61 = arith.constant 0 : index
    %c0_62 = arith.constant 0 : index
    %c0_63 = arith.constant 0 : index
    %136 = vector.load %arg20[%c0_61, %c0_62, %c0_63] : memref<2x1x128xf32, #tpu.memory_space<vmem>>, vector<1x1x128xf32>
    %137 = vector.shape_cast %136 : vector<1x1x128xf32> to vector<1x128xf32>
    %138 = vector.broadcast %137 : vector<1x128xf32> to vector<5x128xf32>
    %139 = arith.addf %135, %138 : vector<5x128xf32>
    %cst_64 = arith.constant 5.000000e-01 : f32
    %140 = vector.broadcast %cst_64 : f32 to vector<5x128xf32>
    %141 = arith.mulf %140, %139 : vector<5x128xf32>
    %cst_65 = arith.constant 0.707106769 : f32
    %142 = vector.broadcast %cst_65 : f32 to vector<5x128xf32>
    %143 = arith.mulf %139, %142 : vector<5x128xf32>
    %cst_66 = arith.constant 0.000000e+00 : f32
    %144 = vector.broadcast %cst_66 : f32 to vector<5x128xf32>
    %145 = arith.cmpf olt, %143, %144 : vector<5x128xf32>
    %cst_67 = arith.constant -1.000000e+00 : f32
    %cst_68 = arith.constant 1.000000e+00 : f32
    %146 = vector.broadcast %cst_67 : f32 to vector<5x128xf32>
    %147 = vector.broadcast %cst_68 : f32 to vector<5x128xf32>
    %148 = arith.select %145, %146, %147 : vector<5x128xi1>, vector<5x128xf32>
    %149 = math.absf %143 : vector<5x128xf32>
    %cst_69 = arith.constant 0.327591091 : f32
    %150 = vector.broadcast %cst_69 : f32 to vector<5x128xf32>
    %151 = arith.mulf %150, %149 : vector<5x128xf32>
    %cst_70 = arith.constant 1.000000e+00 : f32
    %152 = vector.broadcast %cst_70 : f32 to vector<5x128xf32>
    %153 = arith.addf %152, %151 : vector<5x128xf32>
    %cst_71 = arith.constant 1.000000e+00 : f32
    %154 = vector.broadcast %cst_71 : f32 to vector<5x128xf32>
    %155 = arith.divf %154, %153 : vector<5x128xf32>
    %cst_72 = arith.constant 1.06140542 : f32
    %156 = vector.broadcast %cst_72 : f32 to vector<5x128xf32>
    %157 = arith.mulf %156, %155 : vector<5x128xf32>
    %cst_73 = arith.constant -1.45315206 : f32
    %158 = vector.broadcast %cst_73 : f32 to vector<5x128xf32>
    %159 = arith.addf %157, %158 : vector<5x128xf32>
    %160 = arith.mulf %159, %155 : vector<5x128xf32>
    %cst_74 = arith.constant 1.42141378 : f32
    %161 = vector.broadcast %cst_74 : f32 to vector<5x128xf32>
    %162 = arith.addf %160, %161 : vector<5x128xf32>
    %163 = arith.mulf %162, %155 : vector<5x128xf32>
    %cst_75 = arith.constant -0.284496725 : f32
    %164 = vector.broadcast %cst_75 : f32 to vector<5x128xf32>
    %165 = arith.addf %163, %164 : vector<5x128xf32>
    %166 = arith.mulf %165, %155 : vector<5x128xf32>
    %cst_76 = arith.constant 0.254829586 : f32
    %167 = vector.broadcast %cst_76 : f32 to vector<5x128xf32>
    %168 = arith.addf %166, %167 : vector<5x128xf32>
    %169 = arith.mulf %168, %155 : vector<5x128xf32>
    %cst_77 = arith.constant 0.000000e+00 : f32
    %170 = vector.broadcast %cst_77 : f32 to vector<5x128xf32>
    %171 = arith.subf %170, %149 : vector<5x128xf32>
    %172 = arith.mulf %171, %149 : vector<5x128xf32>
    %173 = math.exp %172 : vector<5x128xf32>
    %174 = arith.mulf %169, %173 : vector<5x128xf32>
    %cst_78 = arith.constant 1.000000e+00 : f32
    %175 = vector.broadcast %cst_78 : f32 to vector<5x128xf32>
    %176 = arith.subf %175, %174 : vector<5x128xf32>
    %177 = arith.mulf %148, %176 : vector<5x128xf32>
    %cst_79 = arith.constant 1.000000e+00 : f32
    %178 = vector.broadcast %cst_79 : f32 to vector<5x128xf32>
    %179 = arith.addf %178, %177 : vector<5x128xf32>
    %180 = arith.mulf %141, %179 : vector<5x128xf32>
    %c0_80 = arith.constant 0 : index
    %c0_81 = arith.constant 0 : index
    %c0_82 = arith.constant 0 : index
    %181 = vector.load %arg21[%c0_80, %c0_81, %c0_82] : memref<2x128x32xf32, #tpu.memory_space<vmem>>, vector<1x128x32xf32>
    %182 = vector.shape_cast %181 : vector<1x128x32xf32> to vector<128x32xf32>
    %cst_83 = arith.constant dense<0.000000e+00> : vector<5x32xf32>
    %183 = tpu.matmul %180, %182, %cst_83 {dimension_numbers = #tpu.dot_dimension_numbers<[1], [0], [0], [1], [0, 0, 1, 1], [], []>} : vector<5x128xf32>, vector<128x32xf32>, vector<5x32xf32> -> vector<5x32xf32>
    %c0_84 = arith.constant 0 : index
    %c0_85 = arith.constant 0 : index
    %c0_86 = arith.constant 0 : index
    %184 = vector.load %arg22[%c0_84, %c0_85, %c0_86] : memref<2x1x32xf32, #tpu.memory_space<vmem>>, vector<1x1x32xf32>
    %185 = vector.shape_cast %184 : vector<1x1x32xf32> to vector<1x32xf32>
    %186 = vector.broadcast %185 : vector<1x32xf32> to vector<5x32xf32>
    %187 = arith.addf %183, %186 : vector<5x32xf32>
    %188 = arith.addf %106, %187 : vector<5x32xf32>
    %c1 = arith.constant 1 : index
    %c0_87 = arith.constant 0 : index
    %c0_88 = arith.constant 0 : index
    %189 = vector.load %arg11[%c1, %c0_87, %c0_88] : memref<2x1x32xf32, #tpu.memory_space<vmem>>, vector<1x1x32xf32>
    %190 = vector.shape_cast %189 : vector<1x1x32xf32> to vector<1x32xf32>
    %c1_89 = arith.constant 1 : index
    %c0_90 = arith.constant 0 : index
    %c0_91 = arith.constant 0 : index
    %191 = vector.load %arg12[%c1_89, %c0_90, %c0_91] : memref<2x1x32xf32, #tpu.memory_space<vmem>>, vector<1x1x32xf32>
    %192 = vector.shape_cast %191 : vector<1x1x32xf32> to vector<1x32xf32>
    %cst_92 = arith.constant dense<0.000000e+00> : vector<5xf32>
    %193 = vector.multi_reduction <add>, %188, %cst_92 [1] : vector<5x32xf32> to vector<5xf32>
    %194 = vector.shape_cast %193 : vector<5xf32> to vector<5x1xf32>
    %cst_93 = arith.constant 3.200000e+01 : f32
    %195 = vector.broadcast %cst_93 : f32 to vector<5x1xf32>
    %196 = arith.divf %194, %195 : vector<5x1xf32>
    %197 = vector.broadcast %196 : vector<5x1xf32> to vector<5x32xf32>
    %198 = arith.subf %188, %197 : vector<5x32xf32>
    %199 = arith.mulf %198, %198 : vector<5x32xf32>
    %cst_94 = arith.constant dense<0.000000e+00> : vector<5xf32>
    %200 = vector.multi_reduction <add>, %199, %cst_94 [1] : vector<5x32xf32> to vector<5xf32>
    %201 = vector.shape_cast %200 : vector<5xf32> to vector<5x1xf32>
    %cst_95 = arith.constant 3.200000e+01 : f32
    %202 = vector.broadcast %cst_95 : f32 to vector<5x1xf32>
    %203 = arith.divf %201, %202 : vector<5x1xf32>
    %204 = vector.broadcast %196 : vector<5x1xf32> to vector<5x32xf32>
    %205 = arith.subf %188, %204 : vector<5x32xf32>
    %cst_96 = arith.constant 9.99999974E-6 : f32
    %206 = vector.broadcast %cst_96 : f32 to vector<5x1xf32>
    %207 = arith.addf %203, %206 : vector<5x1xf32>
    %208 = math.rsqrt %207 : vector<5x1xf32>
    %209 = vector.broadcast %208 : vector<5x1xf32> to vector<5x32xf32>
    %210 = arith.mulf %205, %209 : vector<5x32xf32>
    %211 = vector.broadcast %190 : vector<1x32xf32> to vector<5x32xf32>
    %212 = arith.mulf %210, %211 : vector<5x32xf32>
    %213 = vector.broadcast %192 : vector<1x32xf32> to vector<5x32xf32>
    %214 = arith.addf %212, %213 : vector<5x32xf32>
    %c1_97 = arith.constant 1 : index
    %c0_98 = arith.constant 0 : index
    %c0_99 = arith.constant 0 : index
    %215 = vector.load %arg13[%c1_97, %c0_98, %c0_99] : memref<2x32x96xf32, #tpu.memory_space<vmem>>, vector<1x32x96xf32>
    %216 = vector.shape_cast %215 : vector<1x32x96xf32> to vector<32x96xf32>
    %c1_100 = arith.constant 1 : index
    %c0_101 = arith.constant 0 : index
    %c0_102 = arith.constant 0 : index
    %217 = vector.load %arg14[%c1_100, %c0_101, %c0_102] : memref<2x1x96xf32, #tpu.memory_space<vmem>>, vector<1x1x96xf32>
    %218 = vector.shape_cast %217 : vector<1x1x96xf32> to vector<1x96xf32>
    %c1_103 = arith.constant 1 : index
    %c0_104 = arith.constant 0 : index
    %c0_105 = arith.constant 0 : index
    %219 = vector.load %arg15[%c1_103, %c0_104, %c0_105] : memref<2x32x32xf32, #tpu.memory_space<vmem>>, vector<1x32x32xf32>
    %220 = vector.shape_cast %219 : vector<1x32x32xf32> to vector<32x32xf32>
    %c1_106 = arith.constant 1 : index
    %c0_107 = arith.constant 0 : index
    %c0_108 = arith.constant 0 : index
    %221 = vector.load %arg16[%c1_106, %c0_107, %c0_108] : memref<2x1x32xf32, #tpu.memory_space<vmem>>, vector<1x1x32xf32>
    %222 = vector.shape_cast %221 : vector<1x1x32xf32> to vector<1x32xf32>
    %cst_109 = arith.constant dense<0.000000e+00> : vector<5x96xf32>
    %223 = tpu.matmul %214, %216, %cst_109 {dimension_numbers = #tpu.dot_dimension_numbers<[1], [0], [0], [1], [0, 0, 1, 1], [], []>} : vector<5x32xf32>, vector<32x96xf32>, vector<5x96xf32> -> vector<5x96xf32>
    %224 = vector.broadcast %218 : vector<1x96xf32> to vector<5x96xf32>
    %225 = arith.addf %223, %224 : vector<5x96xf32>
    %226 = vector.extract_strided_slice %225 {offsets = [0, 0], sizes = [5, 8], strides = [1, 1]} : vector<5x96xf32> to vector<5x8xf32>
    %227 = vector.shape_cast %226 : vector<5x8xf32> to vector<1x5x8xf32>
    %228 = vector.extract_strided_slice %225 {offsets = [0, 8], sizes = [5, 8], strides = [1, 1]} : vector<5x96xf32> to vector<5x8xf32>
    %229 = vector.shape_cast %228 : vector<5x8xf32> to vector<1x5x8xf32>
    %230 = vector.extract_strided_slice %225 {offsets = [0, 16], sizes = [5, 8], strides = [1, 1]} : vector<5x96xf32> to vector<5x8xf32>
    %231 = vector.shape_cast %230 : vector<5x8xf32> to vector<1x5x8xf32>
    %232 = vector.extract_strided_slice %225 {offsets = [0, 24], sizes = [5, 8], strides = [1, 1]} : vector<5x96xf32> to vector<5x8xf32>
    %233 = vector.shape_cast %232 : vector<5x8xf32> to vector<1x5x8xf32>
    %234 = tpu.concatenate %227, %229, %231, %233 in 0 : vector<1x5x8xf32>, vector<1x5x8xf32>, vector<1x5x8xf32>, vector<1x5x8xf32> -> vector<4x5x8xf32>
    %cst_110 = arith.constant 0.353553385 : f32
    %235 = vector.broadcast %cst_110 : f32 to vector<4x5x8xf32>
    %236 = arith.mulf %234, %235 : vector<4x5x8xf32>
    %237 = vector.extract_strided_slice %225 {offsets = [0, 32], sizes = [5, 8], strides = [1, 1]} : vector<5x96xf32> to vector<5x8xf32>
    %238 = vector.shape_cast %237 : vector<5x8xf32> to vector<1x5x8xf32>
    %239 = vector.extract_strided_slice %225 {offsets = [0, 40], sizes = [5, 8], strides = [1, 1]} : vector<5x96xf32> to vector<5x8xf32>
    %240 = vector.shape_cast %239 : vector<5x8xf32> to vector<1x5x8xf32>
    %241 = vector.extract_strided_slice %225 {offsets = [0, 48], sizes = [5, 8], strides = [1, 1]} : vector<5x96xf32> to vector<5x8xf32>
    %242 = vector.shape_cast %241 : vector<5x8xf32> to vector<1x5x8xf32>
    %243 = vector.extract_strided_slice %225 {offsets = [0, 56], sizes = [5, 8], strides = [1, 1]} : vector<5x96xf32> to vector<5x8xf32>
    %244 = vector.shape_cast %243 : vector<5x8xf32> to vector<1x5x8xf32>
    %245 = tpu.concatenate %238, %240, %242, %244 in 0 : vector<1x5x8xf32>, vector<1x5x8xf32>, vector<1x5x8xf32>, vector<1x5x8xf32> -> vector<4x5x8xf32>
    %246 = vector.extract_strided_slice %225 {offsets = [0, 64], sizes = [5, 8], strides = [1, 1]} : vector<5x96xf32> to vector<5x8xf32>
    %247 = vector.shape_cast %246 : vector<5x8xf32> to vector<1x5x8xf32>
    %248 = vector.extract_strided_slice %225 {offsets = [0, 72], sizes = [5, 8], strides = [1, 1]} : vector<5x96xf32> to vector<5x8xf32>
    %249 = vector.shape_cast %248 : vector<5x8xf32> to vector<1x5x8xf32>
    %250 = vector.extract_strided_slice %225 {offsets = [0, 80], sizes = [5, 8], strides = [1, 1]} : vector<5x96xf32> to vector<5x8xf32>
    %251 = vector.shape_cast %250 : vector<5x8xf32> to vector<1x5x8xf32>
    %252 = vector.extract_strided_slice %225 {offsets = [0, 88], sizes = [5, 8], strides = [1, 1]} : vector<5x96xf32> to vector<5x8xf32>
    %253 = vector.shape_cast %252 : vector<5x8xf32> to vector<1x5x8xf32>
    %254 = tpu.concatenate %247, %249, %251, %253 in 0 : vector<1x5x8xf32>, vector<1x5x8xf32>, vector<1x5x8xf32>, vector<1x5x8xf32> -> vector<4x5x8xf32>
    "tpu.trace_start"() <{level = 10 : i32, message = "hqd,hkd->hqk"}> : () -> ()
    %cst_111 = arith.constant dense<0.000000e+00> : vector<4x5x5xf32>
    %255 = tpu.matmul %236, %245, %cst_111 {dimension_numbers = #tpu.dot_dimension_numbers<[2], [2], [1], [1], [0, 0, 0, 1, 1, 1], [0], [0]>} : vector<4x5x8xf32>, vector<4x5x8xf32>, vector<4x5x5xf32> -> vector<4x5x5xf32>
    "tpu.trace_stop"() : () -> ()
    %cst_112 = arith.constant dense<0xFF800000> : vector<4x5xf32>
    %256 = vector.multi_reduction <maximumf>, %255, %cst_112 [2] : vector<4x5x5xf32> to vector<4x5xf32>
    %257 = vector.shape_cast %256 : vector<4x5xf32> to vector<4x5x1xf32>
    %258 = vector.broadcast %257 : vector<4x5x1xf32> to vector<4x5x5xf32>
    %259 = arith.subf %255, %258 : vector<4x5x5xf32>
    %260 = math.exp %259 : vector<4x5x5xf32>
    %cst_113 = arith.constant dense<0.000000e+00> : vector<4x5xf32>
    %261 = vector.multi_reduction <add>, %260, %cst_113 [2] : vector<4x5x5xf32> to vector<4x5xf32>
    %262 = vector.shape_cast %261 : vector<4x5xf32> to vector<4x5x1xf32>
    %263 = tpu.reciprocal %262 {approx = true} : vector<4x5x1xf32> -> vector<4x5x1xf32>
    %264 = vector.broadcast %263 : vector<4x5x1xf32> to vector<4x5x5xf32>
    %265 = arith.mulf %260, %264 : vector<4x5x5xf32>
    "tpu.trace_start"() <{level = 10 : i32, message = "hqk,hkd->hqd"}> : () -> ()
    %cst_114 = arith.constant dense<0.000000e+00> : vector<4x5x8xf32>
    %266 = tpu.matmul %265, %254, %cst_114 {dimension_numbers = #tpu.dot_dimension_numbers<[2], [1], [1], [2], [0, 0, 0, 1, 1, 2], [0], [0]>} : vector<4x5x5xf32>, vector<4x5x8xf32>, vector<4x5x8xf32> -> vector<4x5x8xf32>
    "tpu.trace_stop"() : () -> ()
    %267 = vector.extract_strided_slice %266 {offsets = [0, 0, 0], sizes = [1, 5, 8], strides = [1, 1, 1]} : vector<4x5x8xf32> to vector<1x5x8xf32>
    %268 = vector.shape_cast %267 : vector<1x5x8xf32> to vector<5x8xf32>
    %269 = vector.extract_strided_slice %266 {offsets = [1, 0, 0], sizes = [1, 5, 8], strides = [1, 1, 1]} : vector<4x5x8xf32> to vector<1x5x8xf32>
    %270 = vector.shape_cast %269 : vector<1x5x8xf32> to vector<5x8xf32>
    %271 = vector.extract_strided_slice %266 {offsets = [2, 0, 0], sizes = [1, 5, 8], strides = [1, 1, 1]} : vector<4x5x8xf32> to vector<1x5x8xf32>
    %272 = vector.shape_cast %271 : vector<1x5x8xf32> to vector<5x8xf32>
    %273 = vector.extract_strided_slice %266 {offsets = [3, 0, 0], sizes = [1, 5, 8], strides = [1, 1, 1]} : vector<4x5x8xf32> to vector<1x5x8xf32>
    %274 = vector.shape_cast %273 : vector<1x5x8xf32> to vector<5x8xf32>
    %275 = tpu.concatenate %268, %270, %272, %274 in 1 : vector<5x8xf32>, vector<5x8xf32>, vector<5x8xf32>, vector<5x8xf32> -> vector<5x32xf32>
    %cst_115 = arith.constant dense<0.000000e+00> : vector<5x32xf32>
    %276 = tpu.matmul %275, %220, %cst_115 {dimension_numbers = #tpu.dot_dimension_numbers<[1], [0], [0], [1], [0, 0, 1, 1], [], []>} : vector<5x32xf32>, vector<32x32xf32>, vector<5x32xf32> -> vector<5x32xf32>
    %277 = vector.broadcast %222 : vector<1x32xf32> to vector<5x32xf32>
    %278 = arith.addf %276, %277 : vector<5x32xf32>
    %279 = arith.addf %188, %278 : vector<5x32xf32>
    %c1_116 = arith.constant 1 : index
    %c0_117 = arith.constant 0 : index
    %c0_118 = arith.constant 0 : index
    %280 = vector.load %arg17[%c1_116, %c0_117, %c0_118] : memref<2x1x32xf32, #tpu.memory_space<vmem>>, vector<1x1x32xf32>
    %281 = vector.shape_cast %280 : vector<1x1x32xf32> to vector<1x32xf32>
    %c1_119 = arith.constant 1 : index
    %c0_120 = arith.constant 0 : index
    %c0_121 = arith.constant 0 : index
    %282 = vector.load %arg18[%c1_119, %c0_120, %c0_121] : memref<2x1x32xf32, #tpu.memory_space<vmem>>, vector<1x1x32xf32>
    %283 = vector.shape_cast %282 : vector<1x1x32xf32> to vector<1x32xf32>
    %cst_122 = arith.constant dense<0.000000e+00> : vector<5xf32>
    %284 = vector.multi_reduction <add>, %279, %cst_122 [1] : vector<5x32xf32> to vector<5xf32>
    %285 = vector.shape_cast %284 : vector<5xf32> to vector<5x1xf32>
    %cst_123 = arith.constant 3.200000e+01 : f32
    %286 = vector.broadcast %cst_123 : f32 to vector<5x1xf32>
    %287 = arith.divf %285, %286 : vector<5x1xf32>
    %288 = vector.broadcast %287 : vector<5x1xf32> to vector<5x32xf32>
    %289 = arith.subf %279, %288 : vector<5x32xf32>
    %290 = arith.mulf %289, %289 : vector<5x32xf32>
    %cst_124 = arith.constant dense<0.000000e+00> : vector<5xf32>
    %291 = vector.multi_reduction <add>, %290, %cst_124 [1] : vector<5x32xf32> to vector<5xf32>
    %292 = vector.shape_cast %291 : vector<5xf32> to vector<5x1xf32>
    %cst_125 = arith.constant 3.200000e+01 : f32
    %293 = vector.broadcast %cst_125 : f32 to vector<5x1xf32>
    %294 = arith.divf %292, %293 : vector<5x1xf32>
    %295 = vector.broadcast %287 : vector<5x1xf32> to vector<5x32xf32>
    %296 = arith.subf %279, %295 : vector<5x32xf32>
    %cst_126 = arith.constant 9.99999974E-6 : f32
    %297 = vector.broadcast %cst_126 : f32 to vector<5x1xf32>
    %298 = arith.addf %294, %297 : vector<5x1xf32>
    %299 = math.rsqrt %298 : vector<5x1xf32>
    %300 = vector.broadcast %299 : vector<5x1xf32> to vector<5x32xf32>
    %301 = arith.mulf %296, %300 : vector<5x32xf32>
    %302 = vector.broadcast %281 : vector<1x32xf32> to vector<5x32xf32>
    %303 = arith.mulf %301, %302 : vector<5x32xf32>
    %304 = vector.broadcast %283 : vector<1x32xf32> to vector<5x32xf32>
    %305 = arith.addf %303, %304 : vector<5x32xf32>
    %c1_127 = arith.constant 1 : index
    %c0_128 = arith.constant 0 : index
    %c0_129 = arith.constant 0 : index
    %306 = vector.load %arg19[%c1_127, %c0_128, %c0_129] : memref<2x32x128xf32, #tpu.memory_space<vmem>>, vector<1x32x128xf32>
    %307 = vector.shape_cast %306 : vector<1x32x128xf32> to vector<32x128xf32>
    %cst_130 = arith.constant dense<0.000000e+00> : vector<5x128xf32>
    %308 = tpu.matmul %305, %307, %cst_130 {dimension_numbers = #tpu.dot_dimension_numbers<[1], [0], [0], [1], [0, 0, 1, 1], [], []>} : vector<5x32xf32>, vector<32x128xf32>, vector<5x128xf32> -> vector<5x128xf32>
    %c1_131 = arith.constant 1 : index
    %c0_132 = arith.constant 0 : index
    %c0_133 = arith.constant 0 : index
    %309 = vector.load %arg20[%c1_131, %c0_132, %c0_133] : memref<2x1x128xf32, #tpu.memory_space<vmem>>, vector<1x1x128xf32>
    %310 = vector.shape_cast %309 : vector<1x1x128xf32> to vector<1x128xf32>
    %311 = vector.broadcast %310 : vector<1x128xf32> to vector<5x128xf32>
    %312 = arith.addf %308, %311 : vector<5x128xf32>
    %cst_134 = arith.constant 5.000000e-01 : f32
    %313 = vector.broadcast %cst_134 : f32 to vector<5x128xf32>
    %314 = arith.mulf %313, %312 : vector<5x128xf32>
    %cst_135 = arith.constant 0.707106769 : f32
    %315 = vector.broadcast %cst_135 : f32 to vector<5x128xf32>
    %316 = arith.mulf %312, %315 : vector<5x128xf32>
    %cst_136 = arith.constant 0.000000e+00 : f32
    %317 = vector.broadcast %cst_136 : f32 to vector<5x128xf32>
    %318 = arith.cmpf olt, %316, %317 : vector<5x128xf32>
    %cst_137 = arith.constant -1.000000e+00 : f32
    %cst_138 = arith.constant 1.000000e+00 : f32
    %319 = vector.broadcast %cst_137 : f32 to vector<5x128xf32>
    %320 = vector.broadcast %cst_138 : f32 to vector<5x128xf32>
    %321 = arith.select %318, %319, %320 : vector<5x128xi1>, vector<5x128xf32>
    %322 = math.absf %316 : vector<5x128xf32>
    %cst_139 = arith.constant 0.327591091 : f32
    %323 = vector.broadcast %cst_139 : f32 to vector<5x128xf32>
    %324 = arith.mulf %323, %322 : vector<5x128xf32>
    %cst_140 = arith.constant 1.000000e+00 : f32
    %325 = vector.broadcast %cst_140 : f32 to vector<5x128xf32>
    %326 = arith.addf %325, %324 : vector<5x128xf32>
    %cst_141 = arith.constant 1.000000e+00 : f32
    %327 = vector.broadcast %cst_141 : f32 to vector<5x128xf32>
    %328 = arith.divf %327, %326 : vector<5x128xf32>
    %cst_142 = arith.constant 1.06140542 : f32
    %329 = vector.broadcast %cst_142 : f32 to vector<5x128xf32>
    %330 = arith.mulf %329, %328 : vector<5x128xf32>
    %cst_143 = arith.constant -1.45315206 : f32
    %331 = vector.broadcast %cst_143 : f32 to vector<5x128xf32>
    %332 = arith.addf %330, %331 : vector<5x128xf32>
    %333 = arith.mulf %332, %328 : vector<5x128xf32>
    %cst_144 = arith.constant 1.42141378 : f32
    %334 = vector.broadcast %cst_144 : f32 to vector<5x128xf32>
    %335 = arith.addf %333, %334 : vector<5x128xf32>
    %336 = arith.mulf %335, %328 : vector<5x128xf32>
    %cst_145 = arith.constant -0.284496725 : f32
    %337 = vector.broadcast %cst_145 : f32 to vector<5x128xf32>
    %338 = arith.addf %336, %337 : vector<5x128xf32>
    %339 = arith.mulf %338, %328 : vector<5x128xf32>
    %cst_146 = arith.constant 0.254829586 : f32
    %340 = vector.broadcast %cst_146 : f32 to vector<5x128xf32>
    %341 = arith.addf %339, %340 : vector<5x128xf32>
    %342 = arith.mulf %341, %328 : vector<5x128xf32>
    %cst_147 = arith.constant 0.000000e+00 : f32
    %343 = vector.broadcast %cst_147 : f32 to vector<5x128xf32>
    %344 = arith.subf %343, %322 : vector<5x128xf32>
    %345 = arith.mulf %344, %322 : vector<5x128xf32>
    %346 = math.exp %345 : vector<5x128xf32>
    %347 = arith.mulf %342, %346 : vector<5x128xf32>
    %cst_148 = arith.constant 1.000000e+00 : f32
    %348 = vector.broadcast %cst_148 : f32 to vector<5x128xf32>
    %349 = arith.subf %348, %347 : vector<5x128xf32>
    %350 = arith.mulf %321, %349 : vector<5x128xf32>
    %cst_149 = arith.constant 1.000000e+00 : f32
    %351 = vector.broadcast %cst_149 : f32 to vector<5x128xf32>
    %352 = arith.addf %351, %350 : vector<5x128xf32>
    %353 = arith.mulf %314, %352 : vector<5x128xf32>
    %c1_150 = arith.constant 1 : index
    %c0_151 = arith.constant 0 : index
    %c0_152 = arith.constant 0 : index
    %354 = vector.load %arg21[%c1_150, %c0_151, %c0_152] : memref<2x128x32xf32, #tpu.memory_space<vmem>>, vector<1x128x32xf32>
    %355 = vector.shape_cast %354 : vector<1x128x32xf32> to vector<128x32xf32>
    %cst_153 = arith.constant dense<0.000000e+00> : vector<5x32xf32>
    %356 = tpu.matmul %353, %355, %cst_153 {dimension_numbers = #tpu.dot_dimension_numbers<[1], [0], [0], [1], [0, 0, 1, 1], [], []>} : vector<5x128xf32>, vector<128x32xf32>, vector<5x32xf32> -> vector<5x32xf32>
    %c1_154 = arith.constant 1 : index
    %c0_155 = arith.constant 0 : index
    %c0_156 = arith.constant 0 : index
    %357 = vector.load %arg22[%c1_154, %c0_155, %c0_156] : memref<2x1x32xf32, #tpu.memory_space<vmem>>, vector<1x1x32xf32>
    %358 = vector.shape_cast %357 : vector<1x1x32xf32> to vector<1x32xf32>
    %359 = vector.broadcast %358 : vector<1x32xf32> to vector<5x32xf32>
    %360 = arith.addf %356, %359 : vector<5x32xf32>
    %361 = arith.addf %279, %360 : vector<5x32xf32>
    %c0_157 = arith.constant 0 : index
    %c0_158 = arith.constant 0 : index
    %362 = vector.load %arg23[%c0_157, %c0_158] : memref<1x32xf32, #tpu.memory_space<vmem>>, vector<1x32xf32>
    %c0_159 = arith.constant 0 : index
    %c0_160 = arith.constant 0 : index
    %363 = vector.load %arg24[%c0_159, %c0_160] : memref<1x32xf32, #tpu.memory_space<vmem>>, vector<1x32xf32>
    %cst_161 = arith.constant dense<0.000000e+00> : vector<5xf32>
    %364 = vector.multi_reduction <add>, %361, %cst_161 [1] : vector<5x32xf32> to vector<5xf32>
    %365 = vector.shape_cast %364 : vector<5xf32> to vector<5x1xf32>
    %cst_162 = arith.constant 3.200000e+01 : f32
    %366 = vector.broadcast %cst_162 : f32 to vector<5x1xf32>
    %367 = arith.divf %365, %366 : vector<5x1xf32>
    %368 = vector.broadcast %367 : vector<5x1xf32> to vector<5x32xf32>
    %369 = arith.subf %361, %368 : vector<5x32xf32>
    %370 = arith.mulf %369, %369 : vector<5x32xf32>
    %cst_163 = arith.constant dense<0.000000e+00> : vector<5xf32>
    %371 = vector.multi_reduction <add>, %370, %cst_163 [1] : vector<5x32xf32> to vector<5xf32>
    %372 = vector.shape_cast %371 : vector<5xf32> to vector<5x1xf32>
    %cst_164 = arith.constant 3.200000e+01 : f32
    %373 = vector.broadcast %cst_164 : f32 to vector<5x1xf32>
    %374 = arith.divf %372, %373 : vector<5x1xf32>
    %375 = vector.broadcast %367 : vector<5x1xf32> to vector<5x32xf32>
    %376 = arith.subf %361, %375 : vector<5x32xf32>
    %cst_165 = arith.constant 9.99999974E-6 : f32
    %377 = vector.broadcast %cst_165 : f32 to vector<5x1xf32>
    %378 = arith.addf %374, %377 : vector<5x1xf32>
    %379 = math.rsqrt %378 : vector<5x1xf32>
    %380 = vector.broadcast %379 : vector<5x1xf32> to vector<5x32xf32>
    %381 = arith.mulf %376, %380 : vector<5x32xf32>
    %382 = vector.broadcast %362 : vector<1x32xf32> to vector<5x32xf32>
    %383 = arith.mulf %381, %382 : vector<5x32xf32>
    %384 = vector.broadcast %363 : vector<1x32xf32> to vector<5x32xf32>
    %385 = arith.addf %383, %384 : vector<5x32xf32>
    %c0_166 = arith.constant 0 : index
    %c0_167 = arith.constant 0 : index
    %386 = vector.load %arg25[%c0_166, %c0_167] : memref<32x32xf32, #tpu.memory_space<vmem>>, vector<32x32xf32>
    %cst_168 = arith.constant dense<0.000000e+00> : vector<5x32xf32>
    %387 = tpu.matmul %385, %386, %cst_168 {dimension_numbers = #tpu.dot_dimension_numbers<[1], [0], [0], [1], [0, 0, 1, 1], [], []>} : vector<5x32xf32>, vector<32x32xf32>, vector<5x32xf32> -> vector<5x32xf32>
    %c0_169 = arith.constant 0 : index
    %c0_170 = arith.constant 0 : index
    %388 = vector.load %arg26[%c0_169, %c0_170] : memref<1x32xf32, #tpu.memory_space<vmem>>, vector<1x32xf32>
    %389 = vector.broadcast %388 : vector<1x32xf32> to vector<5x32xf32>
    %390 = arith.addf %387, %389 : vector<5x32xf32>
    %c0_171 = arith.constant 0 : index
    %c0_172 = arith.constant 0 : index
    %391 = vector.load %arg27[%c0_171, %c0_172] : memref<1x32xf32, #tpu.memory_space<vmem>>, vector<1x32xf32>
    %392 = vector.shape_cast %391 : vector<1x32xf32> to vector<1x32xf32>
    %393 = vector.broadcast %392 : vector<1x32xf32> to vector<12x32xf32>
    %394 = vector.extract_strided_slice %390 {offsets = [1, 0], sizes = [4, 32], strides = [1, 1]} : vector<5x32xf32> to vector<4x32xf32>
    %395 = tpu.concatenate %394, %393 in 0 : vector<4x32xf32>, vector<12x32xf32> -> vector<16x32xf32>
    %c0_173 = arith.constant 0 : index
    %c0_174 = arith.constant 0 : index
    %c0_175 = arith.constant 0 : index
    %396 = vector.load %arg5[%c0_173, %c0_174, %c0_175] : memref<1x16x16xf32, #tpu.memory_space<vmem>>, vector<1x16x16xf32>
    %397 = vector.shape_cast %396 : vector<1x16x16xf32> to vector<16x16xf32>
    %cst_176 = arith.constant dense<0.000000e+00> : vector<16x32xf32>
    %398 = tpu.matmul %397, %395, %cst_176 {dimension_numbers = #tpu.dot_dimension_numbers<[1], [0], [0], [1], [0, 0, 1, 1], [], []>} : vector<16x16xf32>, vector<16x32xf32>, vector<16x32xf32> -> vector<16x32xf32>
    %399 = vector.extract_strided_slice %390 {offsets = [0, 0], sizes = [1, 32], strides = [1, 1]} : vector<5x32xf32> to vector<1x32xf32>
    %400 = tpu.concatenate %399, %398 in 0 : vector<1x32xf32>, vector<16x32xf32> -> vector<17x32xf32>
    %c0_177 = arith.constant 0 : index
    %c0_178 = arith.constant 0 : index
    %401 = vector.load %arg28[%c0_177, %c0_178] : memref<17x32xf32, #tpu.memory_space<vmem>>, vector<17x32xf32>
    %402 = arith.addf %400, %401 : vector<17x32xf32>
    %c0_179 = arith.constant 0 : index
    %c0_180 = arith.constant 0 : index
    %c0_181 = arith.constant 0 : index
    %403 = vector.load %arg29[%c0_179, %c0_180, %c0_181] : memref<2x1x32xf32, #tpu.memory_space<vmem>>, vector<1x1x32xf32>
    %404 = vector.shape_cast %403 : vector<1x1x32xf32> to vector<1x32xf32>
    %c0_182 = arith.constant 0 : index
    %c0_183 = arith.constant 0 : index
    %c0_184 = arith.constant 0 : index
    %405 = vector.load %arg30[%c0_182, %c0_183, %c0_184] : memref<2x1x32xf32, #tpu.memory_space<vmem>>, vector<1x1x32xf32>
    %406 = vector.shape_cast %405 : vector<1x1x32xf32> to vector<1x32xf32>
    %cst_185 = arith.constant dense<0.000000e+00> : vector<17xf32>
    %407 = vector.multi_reduction <add>, %402, %cst_185 [1] : vector<17x32xf32> to vector<17xf32>
    %408 = vector.shape_cast %407 : vector<17xf32> to vector<17x1xf32>
    %cst_186 = arith.constant 3.200000e+01 : f32
    %409 = vector.broadcast %cst_186 : f32 to vector<17x1xf32>
    %410 = arith.divf %408, %409 : vector<17x1xf32>
    %411 = vector.broadcast %410 : vector<17x1xf32> to vector<17x32xf32>
    %412 = arith.subf %402, %411 : vector<17x32xf32>
    %413 = arith.mulf %412, %412 : vector<17x32xf32>
    %cst_187 = arith.constant dense<0.000000e+00> : vector<17xf32>
    %414 = vector.multi_reduction <add>, %413, %cst_187 [1] : vector<17x32xf32> to vector<17xf32>
    %415 = vector.shape_cast %414 : vector<17xf32> to vector<17x1xf32>
    %cst_188 = arith.constant 3.200000e+01 : f32
    %416 = vector.broadcast %cst_188 : f32 to vector<17x1xf32>
    %417 = arith.divf %415, %416 : vector<17x1xf32>
    %418 = vector.broadcast %410 : vector<17x1xf32> to vector<17x32xf32>
    %419 = arith.subf %402, %418 : vector<17x32xf32>
    %cst_189 = arith.constant 9.99999974E-6 : f32
    %420 = vector.broadcast %cst_189 : f32 to vector<17x1xf32>
    %421 = arith.addf %417, %420 : vector<17x1xf32>
    %422 = math.rsqrt %421 : vector<17x1xf32>
    %423 = vector.broadcast %422 : vector<17x1xf32> to vector<17x32xf32>
    %424 = arith.mulf %419, %423 : vector<17x32xf32>
    %425 = vector.broadcast %404 : vector<1x32xf32> to vector<17x32xf32>
    %426 = arith.mulf %424, %425 : vector<17x32xf32>
    %427 = vector.broadcast %406 : vector<1x32xf32> to vector<17x32xf32>
    %428 = arith.addf %426, %427 : vector<17x32xf32>
    %c0_190 = arith.constant 0 : index
    %c0_191 = arith.constant 0 : index
    %c0_192 = arith.constant 0 : index
    %429 = vector.load %arg31[%c0_190, %c0_191, %c0_192] : memref<2x32x96xf32, #tpu.memory_space<vmem>>, vector<1x32x96xf32>
    %430 = vector.shape_cast %429 : vector<1x32x96xf32> to vector<32x96xf32>
    %c0_193 = arith.constant 0 : index
    %c0_194 = arith.constant 0 : index
    %c0_195 = arith.constant 0 : index
    %431 = vector.load %arg32[%c0_193, %c0_194, %c0_195] : memref<2x1x96xf32, #tpu.memory_space<vmem>>, vector<1x1x96xf32>
    %432 = vector.shape_cast %431 : vector<1x1x96xf32> to vector<1x96xf32>
    %c0_196 = arith.constant 0 : index
    %c0_197 = arith.constant 0 : index
    %c0_198 = arith.constant 0 : index
    %433 = vector.load %arg33[%c0_196, %c0_197, %c0_198] : memref<2x32x32xf32, #tpu.memory_space<vmem>>, vector<1x32x32xf32>
    %434 = vector.shape_cast %433 : vector<1x32x32xf32> to vector<32x32xf32>
    %c0_199 = arith.constant 0 : index
    %c0_200 = arith.constant 0 : index
    %c0_201 = arith.constant 0 : index
    %435 = vector.load %arg34[%c0_199, %c0_200, %c0_201] : memref<2x1x32xf32, #tpu.memory_space<vmem>>, vector<1x1x32xf32>
    %436 = vector.shape_cast %435 : vector<1x1x32xf32> to vector<1x32xf32>
    %cst_202 = arith.constant dense<0.000000e+00> : vector<17x96xf32>
    %437 = tpu.matmul %428, %430, %cst_202 {dimension_numbers = #tpu.dot_dimension_numbers<[1], [0], [0], [1], [0, 0, 1, 1], [], []>} : vector<17x32xf32>, vector<32x96xf32>, vector<17x96xf32> -> vector<17x96xf32>
    %438 = vector.broadcast %432 : vector<1x96xf32> to vector<17x96xf32>
    %439 = arith.addf %437, %438 : vector<17x96xf32>
    %440 = vector.extract_strided_slice %439 {offsets = [0, 0], sizes = [17, 8], strides = [1, 1]} : vector<17x96xf32> to vector<17x8xf32>
    %441 = vector.shape_cast %440 : vector<17x8xf32> to vector<1x17x8xf32>
    %442 = vector.extract_strided_slice %439 {offsets = [0, 8], sizes = [17, 8], strides = [1, 1]} : vector<17x96xf32> to vector<17x8xf32>
    %443 = vector.shape_cast %442 : vector<17x8xf32> to vector<1x17x8xf32>
    %444 = vector.extract_strided_slice %439 {offsets = [0, 16], sizes = [17, 8], strides = [1, 1]} : vector<17x96xf32> to vector<17x8xf32>
    %445 = vector.shape_cast %444 : vector<17x8xf32> to vector<1x17x8xf32>
    %446 = vector.extract_strided_slice %439 {offsets = [0, 24], sizes = [17, 8], strides = [1, 1]} : vector<17x96xf32> to vector<17x8xf32>
    %447 = vector.shape_cast %446 : vector<17x8xf32> to vector<1x17x8xf32>
    %448 = tpu.concatenate %441, %443, %445, %447 in 0 : vector<1x17x8xf32>, vector<1x17x8xf32>, vector<1x17x8xf32>, vector<1x17x8xf32> -> vector<4x17x8xf32>
    %cst_203 = arith.constant 0.353553385 : f32
    %449 = vector.broadcast %cst_203 : f32 to vector<4x17x8xf32>
    %450 = arith.mulf %448, %449 : vector<4x17x8xf32>
    %451 = vector.extract_strided_slice %439 {offsets = [0, 32], sizes = [17, 8], strides = [1, 1]} : vector<17x96xf32> to vector<17x8xf32>
    %452 = vector.shape_cast %451 : vector<17x8xf32> to vector<1x17x8xf32>
    %453 = vector.extract_strided_slice %439 {offsets = [0, 40], sizes = [17, 8], strides = [1, 1]} : vector<17x96xf32> to vector<17x8xf32>
    %454 = vector.shape_cast %453 : vector<17x8xf32> to vector<1x17x8xf32>
    %455 = vector.extract_strided_slice %439 {offsets = [0, 48], sizes = [17, 8], strides = [1, 1]} : vector<17x96xf32> to vector<17x8xf32>
    %456 = vector.shape_cast %455 : vector<17x8xf32> to vector<1x17x8xf32>
    %457 = vector.extract_strided_slice %439 {offsets = [0, 56], sizes = [17, 8], strides = [1, 1]} : vector<17x96xf32> to vector<17x8xf32>
    %458 = vector.shape_cast %457 : vector<17x8xf32> to vector<1x17x8xf32>
    %459 = tpu.concatenate %452, %454, %456, %458 in 0 : vector<1x17x8xf32>, vector<1x17x8xf32>, vector<1x17x8xf32>, vector<1x17x8xf32> -> vector<4x17x8xf32>
    %460 = vector.extract_strided_slice %439 {offsets = [0, 64], sizes = [17, 8], strides = [1, 1]} : vector<17x96xf32> to vector<17x8xf32>
    %461 = vector.shape_cast %460 : vector<17x8xf32> to vector<1x17x8xf32>
    %462 = vector.extract_strided_slice %439 {offsets = [0, 72], sizes = [17, 8], strides = [1, 1]} : vector<17x96xf32> to vector<17x8xf32>
    %463 = vector.shape_cast %462 : vector<17x8xf32> to vector<1x17x8xf32>
    %464 = vector.extract_strided_slice %439 {offsets = [0, 80], sizes = [17, 8], strides = [1, 1]} : vector<17x96xf32> to vector<17x8xf32>
    %465 = vector.shape_cast %464 : vector<17x8xf32> to vector<1x17x8xf32>
    %466 = vector.extract_strided_slice %439 {offsets = [0, 88], sizes = [17, 8], strides = [1, 1]} : vector<17x96xf32> to vector<17x8xf32>
    %467 = vector.shape_cast %466 : vector<17x8xf32> to vector<1x17x8xf32>
    %468 = tpu.concatenate %461, %463, %465, %467 in 0 : vector<1x17x8xf32>, vector<1x17x8xf32>, vector<1x17x8xf32>, vector<1x17x8xf32> -> vector<4x17x8xf32>
    "tpu.trace_start"() <{level = 10 : i32, message = "hqd,hkd->hqk"}> : () -> ()
    %cst_204 = arith.constant dense<0.000000e+00> : vector<4x17x17xf32>
    %469 = tpu.matmul %450, %459, %cst_204 {dimension_numbers = #tpu.dot_dimension_numbers<[2], [2], [1], [1], [0, 0, 0, 1, 1, 1], [0], [0]>} : vector<4x17x8xf32>, vector<4x17x8xf32>, vector<4x17x17xf32> -> vector<4x17x17xf32>
    "tpu.trace_stop"() : () -> ()
    %cst_205 = arith.constant dense<0xFF800000> : vector<4x17xf32>
    %470 = vector.multi_reduction <maximumf>, %469, %cst_205 [2] : vector<4x17x17xf32> to vector<4x17xf32>
    %471 = vector.shape_cast %470 : vector<4x17xf32> to vector<4x17x1xf32>
    %472 = vector.broadcast %471 : vector<4x17x1xf32> to vector<4x17x17xf32>
    %473 = arith.subf %469, %472 : vector<4x17x17xf32>
    %474 = math.exp %473 : vector<4x17x17xf32>
    %cst_206 = arith.constant dense<0.000000e+00> : vector<4x17xf32>
    %475 = vector.multi_reduction <add>, %474, %cst_206 [2] : vector<4x17x17xf32> to vector<4x17xf32>
    %476 = vector.shape_cast %475 : vector<4x17xf32> to vector<4x17x1xf32>
    %477 = tpu.reciprocal %476 {approx = true} : vector<4x17x1xf32> -> vector<4x17x1xf32>
    %478 = vector.broadcast %477 : vector<4x17x1xf32> to vector<4x17x17xf32>
    %479 = arith.mulf %474, %478 : vector<4x17x17xf32>
    "tpu.trace_start"() <{level = 10 : i32, message = "hqk,hkd->hqd"}> : () -> ()
    %cst_207 = arith.constant dense<0.000000e+00> : vector<4x17x8xf32>
    %480 = tpu.matmul %479, %468, %cst_207 {dimension_numbers = #tpu.dot_dimension_numbers<[2], [1], [1], [2], [0, 0, 0, 1, 1, 2], [0], [0]>} : vector<4x17x17xf32>, vector<4x17x8xf32>, vector<4x17x8xf32> -> vector<4x17x8xf32>
    "tpu.trace_stop"() : () -> ()
    %481 = vector.extract_strided_slice %480 {offsets = [0, 0, 0], sizes = [1, 17, 8], strides = [1, 1, 1]} : vector<4x17x8xf32> to vector<1x17x8xf32>
    %482 = vector.shape_cast %481 : vector<1x17x8xf32> to vector<17x8xf32>
    %483 = vector.extract_strided_slice %480 {offsets = [1, 0, 0], sizes = [1, 17, 8], strides = [1, 1, 1]} : vector<4x17x8xf32> to vector<1x17x8xf32>
    %484 = vector.shape_cast %483 : vector<1x17x8xf32> to vector<17x8xf32>
    %485 = vector.extract_strided_slice %480 {offsets = [2, 0, 0], sizes = [1, 17, 8], strides = [1, 1, 1]} : vector<4x17x8xf32> to vector<1x17x8xf32>
    %486 = vector.shape_cast %485 : vector<1x17x8xf32> to vector<17x8xf32>
    %487 = vector.extract_strided_slice %480 {offsets = [3, 0, 0], sizes = [1, 17, 8], strides = [1, 1, 1]} : vector<4x17x8xf32> to vector<1x17x8xf32>
    %488 = vector.shape_cast %487 : vector<1x17x8xf32> to vector<17x8xf32>
    %489 = tpu.concatenate %482, %484, %486, %488 in 1 : vector<17x8xf32>, vector<17x8xf32>, vector<17x8xf32>, vector<17x8xf32> -> vector<17x32xf32>
    %cst_208 = arith.constant dense<0.000000e+00> : vector<17x32xf32>
    %490 = tpu.matmul %489, %434, %cst_208 {dimension_numbers = #tpu.dot_dimension_numbers<[1], [0], [0], [1], [0, 0, 1, 1], [], []>} : vector<17x32xf32>, vector<32x32xf32>, vector<17x32xf32> -> vector<17x32xf32>
    %491 = vector.broadcast %436 : vector<1x32xf32> to vector<17x32xf32>
    %492 = arith.addf %490, %491 : vector<17x32xf32>
    %493 = arith.addf %402, %492 : vector<17x32xf32>
    %c0_209 = arith.constant 0 : index
    %c0_210 = arith.constant 0 : index
    %c0_211 = arith.constant 0 : index
    %494 = vector.load %arg35[%c0_209, %c0_210, %c0_211] : memref<2x1x32xf32, #tpu.memory_space<vmem>>, vector<1x1x32xf32>
    %495 = vector.shape_cast %494 : vector<1x1x32xf32> to vector<1x32xf32>
    %c0_212 = arith.constant 0 : index
    %c0_213 = arith.constant 0 : index
    %c0_214 = arith.constant 0 : index
    %496 = vector.load %arg36[%c0_212, %c0_213, %c0_214] : memref<2x1x32xf32, #tpu.memory_space<vmem>>, vector<1x1x32xf32>
    %497 = vector.shape_cast %496 : vector<1x1x32xf32> to vector<1x32xf32>
    %cst_215 = arith.constant dense<0.000000e+00> : vector<17xf32>
    %498 = vector.multi_reduction <add>, %493, %cst_215 [1] : vector<17x32xf32> to vector<17xf32>
    %499 = vector.shape_cast %498 : vector<17xf32> to vector<17x1xf32>
    %cst_216 = arith.constant 3.200000e+01 : f32
    %500 = vector.broadcast %cst_216 : f32 to vector<17x1xf32>
    %501 = arith.divf %499, %500 : vector<17x1xf32>
    %502 = vector.broadcast %501 : vector<17x1xf32> to vector<17x32xf32>
    %503 = arith.subf %493, %502 : vector<17x32xf32>
    %504 = arith.mulf %503, %503 : vector<17x32xf32>
    %cst_217 = arith.constant dense<0.000000e+00> : vector<17xf32>
    %505 = vector.multi_reduction <add>, %504, %cst_217 [1] : vector<17x32xf32> to vector<17xf32>
    %506 = vector.shape_cast %505 : vector<17xf32> to vector<17x1xf32>
    %cst_218 = arith.constant 3.200000e+01 : f32
    %507 = vector.broadcast %cst_218 : f32 to vector<17x1xf32>
    %508 = arith.divf %506, %507 : vector<17x1xf32>
    %509 = vector.broadcast %501 : vector<17x1xf32> to vector<17x32xf32>
    %510 = arith.subf %493, %509 : vector<17x32xf32>
    %cst_219 = arith.constant 9.99999974E-6 : f32
    %511 = vector.broadcast %cst_219 : f32 to vector<17x1xf32>
    %512 = arith.addf %508, %511 : vector<17x1xf32>
    %513 = math.rsqrt %512 : vector<17x1xf32>
    %514 = vector.broadcast %513 : vector<17x1xf32> to vector<17x32xf32>
    %515 = arith.mulf %510, %514 : vector<17x32xf32>
    %516 = vector.broadcast %495 : vector<1x32xf32> to vector<17x32xf32>
    %517 = arith.mulf %515, %516 : vector<17x32xf32>
    %518 = vector.broadcast %497 : vector<1x32xf32> to vector<17x32xf32>
    %519 = arith.addf %517, %518 : vector<17x32xf32>
    %c0_220 = arith.constant 0 : index
    %c0_221 = arith.constant 0 : index
    %c0_222 = arith.constant 0 : index
    %520 = vector.load %arg37[%c0_220, %c0_221, %c0_222] : memref<2x32x128xf32, #tpu.memory_space<vmem>>, vector<1x32x128xf32>
    %521 = vector.shape_cast %520 : vector<1x32x128xf32> to vector<32x128xf32>
    %cst_223 = arith.constant dense<0.000000e+00> : vector<17x128xf32>
    %522 = tpu.matmul %519, %521, %cst_223 {dimension_numbers = #tpu.dot_dimension_numbers<[1], [0], [0], [1], [0, 0, 1, 1], [], []>} : vector<17x32xf32>, vector<32x128xf32>, vector<17x128xf32> -> vector<17x128xf32>
    %c0_224 = arith.constant 0 : index
    %c0_225 = arith.constant 0 : index
    %c0_226 = arith.constant 0 : index
    %523 = vector.load %arg38[%c0_224, %c0_225, %c0_226] : memref<2x1x128xf32, #tpu.memory_space<vmem>>, vector<1x1x128xf32>
    %524 = vector.shape_cast %523 : vector<1x1x128xf32> to vector<1x128xf32>
    %525 = vector.broadcast %524 : vector<1x128xf32> to vector<17x128xf32>
    %526 = arith.addf %522, %525 : vector<17x128xf32>
    %cst_227 = arith.constant 5.000000e-01 : f32
    %527 = vector.broadcast %cst_227 : f32 to vector<17x128xf32>
    %528 = arith.mulf %527, %526 : vector<17x128xf32>
    %cst_228 = arith.constant 0.707106769 : f32
    %529 = vector.broadcast %cst_228 : f32 to vector<17x128xf32>
    %530 = arith.mulf %526, %529 : vector<17x128xf32>
    %cst_229 = arith.constant 0.000000e+00 : f32
    %531 = vector.broadcast %cst_229 : f32 to vector<17x128xf32>
    %532 = arith.cmpf olt, %530, %531 : vector<17x128xf32>
    %cst_230 = arith.constant -1.000000e+00 : f32
    %cst_231 = arith.constant 1.000000e+00 : f32
    %533 = vector.broadcast %cst_230 : f32 to vector<17x128xf32>
    %534 = vector.broadcast %cst_231 : f32 to vector<17x128xf32>
    %535 = arith.select %532, %533, %534 : vector<17x128xi1>, vector<17x128xf32>
    %536 = math.absf %530 : vector<17x128xf32>
    %cst_232 = arith.constant 0.327591091 : f32
    %537 = vector.broadcast %cst_232 : f32 to vector<17x128xf32>
    %538 = arith.mulf %537, %536 : vector<17x128xf32>
    %cst_233 = arith.constant 1.000000e+00 : f32
    %539 = vector.broadcast %cst_233 : f32 to vector<17x128xf32>
    %540 = arith.addf %539, %538 : vector<17x128xf32>
    %cst_234 = arith.constant 1.000000e+00 : f32
    %541 = vector.broadcast %cst_234 : f32 to vector<17x128xf32>
    %542 = arith.divf %541, %540 : vector<17x128xf32>
    %cst_235 = arith.constant 1.06140542 : f32
    %543 = vector.broadcast %cst_235 : f32 to vector<17x128xf32>
    %544 = arith.mulf %543, %542 : vector<17x128xf32>
    %cst_236 = arith.constant -1.45315206 : f32
    %545 = vector.broadcast %cst_236 : f32 to vector<17x128xf32>
    %546 = arith.addf %544, %545 : vector<17x128xf32>
    %547 = arith.mulf %546, %542 : vector<17x128xf32>
    %cst_237 = arith.constant 1.42141378 : f32
    %548 = vector.broadcast %cst_237 : f32 to vector<17x128xf32>
    %549 = arith.addf %547, %548 : vector<17x128xf32>
    %550 = arith.mulf %549, %542 : vector<17x128xf32>
    %cst_238 = arith.constant -0.284496725 : f32
    %551 = vector.broadcast %cst_238 : f32 to vector<17x128xf32>
    %552 = arith.addf %550, %551 : vector<17x128xf32>
    %553 = arith.mulf %552, %542 : vector<17x128xf32>
    %cst_239 = arith.constant 0.254829586 : f32
    %554 = vector.broadcast %cst_239 : f32 to vector<17x128xf32>
    %555 = arith.addf %553, %554 : vector<17x128xf32>
    %556 = arith.mulf %555, %542 : vector<17x128xf32>
    %cst_240 = arith.constant 0.000000e+00 : f32
    %557 = vector.broadcast %cst_240 : f32 to vector<17x128xf32>
    %558 = arith.subf %557, %536 : vector<17x128xf32>
    %559 = arith.mulf %558, %536 : vector<17x128xf32>
    %560 = math.exp %559 : vector<17x128xf32>
    %561 = arith.mulf %556, %560 : vector<17x128xf32>
    %cst_241 = arith.constant 1.000000e+00 : f32
    %562 = vector.broadcast %cst_241 : f32 to vector<17x128xf32>
    %563 = arith.subf %562, %561 : vector<17x128xf32>
    %564 = arith.mulf %535, %563 : vector<17x128xf32>
    %cst_242 = arith.constant 1.000000e+00 : f32
    %565 = vector.broadcast %cst_242 : f32 to vector<17x128xf32>
    %566 = arith.addf %565, %564 : vector<17x128xf32>
    %567 = arith.mulf %528, %566 : vector<17x128xf32>
    %c0_243 = arith.constant 0 : index
    %c0_244 = arith.constant 0 : index
    %c0_245 = arith.constant 0 : index
    %568 = vector.load %arg39[%c0_243, %c0_244, %c0_245] : memref<2x128x32xf32, #tpu.memory_space<vmem>>, vector<1x128x32xf32>
    %569 = vector.shape_cast %568 : vector<1x128x32xf32> to vector<128x32xf32>
    %cst_246 = arith.constant dense<0.000000e+00> : vector<17x32xf32>
    %570 = tpu.matmul %567, %569, %cst_246 {dimension_numbers = #tpu.dot_dimension_numbers<[1], [0], [0], [1], [0, 0, 1, 1], [], []>} : vector<17x128xf32>, vector<128x32xf32>, vector<17x32xf32> -> vector<17x32xf32>
    %c0_247 = arith.constant 0 : index
    %c0_248 = arith.constant 0 : index
    %c0_249 = arith.constant 0 : index
    %571 = vector.load %arg40[%c0_247, %c0_248, %c0_249] : memref<2x1x32xf32, #tpu.memory_space<vmem>>, vector<1x1x32xf32>
    %572 = vector.shape_cast %571 : vector<1x1x32xf32> to vector<1x32xf32>
    %573 = vector.broadcast %572 : vector<1x32xf32> to vector<17x32xf32>
    %574 = arith.addf %570, %573 : vector<17x32xf32>
    %575 = arith.addf %493, %574 : vector<17x32xf32>
    %c1_250 = arith.constant 1 : index
    %c0_251 = arith.constant 0 : index
    %c0_252 = arith.constant 0 : index
    %576 = vector.load %arg29[%c1_250, %c0_251, %c0_252] : memref<2x1x32xf32, #tpu.memory_space<vmem>>, vector<1x1x32xf32>
    %577 = vector.shape_cast %576 : vector<1x1x32xf32> to vector<1x32xf32>
    %c1_253 = arith.constant 1 : index
    %c0_254 = arith.constant 0 : index
    %c0_255 = arith.constant 0 : index
    %578 = vector.load %arg30[%c1_253, %c0_254, %c0_255] : memref<2x1x32xf32, #tpu.memory_space<vmem>>, vector<1x1x32xf32>
    %579 = vector.shape_cast %578 : vector<1x1x32xf32> to vector<1x32xf32>
    %cst_256 = arith.constant dense<0.000000e+00> : vector<17xf32>
    %580 = vector.multi_reduction <add>, %575, %cst_256 [1] : vector<17x32xf32> to vector<17xf32>
    %581 = vector.shape_cast %580 : vector<17xf32> to vector<17x1xf32>
    %cst_257 = arith.constant 3.200000e+01 : f32
    %582 = vector.broadcast %cst_257 : f32 to vector<17x1xf32>
    %583 = arith.divf %581, %582 : vector<17x1xf32>
    %584 = vector.broadcast %583 : vector<17x1xf32> to vector<17x32xf32>
    %585 = arith.subf %575, %584 : vector<17x32xf32>
    %586 = arith.mulf %585, %585 : vector<17x32xf32>
    %cst_258 = arith.constant dense<0.000000e+00> : vector<17xf32>
    %587 = vector.multi_reduction <add>, %586, %cst_258 [1] : vector<17x32xf32> to vector<17xf32>
    %588 = vector.shape_cast %587 : vector<17xf32> to vector<17x1xf32>
    %cst_259 = arith.constant 3.200000e+01 : f32
    %589 = vector.broadcast %cst_259 : f32 to vector<17x1xf32>
    %590 = arith.divf %588, %589 : vector<17x1xf32>
    %591 = vector.broadcast %583 : vector<17x1xf32> to vector<17x32xf32>
    %592 = arith.subf %575, %591 : vector<17x32xf32>
    %cst_260 = arith.constant 9.99999974E-6 : f32
    %593 = vector.broadcast %cst_260 : f32 to vector<17x1xf32>
    %594 = arith.addf %590, %593 : vector<17x1xf32>
    %595 = math.rsqrt %594 : vector<17x1xf32>
    %596 = vector.broadcast %595 : vector<17x1xf32> to vector<17x32xf32>
    %597 = arith.mulf %592, %596 : vector<17x32xf32>
    %598 = vector.broadcast %577 : vector<1x32xf32> to vector<17x32xf32>
    %599 = arith.mulf %597, %598 : vector<17x32xf32>
    %600 = vector.broadcast %579 : vector<1x32xf32> to vector<17x32xf32>
    %601 = arith.addf %599, %600 : vector<17x32xf32>
    %c1_261 = arith.constant 1 : index
    %c0_262 = arith.constant 0 : index
    %c0_263 = arith.constant 0 : index
    %602 = vector.load %arg31[%c1_261, %c0_262, %c0_263] : memref<2x32x96xf32, #tpu.memory_space<vmem>>, vector<1x32x96xf32>
    %603 = vector.shape_cast %602 : vector<1x32x96xf32> to vector<32x96xf32>
    %c1_264 = arith.constant 1 : index
    %c0_265 = arith.constant 0 : index
    %c0_266 = arith.constant 0 : index
    %604 = vector.load %arg32[%c1_264, %c0_265, %c0_266] : memref<2x1x96xf32, #tpu.memory_space<vmem>>, vector<1x1x96xf32>
    %605 = vector.shape_cast %604 : vector<1x1x96xf32> to vector<1x96xf32>
    %c1_267 = arith.constant 1 : index
    %c0_268 = arith.constant 0 : index
    %c0_269 = arith.constant 0 : index
    %606 = vector.load %arg33[%c1_267, %c0_268, %c0_269] : memref<2x32x32xf32, #tpu.memory_space<vmem>>, vector<1x32x32xf32>
    %607 = vector.shape_cast %606 : vector<1x32x32xf32> to vector<32x32xf32>
    %c1_270 = arith.constant 1 : index
    %c0_271 = arith.constant 0 : index
    %c0_272 = arith.constant 0 : index
    %608 = vector.load %arg34[%c1_270, %c0_271, %c0_272] : memref<2x1x32xf32, #tpu.memory_space<vmem>>, vector<1x1x32xf32>
    %609 = vector.shape_cast %608 : vector<1x1x32xf32> to vector<1x32xf32>
    %cst_273 = arith.constant dense<0.000000e+00> : vector<17x96xf32>
    %610 = tpu.matmul %601, %603, %cst_273 {dimension_numbers = #tpu.dot_dimension_numbers<[1], [0], [0], [1], [0, 0, 1, 1], [], []>} : vector<17x32xf32>, vector<32x96xf32>, vector<17x96xf32> -> vector<17x96xf32>
    %611 = vector.broadcast %605 : vector<1x96xf32> to vector<17x96xf32>
    %612 = arith.addf %610, %611 : vector<17x96xf32>
    %613 = vector.extract_strided_slice %612 {offsets = [0, 0], sizes = [17, 8], strides = [1, 1]} : vector<17x96xf32> to vector<17x8xf32>
    %614 = vector.shape_cast %613 : vector<17x8xf32> to vector<1x17x8xf32>
    %615 = vector.extract_strided_slice %612 {offsets = [0, 8], sizes = [17, 8], strides = [1, 1]} : vector<17x96xf32> to vector<17x8xf32>
    %616 = vector.shape_cast %615 : vector<17x8xf32> to vector<1x17x8xf32>
    %617 = vector.extract_strided_slice %612 {offsets = [0, 16], sizes = [17, 8], strides = [1, 1]} : vector<17x96xf32> to vector<17x8xf32>
    %618 = vector.shape_cast %617 : vector<17x8xf32> to vector<1x17x8xf32>
    %619 = vector.extract_strided_slice %612 {offsets = [0, 24], sizes = [17, 8], strides = [1, 1]} : vector<17x96xf32> to vector<17x8xf32>
    %620 = vector.shape_cast %619 : vector<17x8xf32> to vector<1x17x8xf32>
    %621 = tpu.concatenate %614, %616, %618, %620 in 0 : vector<1x17x8xf32>, vector<1x17x8xf32>, vector<1x17x8xf32>, vector<1x17x8xf32> -> vector<4x17x8xf32>
    %cst_274 = arith.constant 0.353553385 : f32
    %622 = vector.broadcast %cst_274 : f32 to vector<4x17x8xf32>
    %623 = arith.mulf %621, %622 : vector<4x17x8xf32>
    %624 = vector.extract_strided_slice %612 {offsets = [0, 32], sizes = [17, 8], strides = [1, 1]} : vector<17x96xf32> to vector<17x8xf32>
    %625 = vector.shape_cast %624 : vector<17x8xf32> to vector<1x17x8xf32>
    %626 = vector.extract_strided_slice %612 {offsets = [0, 40], sizes = [17, 8], strides = [1, 1]} : vector<17x96xf32> to vector<17x8xf32>
    %627 = vector.shape_cast %626 : vector<17x8xf32> to vector<1x17x8xf32>
    %628 = vector.extract_strided_slice %612 {offsets = [0, 48], sizes = [17, 8], strides = [1, 1]} : vector<17x96xf32> to vector<17x8xf32>
    %629 = vector.shape_cast %628 : vector<17x8xf32> to vector<1x17x8xf32>
    %630 = vector.extract_strided_slice %612 {offsets = [0, 56], sizes = [17, 8], strides = [1, 1]} : vector<17x96xf32> to vector<17x8xf32>
    %631 = vector.shape_cast %630 : vector<17x8xf32> to vector<1x17x8xf32>
    %632 = tpu.concatenate %625, %627, %629, %631 in 0 : vector<1x17x8xf32>, vector<1x17x8xf32>, vector<1x17x8xf32>, vector<1x17x8xf32> -> vector<4x17x8xf32>
    %633 = vector.extract_strided_slice %612 {offsets = [0, 64], sizes = [17, 8], strides = [1, 1]} : vector<17x96xf32> to vector<17x8xf32>
    %634 = vector.shape_cast %633 : vector<17x8xf32> to vector<1x17x8xf32>
    %635 = vector.extract_strided_slice %612 {offsets = [0, 72], sizes = [17, 8], strides = [1, 1]} : vector<17x96xf32> to vector<17x8xf32>
    %636 = vector.shape_cast %635 : vector<17x8xf32> to vector<1x17x8xf32>
    %637 = vector.extract_strided_slice %612 {offsets = [0, 80], sizes = [17, 8], strides = [1, 1]} : vector<17x96xf32> to vector<17x8xf32>
    %638 = vector.shape_cast %637 : vector<17x8xf32> to vector<1x17x8xf32>
    %639 = vector.extract_strided_slice %612 {offsets = [0, 88], sizes = [17, 8], strides = [1, 1]} : vector<17x96xf32> to vector<17x8xf32>
    %640 = vector.shape_cast %639 : vector<17x8xf32> to vector<1x17x8xf32>
    %641 = tpu.concatenate %634, %636, %638, %640 in 0 : vector<1x17x8xf32>, vector<1x17x8xf32>, vector<1x17x8xf32>, vector<1x17x8xf32> -> vector<4x17x8xf32>
    "tpu.trace_start"() <{level = 10 : i32, message = "hqd,hkd->hqk"}> : () -> ()
    %cst_275 = arith.constant dense<0.000000e+00> : vector<4x17x17xf32>
    %642 = tpu.matmul %623, %632, %cst_275 {dimension_numbers = #tpu.dot_dimension_numbers<[2], [2], [1], [1], [0, 0, 0, 1, 1, 1], [0], [0]>} : vector<4x17x8xf32>, vector<4x17x8xf32>, vector<4x17x17xf32> -> vector<4x17x17xf32>
    "tpu.trace_stop"() : () -> ()
    %cst_276 = arith.constant dense<0xFF800000> : vector<4x17xf32>
    %643 = vector.multi_reduction <maximumf>, %642, %cst_276 [2] : vector<4x17x17xf32> to vector<4x17xf32>
    %644 = vector.shape_cast %643 : vector<4x17xf32> to vector<4x17x1xf32>
    %645 = vector.broadcast %644 : vector<4x17x1xf32> to vector<4x17x17xf32>
    %646 = arith.subf %642, %645 : vector<4x17x17xf32>
    %647 = math.exp %646 : vector<4x17x17xf32>
    %cst_277 = arith.constant dense<0.000000e+00> : vector<4x17xf32>
    %648 = vector.multi_reduction <add>, %647, %cst_277 [2] : vector<4x17x17xf32> to vector<4x17xf32>
    %649 = vector.shape_cast %648 : vector<4x17xf32> to vector<4x17x1xf32>
    %650 = tpu.reciprocal %649 {approx = true} : vector<4x17x1xf32> -> vector<4x17x1xf32>
    %651 = vector.broadcast %650 : vector<4x17x1xf32> to vector<4x17x17xf32>
    %652 = arith.mulf %647, %651 : vector<4x17x17xf32>
    "tpu.trace_start"() <{level = 10 : i32, message = "hqk,hkd->hqd"}> : () -> ()
    %cst_278 = arith.constant dense<0.000000e+00> : vector<4x17x8xf32>
    %653 = tpu.matmul %652, %641, %cst_278 {dimension_numbers = #tpu.dot_dimension_numbers<[2], [1], [1], [2], [0, 0, 0, 1, 1, 2], [0], [0]>} : vector<4x17x17xf32>, vector<4x17x8xf32>, vector<4x17x8xf32> -> vector<4x17x8xf32>
    "tpu.trace_stop"() : () -> ()
    %654 = vector.extract_strided_slice %653 {offsets = [0, 0, 0], sizes = [1, 17, 8], strides = [1, 1, 1]} : vector<4x17x8xf32> to vector<1x17x8xf32>
    %655 = vector.shape_cast %654 : vector<1x17x8xf32> to vector<17x8xf32>
    %656 = vector.extract_strided_slice %653 {offsets = [1, 0, 0], sizes = [1, 17, 8], strides = [1, 1, 1]} : vector<4x17x8xf32> to vector<1x17x8xf32>
    %657 = vector.shape_cast %656 : vector<1x17x8xf32> to vector<17x8xf32>
    %658 = vector.extract_strided_slice %653 {offsets = [2, 0, 0], sizes = [1, 17, 8], strides = [1, 1, 1]} : vector<4x17x8xf32> to vector<1x17x8xf32>
    %659 = vector.shape_cast %658 : vector<1x17x8xf32> to vector<17x8xf32>
    %660 = vector.extract_strided_slice %653 {offsets = [3, 0, 0], sizes = [1, 17, 8], strides = [1, 1, 1]} : vector<4x17x8xf32> to vector<1x17x8xf32>
    %661 = vector.shape_cast %660 : vector<1x17x8xf32> to vector<17x8xf32>
    %662 = tpu.concatenate %655, %657, %659, %661 in 1 : vector<17x8xf32>, vector<17x8xf32>, vector<17x8xf32>, vector<17x8xf32> -> vector<17x32xf32>
    %cst_279 = arith.constant dense<0.000000e+00> : vector<17x32xf32>
    %663 = tpu.matmul %662, %607, %cst_279 {dimension_numbers = #tpu.dot_dimension_numbers<[1], [0], [0], [1], [0, 0, 1, 1], [], []>} : vector<17x32xf32>, vector<32x32xf32>, vector<17x32xf32> -> vector<17x32xf32>
    %664 = vector.broadcast %609 : vector<1x32xf32> to vector<17x32xf32>
    %665 = arith.addf %663, %664 : vector<17x32xf32>
    %666 = arith.addf %575, %665 : vector<17x32xf32>
    %c1_280 = arith.constant 1 : index
    %c0_281 = arith.constant 0 : index
    %c0_282 = arith.constant 0 : index
    %667 = vector.load %arg35[%c1_280, %c0_281, %c0_282] : memref<2x1x32xf32, #tpu.memory_space<vmem>>, vector<1x1x32xf32>
    %668 = vector.shape_cast %667 : vector<1x1x32xf32> to vector<1x32xf32>
    %c1_283 = arith.constant 1 : index
    %c0_284 = arith.constant 0 : index
    %c0_285 = arith.constant 0 : index
    %669 = vector.load %arg36[%c1_283, %c0_284, %c0_285] : memref<2x1x32xf32, #tpu.memory_space<vmem>>, vector<1x1x32xf32>
    %670 = vector.shape_cast %669 : vector<1x1x32xf32> to vector<1x32xf32>
    %cst_286 = arith.constant dense<0.000000e+00> : vector<17xf32>
    %671 = vector.multi_reduction <add>, %666, %cst_286 [1] : vector<17x32xf32> to vector<17xf32>
    %672 = vector.shape_cast %671 : vector<17xf32> to vector<17x1xf32>
    %cst_287 = arith.constant 3.200000e+01 : f32
    %673 = vector.broadcast %cst_287 : f32 to vector<17x1xf32>
    %674 = arith.divf %672, %673 : vector<17x1xf32>
    %675 = vector.broadcast %674 : vector<17x1xf32> to vector<17x32xf32>
    %676 = arith.subf %666, %675 : vector<17x32xf32>
    %677 = arith.mulf %676, %676 : vector<17x32xf32>
    %cst_288 = arith.constant dense<0.000000e+00> : vector<17xf32>
    %678 = vector.multi_reduction <add>, %677, %cst_288 [1] : vector<17x32xf32> to vector<17xf32>
    %679 = vector.shape_cast %678 : vector<17xf32> to vector<17x1xf32>
    %cst_289 = arith.constant 3.200000e+01 : f32
    %680 = vector.broadcast %cst_289 : f32 to vector<17x1xf32>
    %681 = arith.divf %679, %680 : vector<17x1xf32>
    %682 = vector.broadcast %674 : vector<17x1xf32> to vector<17x32xf32>
    %683 = arith.subf %666, %682 : vector<17x32xf32>
    %cst_290 = arith.constant 9.99999974E-6 : f32
    %684 = vector.broadcast %cst_290 : f32 to vector<17x1xf32>
    %685 = arith.addf %681, %684 : vector<17x1xf32>
    %686 = math.rsqrt %685 : vector<17x1xf32>
    %687 = vector.broadcast %686 : vector<17x1xf32> to vector<17x32xf32>
    %688 = arith.mulf %683, %687 : vector<17x32xf32>
    %689 = vector.broadcast %668 : vector<1x32xf32> to vector<17x32xf32>
    %690 = arith.mulf %688, %689 : vector<17x32xf32>
    %691 = vector.broadcast %670 : vector<1x32xf32> to vector<17x32xf32>
    %692 = arith.addf %690, %691 : vector<17x32xf32>
    %c1_291 = arith.constant 1 : index
    %c0_292 = arith.constant 0 : index
    %c0_293 = arith.constant 0 : index
    %693 = vector.load %arg37[%c1_291, %c0_292, %c0_293] : memref<2x32x128xf32, #tpu.memory_space<vmem>>, vector<1x32x128xf32>
    %694 = vector.shape_cast %693 : vector<1x32x128xf32> to vector<32x128xf32>
    %cst_294 = arith.constant dense<0.000000e+00> : vector<17x128xf32>
    %695 = tpu.matmul %692, %694, %cst_294 {dimension_numbers = #tpu.dot_dimension_numbers<[1], [0], [0], [1], [0, 0, 1, 1], [], []>} : vector<17x32xf32>, vector<32x128xf32>, vector<17x128xf32> -> vector<17x128xf32>
    %c1_295 = arith.constant 1 : index
    %c0_296 = arith.constant 0 : index
    %c0_297 = arith.constant 0 : index
    %696 = vector.load %arg38[%c1_295, %c0_296, %c0_297] : memref<2x1x128xf32, #tpu.memory_space<vmem>>, vector<1x1x128xf32>
    %697 = vector.shape_cast %696 : vector<1x1x128xf32> to vector<1x128xf32>
    %698 = vector.broadcast %697 : vector<1x128xf32> to vector<17x128xf32>
    %699 = arith.addf %695, %698 : vector<17x128xf32>
    %cst_298 = arith.constant 5.000000e-01 : f32
    %700 = vector.broadcast %cst_298 : f32 to vector<17x128xf32>
    %701 = arith.mulf %700, %699 : vector<17x128xf32>
    %cst_299 = arith.constant 0.707106769 : f32
    %702 = vector.broadcast %cst_299 : f32 to vector<17x128xf32>
    %703 = arith.mulf %699, %702 : vector<17x128xf32>
    %cst_300 = arith.constant 0.000000e+00 : f32
    %704 = vector.broadcast %cst_300 : f32 to vector<17x128xf32>
    %705 = arith.cmpf olt, %703, %704 : vector<17x128xf32>
    %cst_301 = arith.constant -1.000000e+00 : f32
    %cst_302 = arith.constant 1.000000e+00 : f32
    %706 = vector.broadcast %cst_301 : f32 to vector<17x128xf32>
    %707 = vector.broadcast %cst_302 : f32 to vector<17x128xf32>
    %708 = arith.select %705, %706, %707 : vector<17x128xi1>, vector<17x128xf32>
    %709 = math.absf %703 : vector<17x128xf32>
    %cst_303 = arith.constant 0.327591091 : f32
    %710 = vector.broadcast %cst_303 : f32 to vector<17x128xf32>
    %711 = arith.mulf %710, %709 : vector<17x128xf32>
    %cst_304 = arith.constant 1.000000e+00 : f32
    %712 = vector.broadcast %cst_304 : f32 to vector<17x128xf32>
    %713 = arith.addf %712, %711 : vector<17x128xf32>
    %cst_305 = arith.constant 1.000000e+00 : f32
    %714 = vector.broadcast %cst_305 : f32 to vector<17x128xf32>
    %715 = arith.divf %714, %713 : vector<17x128xf32>
    %cst_306 = arith.constant 1.06140542 : f32
    %716 = vector.broadcast %cst_306 : f32 to vector<17x128xf32>
    %717 = arith.mulf %716, %715 : vector<17x128xf32>
    %cst_307 = arith.constant -1.45315206 : f32
    %718 = vector.broadcast %cst_307 : f32 to vector<17x128xf32>
    %719 = arith.addf %717, %718 : vector<17x128xf32>
    %720 = arith.mulf %719, %715 : vector<17x128xf32>
    %cst_308 = arith.constant 1.42141378 : f32
    %721 = vector.broadcast %cst_308 : f32 to vector<17x128xf32>
    %722 = arith.addf %720, %721 : vector<17x128xf32>
    %723 = arith.mulf %722, %715 : vector<17x128xf32>
    %cst_309 = arith.constant -0.284496725 : f32
    %724 = vector.broadcast %cst_309 : f32 to vector<17x128xf32>
    %725 = arith.addf %723, %724 : vector<17x128xf32>
    %726 = arith.mulf %725, %715 : vector<17x128xf32>
    %cst_310 = arith.constant 0.254829586 : f32
    %727 = vector.broadcast %cst_310 : f32 to vector<17x128xf32>
    %728 = arith.addf %726, %727 : vector<17x128xf32>
    %729 = arith.mulf %728, %715 : vector<17x128xf32>
    %cst_311 = arith.constant 0.000000e+00 : f32
    %730 = vector.broadcast %cst_311 : f32 to vector<17x128xf32>
    %731 = arith.subf %730, %709 : vector<17x128xf32>
    %732 = arith.mulf %731, %709 : vector<17x128xf32>
    %733 = math.exp %732 : vector<17x128xf32>
    %734 = arith.mulf %729, %733 : vector<17x128xf32>
    %cst_312 = arith.constant 1.000000e+00 : f32
    %735 = vector.broadcast %cst_312 : f32 to vector<17x128xf32>
    %736 = arith.subf %735, %734 : vector<17x128xf32>
    %737 = arith.mulf %708, %736 : vector<17x128xf32>
    %cst_313 = arith.constant 1.000000e+00 : f32
    %738 = vector.broadcast %cst_313 : f32 to vector<17x128xf32>
    %739 = arith.addf %738, %737 : vector<17x128xf32>
    %740 = arith.mulf %701, %739 : vector<17x128xf32>
    %c1_314 = arith.constant 1 : index
    %c0_315 = arith.constant 0 : index
    %c0_316 = arith.constant 0 : index
    %741 = vector.load %arg39[%c1_314, %c0_315, %c0_316] : memref<2x128x32xf32, #tpu.memory_space<vmem>>, vector<1x128x32xf32>
    %742 = vector.shape_cast %741 : vector<1x128x32xf32> to vector<128x32xf32>
    %cst_317 = arith.constant dense<0.000000e+00> : vector<17x32xf32>
    %743 = tpu.matmul %740, %742, %cst_317 {dimension_numbers = #tpu.dot_dimension_numbers<[1], [0], [0], [1], [0, 0, 1, 1], [], []>} : vector<17x128xf32>, vector<128x32xf32>, vector<17x32xf32> -> vector<17x32xf32>
    %c1_318 = arith.constant 1 : index
    %c0_319 = arith.constant 0 : index
    %c0_320 = arith.constant 0 : index
    %744 = vector.load %arg40[%c1_318, %c0_319, %c0_320] : memref<2x1x32xf32, #tpu.memory_space<vmem>>, vector<1x1x32xf32>
    %745 = vector.shape_cast %744 : vector<1x1x32xf32> to vector<1x32xf32>
    %746 = vector.broadcast %745 : vector<1x32xf32> to vector<17x32xf32>
    %747 = arith.addf %743, %746 : vector<17x32xf32>
    %748 = arith.addf %666, %747 : vector<17x32xf32>
    %c0_321 = arith.constant 0 : index
    %c0_322 = arith.constant 0 : index
    %749 = vector.load %arg41[%c0_321, %c0_322] : memref<1x32xf32, #tpu.memory_space<vmem>>, vector<1x32xf32>
    %c0_323 = arith.constant 0 : index
    %c0_324 = arith.constant 0 : index
    %750 = vector.load %arg42[%c0_323, %c0_324] : memref<1x32xf32, #tpu.memory_space<vmem>>, vector<1x32xf32>
    %cst_325 = arith.constant dense<0.000000e+00> : vector<17xf32>
    %751 = vector.multi_reduction <add>, %748, %cst_325 [1] : vector<17x32xf32> to vector<17xf32>
    %752 = vector.shape_cast %751 : vector<17xf32> to vector<17x1xf32>
    %cst_326 = arith.constant 3.200000e+01 : f32
    %753 = vector.broadcast %cst_326 : f32 to vector<17x1xf32>
    %754 = arith.divf %752, %753 : vector<17x1xf32>
    %755 = vector.broadcast %754 : vector<17x1xf32> to vector<17x32xf32>
    %756 = arith.subf %748, %755 : vector<17x32xf32>
    %757 = arith.mulf %756, %756 : vector<17x32xf32>
    %cst_327 = arith.constant dense<0.000000e+00> : vector<17xf32>
    %758 = vector.multi_reduction <add>, %757, %cst_327 [1] : vector<17x32xf32> to vector<17xf32>
    %759 = vector.shape_cast %758 : vector<17xf32> to vector<17x1xf32>
    %cst_328 = arith.constant 3.200000e+01 : f32
    %760 = vector.broadcast %cst_328 : f32 to vector<17x1xf32>
    %761 = arith.divf %759, %760 : vector<17x1xf32>
    %762 = vector.broadcast %754 : vector<17x1xf32> to vector<17x32xf32>
    %763 = arith.subf %748, %762 : vector<17x32xf32>
    %cst_329 = arith.constant 9.99999974E-6 : f32
    %764 = vector.broadcast %cst_329 : f32 to vector<17x1xf32>
    %765 = arith.addf %761, %764 : vector<17x1xf32>
    %766 = math.rsqrt %765 : vector<17x1xf32>
    %767 = vector.broadcast %766 : vector<17x1xf32> to vector<17x32xf32>
    %768 = arith.mulf %763, %767 : vector<17x32xf32>
    %769 = vector.broadcast %749 : vector<1x32xf32> to vector<17x32xf32>
    %770 = arith.mulf %768, %769 : vector<17x32xf32>
    %771 = vector.broadcast %750 : vector<1x32xf32> to vector<17x32xf32>
    %772 = arith.addf %770, %771 : vector<17x32xf32>
    %c0_330 = arith.constant 0 : index
    %c0_331 = arith.constant 0 : index
    %773 = vector.load %arg43[%c0_330, %c0_331] : memref<32x48xf32, #tpu.memory_space<vmem>>, vector<32x48xf32>
    %cst_332 = arith.constant dense<0.000000e+00> : vector<17x48xf32>
    %774 = tpu.matmul %772, %773, %cst_332 {dimension_numbers = #tpu.dot_dimension_numbers<[1], [0], [0], [1], [0, 0, 1, 1], [], []>} : vector<17x32xf32>, vector<32x48xf32>, vector<17x48xf32> -> vector<17x48xf32>
    %c0_333 = arith.constant 0 : index
    %c0_334 = arith.constant 0 : index
    %775 = vector.load %arg44[%c0_333, %c0_334] : memref<1x48xf32, #tpu.memory_space<vmem>>, vector<1x48xf32>
    %776 = vector.broadcast %775 : vector<1x48xf32> to vector<17x48xf32>
    %777 = arith.addf %774, %776 : vector<17x48xf32>
    %778 = vector.extract_strided_slice %777 {offsets = [1, 0], sizes = [16, 48], strides = [1, 1]} : vector<17x48xf32> to vector<16x48xf32>
    %c0_335 = arith.constant 0 : index
    %c0_336 = arith.constant 0 : index
    %c0_337 = arith.constant 0 : index
    %779 = vector.load %arg45[%c0_335, %c0_336, %c0_337] : memref<1x16x48xf32, #tpu.memory_space<vmem>>, vector<1x16x48xf32>
    %780 = vector.shape_cast %779 : vector<1x16x48xf32> to vector<16x48xf32>
    %781 = vector.shape_cast %778 : vector<16x48xf32> to vector<1x16x48xf32>
    tpu.vector_store %arg45[%c0_335, %c0_336, %c0_337], %781 {strides = array<i32>} : memref<1x16x48xf32, #tpu.memory_space<vmem>>, vector<1x16x48xf32>,
    %c0_338 = arith.constant 0 : index
    %c0_339 = arith.constant 0 : index
    %c0_340 = arith.constant 0 : index
    %782 = vector.load %arg2[%c0_338, %c0_339, %c0_340] : memref<1x16x48xf32, #tpu.memory_space<vmem>>, vector<1x16x48xf32>
    %783 = vector.shape_cast %782 : vector<1x16x48xf32> to vector<16x48xf32>
    %784 = arith.subf %778, %783 : vector<16x48xf32>
    %785 = arith.mulf %784, %784 : vector<16x48xf32>
    %cst_341 = arith.constant dense<0.000000e+00> : vector<16xf32>
    %786 = vector.multi_reduction <add>, %785, %cst_341 [1] : vector<16x48xf32> to vector<16xf32>
    %787 = vector.shape_cast %786 : vector<16xf32> to vector<16x1xf32>
    %cst_342 = arith.constant 4.800000e+01 : f32
    %788 = vector.broadcast %cst_342 : f32 to vector<16x1xf32>
    %789 = arith.divf %787, %788 : vector<16x1xf32>
    %c0_343 = arith.constant 0 : index
    %c0_344 = arith.constant 0 : index
    %c0_345 = arith.constant 0 : index
    %790 = vector.load %arg3[%c0_343, %c0_344, %c0_345] : memref<1x16x1xf32, #tpu.memory_space<vmem>>, vector<1x16x1xf32>
    %791 = vector.shape_cast %790 : vector<1x16x1xf32> to vector<16x1xf32>
    %792 = arith.mulf %789, %791 : vector<16x1xf32>
    %cst_346 = arith.constant dense<0.000000e+00> : vector<1xf32>
    %793 = vector.multi_reduction <add>, %792, %cst_346 [0] : vector<16x1xf32> to vector<1xf32>
    %794 = vector.shape_cast %793 : vector<1xf32> to vector<1x1xf32>
    %cst_347 = arith.constant dense<0.000000e+00> : vector<1xf32>
    %795 = vector.multi_reduction <add>, %791, %cst_347 [0] : vector<16x1xf32> to vector<1xf32>
    %796 = vector.shape_cast %795 : vector<1xf32> to vector<1x1xf32>
    %797 = tpu.concatenate %794, %796 in 1 : vector<1x1xf32>, vector<1x1xf32> -> vector<1x2xf32>
    %c0_348 = arith.constant 0 : index
    %c0_349 = arith.constant 0 : index
    %c0_350 = arith.constant 0 : index
    %798 = vector.load %arg46[%c0_348, %c0_349, %c0_350] : memref<1x1x2xf32, #tpu.memory_space<vmem>>, vector<1x1x2xf32>
    %799 = vector.shape_cast %798 : vector<1x1x2xf32> to vector<1x2xf32>
    %800 = vector.shape_cast %797 : vector<1x2xf32> to vector<1x1x2xf32>
    tpu.vector_store %arg46[%c0_348, %c0_349, %c0_350], %800 {strides = array<i32>} : memref<1x1x2xf32, #tpu.memory_space<vmem>>, vector<1x1x2xf32>,
    return
  }
  func.func @transform_0(%arg0: i32) -> (i32, i32, i32) {
    %c0_i32 = arith.constant 0 : i32
    %c0_i32_0 = arith.constant 0 : i32
    %c0_i32_1 = arith.constant 0 : i32
    return %arg0, %c0_i32, %c0_i32_0 : i32, i32, i32
  }
  func.func @transform_1(%arg0: i32) -> (i32, i32, i32) {
    %c0_i32 = arith.constant 0 : i32
    %c0_i32_0 = arith.constant 0 : i32
    %c0_i32_1 = arith.constant 0 : i32
    return %arg0, %c0_i32, %c0_i32_0 : i32, i32, i32
  }
  func.func @transform_2(%arg0: i32) -> (i32, i32, i32) {
    %c0_i32 = arith.constant 0 : i32
    %c0_i32_0 = arith.constant 0 : i32
    %c0_i32_1 = arith.constant 0 : i32
    return %arg0, %c0_i32, %c0_i32_0 : i32, i32, i32
  }
  func.func @transform_3(%arg0: i32) -> (i32, i32, i32) {
    %c0_i32 = arith.constant 0 : i32
    %c0_i32_0 = arith.constant 0 : i32
    %c0_i32_1 = arith.constant 0 : i32
    return %arg0, %c0_i32, %c0_i32_0 : i32, i32, i32
  }
  func.func @transform_4(%arg0: i32) -> (i32, i32, i32) {
    %c0_i32 = arith.constant 0 : i32
    %c0_i32_0 = arith.constant 0 : i32
    %c0_i32_1 = arith.constant 0 : i32
    return %arg0, %c0_i32, %c0_i32_0 : i32, i32, i32
  }
  func.func @transform_5(%arg0: i32) -> (i32, i32) {
    %c0_i32 = arith.constant 0 : i32
    %c0_i32_0 = arith.constant 0 : i32
    %c0_i32_1 = arith.constant 0 : i32
    return %c0_i32, %c0_i32_0 : i32, i32
  }
  func.func @transform_6(%arg0: i32) -> (i32, i32) {
    %c0_i32 = arith.constant 0 : i32
    %c0_i32_0 = arith.constant 0 : i32
    %c0_i32_1 = arith.constant 0 : i32
    return %c0_i32, %c0_i32_0 : i32, i32
  }
  func.func @transform_7(%arg0: i32) -> (i32, i32) {
    %c0_i32 = arith.constant 0 : i32
    %c0_i32_0 = arith.constant 0 : i32
    %c0_i32_1 = arith.constant 0 : i32
    return %c0_i32, %c0_i32_0 : i32, i32
  }
  func.func @transform_8(%arg0: i32) -> (i32, i32) {
    %c0_i32 = arith.constant 0 : i32
    %c0_i32_0 = arith.constant 0 : i32
    %c0_i32_1 = arith.constant 0 : i32
    return %c0_i32, %c0_i32_0 : i32, i32
  }
  func.func @transform_9(%arg0: i32) -> (i32, i32) {
    %c0_i32 = arith.constant 0 : i32
    %c0_i32_0 = arith.constant 0 : i32
    %c0_i32_1 = arith.constant 0 : i32
    return %c0_i32, %c0_i32_0 : i32, i32
  }
  func.func @transform_10(%arg0: i32) -> (i32, i32, i32) {
    %c0_i32 = arith.constant 0 : i32
    %c0_i32_0 = arith.constant 0 : i32
    %c0_i32_1 = arith.constant 0 : i32
    %c0_i32_2 = arith.constant 0 : i32
    return %c0_i32, %c0_i32_0, %c0_i32_1 : i32, i32, i32
  }
  func.func @transform_11(%arg0: i32) -> (i32, i32, i32) {
    %c0_i32 = arith.constant 0 : i32
    %c0_i32_0 = arith.constant 0 : i32
    %c0_i32_1 = arith.constant 0 : i32
    %c0_i32_2 = arith.constant 0 : i32
    return %c0_i32, %c0_i32_0, %c0_i32_1 : i32, i32, i32
  }
  func.func @transform_12(%arg0: i32) -> (i32, i32, i32) {
    %c0_i32 = arith.constant 0 : i32
    %c0_i32_0 = arith.constant 0 : i32
    %c0_i32_1 = arith.constant 0 : i32
    %c0_i32_2 = arith.constant 0 : i32
    return %c0_i32, %c0_i32_0, %c0_i32_1 : i32, i32, i32
  }
  func.func @transform_13(%arg0: i32) -> (i32, i32, i32) {
    %c0_i32 = arith.constant 0 : i32
    %c0_i32_0 = arith.constant 0 : i32
    %c0_i32_1 = arith.constant 0 : i32
    %c0_i32_2 = arith.constant 0 : i32
    return %c0_i32, %c0_i32_0, %c0_i32_1 : i32, i32, i32
  }
  func.func @transform_14(%arg0: i32) -> (i32, i32, i32) {
    %c0_i32 = arith.constant 0 : i32
    %c0_i32_0 = arith.constant 0 : i32
    %c0_i32_1 = arith.constant 0 : i32
    %c0_i32_2 = arith.constant 0 : i32
    return %c0_i32, %c0_i32_0, %c0_i32_1 : i32, i32, i32
  }
  func.func @transform_15(%arg0: i32) -> (i32, i32, i32) {
    %c0_i32 = arith.constant 0 : i32
    %c0_i32_0 = arith.constant 0 : i32
    %c0_i32_1 = arith.constant 0 : i32
    %c0_i32_2 = arith.constant 0 : i32
    return %c0_i32, %c0_i32_0, %c0_i32_1 : i32, i32, i32
  }
  func.func @transform_16(%arg0: i32) -> (i32, i32, i32) {
    %c0_i32 = arith.constant 0 : i32
    %c0_i32_0 = arith.constant 0 : i32
    %c0_i32_1 = arith.constant 0 : i32
    %c0_i32_2 = arith.constant 0 : i32
    return %c0_i32, %c0_i32_0, %c0_i32_1 : i32, i32, i32
  }
  func.func @transform_17(%arg0: i32) -> (i32, i32, i32) {
    %c0_i32 = arith.constant 0 : i32
    %c0_i32_0 = arith.constant 0 : i32
    %c0_i32_1 = arith.constant 0 : i32
    %c0_i32_2 = arith.constant 0 : i32
    return %c0_i32, %c0_i32_0, %c0_i32_1 : i32, i32, i32
  }
  func.func @transform_18(%arg0: i32) -> (i32, i32, i32) {
    %c0_i32 = arith.constant 0 : i32
    %c0_i32_0 = arith.constant 0 : i32
    %c0_i32_1 = arith.constant 0 : i32
    %c0_i32_2 = arith.constant 0 : i32
    return %c0_i32, %c0_i32_0, %c0_i32_1 : i32, i32, i32
  }
  func.func @transform_19(%arg0: i32) -> (i32, i32, i32) {
    %c0_i32 = arith.constant 0 : i32
    %c0_i32_0 = arith.constant 0 : i32
    %c0_i32_1 = arith.constant 0 : i32
    %c0_i32_2 = arith.constant 0 : i32
    return %c0_i32, %c0_i32_0, %c0_i32_1 : i32, i32, i32
  }
  func.func @transform_20(%arg0: i32) -> (i32, i32, i32) {
    %c0_i32 = arith.constant 0 : i32
    %c0_i32_0 = arith.constant 0 : i32
    %c0_i32_1 = arith.constant 0 : i32
    %c0_i32_2 = arith.constant 0 : i32
    return %c0_i32, %c0_i32_0, %c0_i32_1 : i32, i32, i32
  }
  func.func @transform_21(%arg0: i32) -> (i32, i32, i32) {
    %c0_i32 = arith.constant 0 : i32
    %c0_i32_0 = arith.constant 0 : i32
    %c0_i32_1 = arith.constant 0 : i32
    %c0_i32_2 = arith.constant 0 : i32
    return %c0_i32, %c0_i32_0, %c0_i32_1 : i32, i32, i32
  }
  func.func @transform_22(%arg0: i32) -> (i32, i32) {
    %c0_i32 = arith.constant 0 : i32
    %c0_i32_0 = arith.constant 0 : i32
    %c0_i32_1 = arith.constant 0 : i32
    return %c0_i32, %c0_i32_0 : i32, i32
  }
  func.func @transform_23(%arg0: i32) -> (i32, i32) {
    %c0_i32 = arith.constant 0 : i32
    %c0_i32_0 = arith.constant 0 : i32
    %c0_i32_1 = arith.constant 0 : i32
    return %c0_i32, %c0_i32_0 : i32, i32
  }
  func.func @transform_24(%arg0: i32) -> (i32, i32) {
    %c0_i32 = arith.constant 0 : i32
    %c0_i32_0 = arith.constant 0 : i32
    %c0_i32_1 = arith.constant 0 : i32
    return %c0_i32, %c0_i32_0 : i32, i32
  }
  func.func @transform_25(%arg0: i32) -> (i32, i32) {
    %c0_i32 = arith.constant 0 : i32
    %c0_i32_0 = arith.constant 0 : i32
    %c0_i32_1 = arith.constant 0 : i32
    return %c0_i32, %c0_i32_0 : i32, i32
  }
  func.func @transform_26(%arg0: i32) -> (i32, i32) {
    %c0_i32 = arith.constant 0 : i32
    %c0_i32_0 = arith.constant 0 : i32
    %c0_i32_1 = arith.constant 0 : i32
    return %c0_i32, %c0_i32_0 : i32, i32
  }
  func.func @transform_27(%arg0: i32) -> (i32, i32) {
    %c0_i32 = arith.constant 0 : i32
    %c0_i32_0 = arith.constant 0 : i32
    %c0_i32_1 = arith.constant 0 : i32
    return %c0_i32, %c0_i32_0 : i32, i32
  }
  func.func @transform_28(%arg0: i32) -> (i32, i32, i32) {
    %c0_i32 = arith.constant 0 : i32
    %c0_i32_0 = arith.constant 0 : i32
    %c0_i32_1 = arith.constant 0 : i32
    %c0_i32_2 = arith.constant 0 : i32
    return %c0_i32, %c0_i32_0, %c0_i32_1 : i32, i32, i32
  }
  func.func @transform_29(%arg0: i32) -> (i32, i32, i32) {
    %c0_i32 = arith.constant 0 : i32
    %c0_i32_0 = arith.constant 0 : i32
    %c0_i32_1 = arith.constant 0 : i32
    %c0_i32_2 = arith.constant 0 : i32
    return %c0_i32, %c0_i32_0, %c0_i32_1 : i32, i32, i32
  }
  func.func @transform_30(%arg0: i32) -> (i32, i32, i32) {
    %c0_i32 = arith.constant 0 : i32
    %c0_i32_0 = arith.constant 0 : i32
    %c0_i32_1 = arith.constant 0 : i32
    %c0_i32_2 = arith.constant 0 : i32
    return %c0_i32, %c0_i32_0, %c0_i32_1 : i32, i32, i32
  }
  func.func @transform_31(%arg0: i32) -> (i32, i32, i32) {
    %c0_i32 = arith.constant 0 : i32
    %c0_i32_0 = arith.constant 0 : i32
    %c0_i32_1 = arith.constant 0 : i32
    %c0_i32_2 = arith.constant 0 : i32
    return %c0_i32, %c0_i32_0, %c0_i32_1 : i32, i32, i32
  }
  func.func @transform_32(%arg0: i32) -> (i32, i32, i32) {
    %c0_i32 = arith.constant 0 : i32
    %c0_i32_0 = arith.constant 0 : i32
    %c0_i32_1 = arith.constant 0 : i32
    %c0_i32_2 = arith.constant 0 : i32
    return %c0_i32, %c0_i32_0, %c0_i32_1 : i32, i32, i32
  }
  func.func @transform_33(%arg0: i32) -> (i32, i32, i32) {
    %c0_i32 = arith.constant 0 : i32
    %c0_i32_0 = arith.constant 0 : i32
    %c0_i32_1 = arith.constant 0 : i32
    %c0_i32_2 = arith.constant 0 : i32
    return %c0_i32, %c0_i32_0, %c0_i32_1 : i32, i32, i32
  }
  func.func @transform_34(%arg0: i32) -> (i32, i32, i32) {
    %c0_i32 = arith.constant 0 : i32
    %c0_i32_0 = arith.constant 0 : i32
    %c0_i32_1 = arith.constant 0 : i32
    %c0_i32_2 = arith.constant 0 : i32
    return %c0_i32, %c0_i32_0, %c0_i32_1 : i32, i32, i32
  }
  func.func @transform_35(%arg0: i32) -> (i32, i32, i32) {
    %c0_i32 = arith.constant 0 : i32
    %c0_i32_0 = arith.constant 0 : i32
    %c0_i32_1 = arith.constant 0 : i32
    %c0_i32_2 = arith.constant 0 : i32
    return %c0_i32, %c0_i32_0, %c0_i32_1 : i32, i32, i32
  }
  func.func @transform_36(%arg0: i32) -> (i32, i32, i32) {
    %c0_i32 = arith.constant 0 : i32
    %c0_i32_0 = arith.constant 0 : i32
    %c0_i32_1 = arith.constant 0 : i32
    %c0_i32_2 = arith.constant 0 : i32
    return %c0_i32, %c0_i32_0, %c0_i32_1 : i32, i32, i32
  }
  func.func @transform_37(%arg0: i32) -> (i32, i32, i32) {
    %c0_i32 = arith.constant 0 : i32
    %c0_i32_0 = arith.constant 0 : i32
    %c0_i32_1 = arith.constant 0 : i32
    %c0_i32_2 = arith.constant 0 : i32
    return %c0_i32, %c0_i32_0, %c0_i32_1 : i32, i32, i32
  }
  func.func @transform_38(%arg0: i32) -> (i32, i32, i32) {
    %c0_i32 = arith.constant 0 : i32
    %c0_i32_0 = arith.constant 0 : i32
    %c0_i32_1 = arith.constant 0 : i32
    %c0_i32_2 = arith.constant 0 : i32
    return %c0_i32, %c0_i32_0, %c0_i32_1 : i32, i32, i32
  }
  func.func @transform_39(%arg0: i32) -> (i32, i32, i32) {
    %c0_i32 = arith.constant 0 : i32
    %c0_i32_0 = arith.constant 0 : i32
    %c0_i32_1 = arith.constant 0 : i32
    %c0_i32_2 = arith.constant 0 : i32
    return %c0_i32, %c0_i32_0, %c0_i32_1 : i32, i32, i32
  }
  func.func @transform_40(%arg0: i32) -> (i32, i32) {
    %c0_i32 = arith.constant 0 : i32
    %c0_i32_0 = arith.constant 0 : i32
    %c0_i32_1 = arith.constant 0 : i32
    return %c0_i32, %c0_i32_0 : i32, i32
  }
  func.func @transform_41(%arg0: i32) -> (i32, i32) {
    %c0_i32 = arith.constant 0 : i32
    %c0_i32_0 = arith.constant 0 : i32
    %c0_i32_1 = arith.constant 0 : i32
    return %c0_i32, %c0_i32_0 : i32, i32
  }
  func.func @transform_42(%arg0: i32) -> (i32, i32) {
    %c0_i32 = arith.constant 0 : i32
    %c0_i32_0 = arith.constant 0 : i32
    %c0_i32_1 = arith.constant 0 : i32
    return %c0_i32, %c0_i32_0 : i32, i32
  }
  func.func @transform_43(%arg0: i32) -> (i32, i32) {
    %c0_i32 = arith.constant 0 : i32
    %c0_i32_0 = arith.constant 0 : i32
    %c0_i32_1 = arith.constant 0 : i32
    return %c0_i32, %c0_i32_0 : i32, i32
  }
  func.func @transform_44(%arg0: i32) -> (i32, i32, i32) {
    %c0_i32 = arith.constant 0 : i32
    %c0_i32_0 = arith.constant 0 : i32
    %c0_i32_1 = arith.constant 0 : i32
    return %arg0, %c0_i32, %c0_i32_0 : i32, i32, i32
  }
  func.func @transform_45(%arg0: i32) -> (i32, i32, i32) {
    %c0_i32 = arith.constant 0 : i32
    %c0_i32_0 = arith.constant 0 : i32
    %c0_i32_1 = arith.constant 0 : i32
    return %arg0, %c0_i32, %c0_i32_0 : i32, i32, i32
  }
}

</mosaic_0001>

<bundles_post_ra>
// kernel: mae_forward.1
= control target key start
LH: loop header
LB: loop body
LE: loop exit
PB: predicated region body
PF: predicated region fallthrough
CT: control target
= control target key end

     0   :  { %s9784_s6 = smov 1   ;;  %s9785_s10 = smov 2   ;;  %s11496_s0 = inlined_call_operand.smem [shape: u32[46], index: -1, kind: input, shape index: {}] }
   0x1   :  { %s9852_s5 = sld [smem:[%s11496_s0]]   ;;  %s9786_s14 = smov 3  }
   0x2   :  { %s9857_s9 = sld [smem:[%s11496_s0 + %s9784_s6]]   ;;  %s9787_s18 = smov 4  }
   0x3   :  { %s9862_s13 = sld [smem:[%s11496_s0 + %s9785_s10]]   ;;  %s9788_s22 = smov 5  }
   0x4   :  { %s9867_s17 = sld [smem:[%s11496_s0 + %s9786_s14]]   ;;  %s9789_s26 = smov 6  }
   0x5   :  { %s9872_s21 = sld [smem:[%s11496_s0 + %s9787_s18]]   ;;  %s9790_s30 = smov 7  }
   0x6   :  { %s9877_s25 = sld [smem:[%s11496_s0 + %s9788_s22]]   ;;  %s9791_s4 = smov 8  }
   0x7   :  { %11553 = sst [smem:[#allocation5_spill]] %s9852_s5  ;;  %s9792_s10 = smov 9  }
   0x8   :  { %11554 = sst [smem:[#allocation6_spill]] %s9857_s9  ;;  %s9793_s15 = smov 10  }
   0x9   :  { %11555 = sst [smem:[#allocation7_spill]] %s9862_s13  ;;  %s9794_s20 = smov 11  }
   0xa   :  { %11556 = sst [smem:[#allocation8_spill]] %s9867_s17  ;;  %s9796_s1 = smov 13  }
   0xb   :  { %11557 = sst [smem:[#allocation9_spill]] %s9872_s21  ;;  %s9797_s7 = smov 14  }
   0xc   :  { %11558 = sst [smem:[#allocation10_spill]] %s9877_s25  ;;  %s9799_s22 = smov 16  }
   0xd   :  { %s9882_s29 = sld [smem:[%s11496_s0 + %s9789_s26]]   ;;  %s9795_s26 = smov 12  }
   0xe   :  { %s9887_s3 = sld [smem:[%s11496_s0 + %s9790_s30]]   ;;  %s9800_s28 = smov 17  }
   0xf   :  { %s9892_s8 = sld [smem:[%s11496_s0 + %s9791_s4]]  }
  0x10   :  { %s9897_s14 = sld [smem:[%s11496_s0 + %s9792_s10]]  }
  0x11   :  { %s9902_s19 = sld [smem:[%s11496_s0 + %s9793_s15]]   ;;  %s9798_s15 = smov 15  }
  0x12   :  { %s9907_s24 = sld [smem:[%s11496_s0 + %s9794_s20]]  }
  0x13   :  { %11559 = sst [smem:[#allocation11_spill]] %s9882_s29 }
  0x14   :  { %11560 = sst [smem:[#allocation12_spill]] %s9887_s3 }
  0x15   :  { %11561 = sst [smem:[#allocation13_spill]] %s9892_s8 }
  0x16   :  { %11562 = sst [smem:[#allocation14_spill]] %s9897_s14 }
  0x17   :  { %11563 = sst [smem:[#allocation15_spill]] %s9902_s19 }
  0x18   :  { %11564 = sst [smem:[#allocation16_spill]] %s9907_s24 }
  0x19   :  { %s9912_s30 = sld [smem:[%s11496_s0 + %s9795_s26]]  }
  0x1a   :  { %s9917_s6 = sld [smem:[%s11496_s0 + %s9796_s1]]  }
  0x1b   :  { %s9922_s12 = sld [smem:[%s11496_s0 + %s9797_s7]]   ;;  %s9801_s7 = smov 18  }
  0x1c   :  { %s9927_s20 = sld [smem:[%s11496_s0 + %s9798_s15]]   ;;  %s9802_s15 = smov 19  }
  0x1d   :  { %s9932_s27 = sld [smem:[%s11496_s0 + %s9799_s22]]   ;;  %s9803_s22 = smov 20  }
  0x1e   :  { %s9937_s4 = sld [smem:[%s11496_s0 + %s9800_s28]]   ;;  %s9804_s28 = smov 21  }
  0x1f   :  { %11565 = sst [smem:[#allocation17_spill]] %s9912_s30 }
  0x20   :  { %11566 = sst [smem:[#allocation18_spill]] %s9917_s6 }
  0x21   :  { %11567 = sst [smem:[#allocation19_spill]] %s9922_s12 }
  0x22   :  { %11568 = sst [smem:[#allocation20_spill]] %s9927_s20 }
  0x23   :  { %11569 = sst [smem:[#allocation21_spill]] %s9932_s27 }
  0x24   :  { %11570 = sst [smem:[#allocation22_spill]] %s9937_s4 }
  0x25   :  { %s9942_s9 = sld [smem:[%s11496_s0 + %s9801_s7]]   ;;  %s9805_s7 = smov 22  }
  0x26   :  { %s9947_s13 = sld [smem:[%s11496_s0 + %s9802_s15]]   ;;  %s9806_s15 = smov 23  }
  0x27   :  { %s9952_s21 = sld [smem:[%s11496_s0 + %s9803_s22]]   ;;  %s9807_s22 = smov 24  }
  0x28   :  { %s9957_s4 = sld [smem:[%s11496_s0 + %s9804_s28]]   ;;  %s9808_s28 = smov 25  }
  0x29   :  { %s9962_s27 = sld [smem:[%s11496_s0 + %s9805_s7]]   ;;  %s9809_s7 = smov 26  }
  0x2b   :  { %11571 = sst [smem:[#allocation23_spill]] %s9942_s9 }
  0x2c   :  { %11572 = sst [smem:[#allocation24_spill]] %s9947_s13 }
  0x2d   :  { %11573 = sst [smem:[#allocation25_spill]] %s9952_s21 }
  0x2e   :  { %11574 = sst [smem:[#allocation26_spill]] %s9957_s4 }
  0x2f   :  { %11575 = sst [smem:[#allocation27_spill]] %s9962_s27 }
  0x30   :  { %s9967_s13 = sld [smem:[%s11496_s0 + %s9806_s15]]   ;;  %s9810_s15 = smov 27  }
  0x31   :  { %s9972_s21 = sld [smem:[%s11496_s0 + %s9807_s22]]   ;;  %s9811_s22 = smov 28  }
  0x32   :  { %s9977_s4 = sld [smem:[%s11496_s0 + %s9808_s28]]   ;;  %s9812_s28 = smov 29  }
  0x33   :  { %s9982_s27 = sld [smem:[%s11496_s0 + %s9809_s7]]   ;;  %s9813_s7 = smov 30  }
  0x36   :  { %11576 = sst [smem:[#allocation28_spill]] %s9967_s13 }
  0x37   :  { %11577 = sst [smem:[#allocation29_spill]] %s9972_s21 }
  0x38   :  { %11578 = sst [smem:[#allocation30_spill]] %s9977_s4 }
  0x39   :  { %11579 = sst [smem:[#allocation31_spill]] %s9982_s27 }
  0x3a   :  { %s9987_s13 = sld [smem:[%s11496_s0 + %s9810_s15]]   ;;  %s9814_s15 = smov 31  }
  0x3b   :  { %s9992_s21 = sld [smem:[%s11496_s0 + %s9811_s22]]   ;;  %s9815_s22 = smov 32  }
  0x3c   :  { %s9997_s4 = sld [smem:[%s11496_s0 + %s9812_s28]]   ;;  %s9816_s28 = smov 33  }
  0x3d   :  { %s10002_s27 = sld [smem:[%s11496_s0 + %s9813_s7]]   ;;  %s9817_s7 = smov 34  }
  0x40   :  { %11580 = sst [smem:[#allocation32_spill]] %s9987_s13 }
  0x41   :  { %11581 = sst [smem:[#allocation33_spill]] %s9992_s21 }
  0x42   :  { %11582 = sst [smem:[#allocation34_spill]] %s9997_s4 }
  0x43   :  { %11583 = sst [smem:[#allocation35_spill]] %s10002_s27 }
  0x44   :  { %s10007_s13 = sld [smem:[%s11496_s0 + %s9814_s15]]   ;;  %s9818_s15 = smov 35  }
  0x45   :  { %s10012_s21 = sld [smem:[%s11496_s0 + %s9815_s22]]   ;;  %s9819_s22 = smov 36  }
  0x46   :  { %s10017_s4 = sld [smem:[%s11496_s0 + %s9816_s28]]   ;;  %s9820_s28 = smov 37  }
  0x47   :  { %s10022_s27 = sld [smem:[%s11496_s0 + %s9817_s7]]   ;;  %s9821_s7 = smov 38  }
  0x4a   :  { %11584 = sst [smem:[#allocation36_spill]] %s10007_s13 }
  0x4b   :  { %11585 = sst [smem:[#allocation37_spill]] %s10012_s21 }
  0x4c   :  { %11586 = sst [smem:[#allocation38_spill]] %s10017_s4 }
  0x4d   :  { %11587 = sst [smem:[#allocation39_spill]] %s10022_s27 }
  0x4e   :  { %s10027_s13 = sld [smem:[%s11496_s0 + %s9818_s15]]   ;;  %s9822_s15 = smov 39  }
  0x4f   :  { %s10032_s21 = sld [smem:[%s11496_s0 + %s9819_s22]]   ;;  %s9823_s22 = smov 40  }
  0x50   :  { %s10037_s4 = sld [smem:[%s11496_s0 + %s9820_s28]]   ;;  %s9824_s28 = smov 41  }
  0x51   :  { %s10042_s27 = sld [smem:[%s11496_s0 + %s9821_s7]]   ;;  %s9825_s7 = smov 42  }
  0x54   :  { %11588 = sst [smem:[#allocation40_spill]] %s10027_s13 }
  0x55   :  { %11589 = sst [smem:[#allocation41_spill]] %s10032_s21 }
  0x56   :  { %11590 = sst [smem:[#allocation42_spill]] %s10037_s4 }
  0x57   :  { %11591 = sst [smem:[#allocation43_spill]] %s10042_s27 }
  0x58   :  { %s10047_s13 = sld [smem:[%s11496_s0 + %s9822_s15]]   ;;  %s9826_s15 = smov 43  }
  0x59   :  { %s10052_s21 = sld [smem:[%s11496_s0 + %s9823_s22]]   ;;  %s9827_s22 = smov 44  }
  0x5a   :  { %s10057_s4 = sld [smem:[%s11496_s0 + %s9824_s28]]   ;;  %s9828_s28 = smov 45  }
  0x5b   :  { %s10062_s27 = sld [smem:[%s11496_s0 + %s9825_s7]]  }
  0x5e   :  { %11592 = sst [smem:[#allocation44_spill]] %s10047_s13 }
  0x5f   :  { %11593 = sst [smem:[#allocation45_spill]] %s10052_s21 }
  0x60   :  { %11594 = sst [smem:[#allocation46_spill]] %s10057_s4 }
  0x61   :  { %s10067_s13 = sld [smem:[%s11496_s0 + %s9826_s15]]  }
  0x62   :  { %s10072_s21 = sld [smem:[%s11496_s0 + %s9827_s22]]  }
  0x63   :  { %s10077_s4 = sld [smem:[%s11496_s0 + %s9828_s28]]  }
  0x69   :  { %11595 = sst [smem:[#allocation47_spill]] %s10077_s4 }
  0x6a   :  { %97 = vsyncpa [#allocation3], 0 }
  0x6b   :  { %99 = vsyncpa [#allocation3 + $0x1], 0  ;;  %s10079_s7 = smov 0   ;;  %s10081_s10 = smov 0  }
  0x6c   :  { %s10083_s11 = smov 0   ;;  %s10085_s15 = smov 0  }
  0x6d LB: > { %s11596_s20 = sld [smem:[#allocation20_spill]]  ;;  %s11597_s12 = sld [smem:[#allocation19_spill]]  ;;  %s9770_s7 = sphi %s10079_s7, %s11662_s7   ;;  %s9782_s15 = sphi %s10085_s15, %s11659_s15   ;;  %s9778_s11 = sphi %s10083_s11, %s11661_s11   ;;  %s9774_s10 = sphi %s10081_s10, %s11663_s10  }
  0x6e   : > { %s11598_s9 = sld [smem:[#allocation23_spill]]  ;;  %s11599_s30 = sld [smem:[#allocation17_spill]] }
  0x6f   : > { %s11600_s24 = sld [smem:[#allocation16_spill]]  ;;  %s11601_s6 = sld [smem:[#allocation18_spill]] }
  0x70   : > { %s11602_s19 = sld [smem:[#allocation15_spill]]  ;;  %s11603_s25 = sld [smem:[#allocation10_spill]] }
  0x71   : > { %s11604_s14 = sld [smem:[#allocation14_spill]]  ;;  %11605 = sst [smem:[#allocation48_spill]] %s9778_s11 }
  0x72   : > { %s10100_s0 = sadd.s32 4294967295, %s9782_s15   ;;  %s7810_s16 = sadd.s32 4294967294, %s9782_s15  }
  0x73   : > { %s10104_s18 = sadd.s32 1, %s9782_s15   ;;  %s1061_s22 = sadd.s32 1, %s9778_s11 }
  0x74   : > { %11606 = sst [smem:[#allocation49_spill]] %s10104_s18  ;;  %s1058_s23 = ssub.s32 %s9782_s15, %s10104_s18 }
  0x75   : > { %p1071_p0 = scmp.ne.s32.totalorder %s9778_s11, %s9774_s10  ;;  %p1059_p1 = scmp.eq.s32.totalorder %s1058_s23, 0 }
  0x76   : > { %p1072_p2 = scmp.eq.s32.totalorder %s10100_s0, 1  ;;  %p1077_p3 = scmp.ne.s32.totalorder %s9774_s10, %s9770_s7 }
  0x77   : > { %p1078_p4 = scmp.eq.s32.totalorder %s7810_s16, 1  ;;  %p7813_p7 = scmp.ge.s32.totalorder %s9782_s15, 1 }
  0x78   : > { %s10115_s26 = scalar_select %p1059_p1, %s9778_s11, %s1061_s22  }
  0x79   : > { %p10117_p5 = por %p1072_p2, %p1071_p0  ;;  %p10121_p6 = por %p1078_p4, %p1077_p3 }
  0x7a   : > { %11607 = sst [smem:[#allocation50_spill]] %s10115_s26  ;;  %p1278_p8 = scmp.lt.s32.totalorder %s9782_s15, 3 }
  0x7b   : > { %s11609_s1 = scalar_select %p10121_p6, 1, 0 }
  0x7c   : > { %p1279_p9 = pnand %p7813_p7, %p1278_p8 }
  0x7d   : > { %11610 = sst [smem:[#allocation51_spill]] %s11609_s1  ;;  %v1437_v0 = vld [vmem:[%s11603_s25] sm:$0xff] (!%p1279_p9)  ;;  %s11611_s5 = sld [smem:[#allocation5_spill]] (!%p1279_p9)  ;;  %v1438_v1 = vld [vmem:[%s11603_s25 + $0x8] sm:$0xff] (!%p1279_p9)  ;;  %v1439_v2 = vld [vmem:[%s11603_s25 + $0x10] sm:$0xff] (!%p1279_p9)  ;;  %vm1450_vm0 = vcmask (!%p1279_p9), 392192  }
  0x7e   : > { %1282 = sbr.rel (%p1279_p9) target bundleno = 12611 (0x3143), region = 196  ;;  %p1408_p10 = scmp.lt.s32.totalorder (!%p1279_p9), %s10100_s0, 1  ;;  %v9087_v3 = vpack.c.bf16 (!%p1279_p9), %v1438_v1, %v1437_v0  ;;  %v1440_v4 = vld [vmem:[%s11603_s25 + $0x18] sm:$0xff] (!%p1279_p9)  ;;  %v1441_v6 = vld [vmem:[%s11603_s25 + $0x20] sm:$0xff] (!%p1279_p9)  ;;  %v1442_v7 = vld [vmem:[%s11603_s25 + $0x28] sm:$0xff] (!%p1279_p9)  ;;  %v9829_v11 = vmov (!%p1279_p9), 0.0|0.0  }
  0x7f   : > { %v9091_v5 = vpack.c.bf16 (!%p1279_p9), %v1440_v4, %v1439_v2  ;;  %v9095_v8 = vpack.c.bf16 (!%p1279_p9), %v1442_v7, %v1441_v6  ;;  %s11612_s29 = sld [smem:[#allocation11_spill]] (!%p1279_p9)  ;;  %9099 = vmatprep.subr.bf16.mxu1 (!%p1279_p9), %v9829_v11  ;;  %s11613_s17 = sld [smem:[#allocation8_spill]] (!%p1279_p9)  ;;  %vm9830_vm1 = vmmov (!%p1279_p9), 0   ;;  %v9831_v12 = vmov (!%p1279_p9), 0.0   ;;  %v1533_v15 = vld [vmem:[%s11604_s14 + $0x8] sm:$0xff] (!%p1279_p9)  ;;  %v1532_v18 = vld [vmem:[%s11604_s14] sm:$0xff] (!%p1279_p9) }
  0x80   : > { %9088 = vmatprep.subr.bf16.mxu0 (!%p1279_p9), %v9087_v3  ;;  %8409 = vmatprep.mubr.msk.f32.mxu1 (!%p1279_p9), %vm9830_vm1, %v9831_v12  ;;  %s11614_s3 = sld [smem:[#allocation12_spill]] (!%p1279_p9)  ;;  %s11615_s8 = sld [smem:[#allocation13_spill]] (!%p1279_p9)  ;;  %vm1537_vm2 = vcmask (!%p1279_p9), 130048   ;;  %vm1617_vm3 = vcmask (!%p1279_p9), 1040384   ;;  %vm1621_vm4 = vcmask (!%p1279_p9), 258048   ;;  %v1650_v37 = vld [vmem:[%s11599_s30] sm:$0xff] (!%p1279_p9) }
  0x81   : > { %9090 = vmatpush3.bf16.msra.mxu0 (!%p1279_p9), %v9087_v3  ;;  %v1651_v38 = vld [vmem:[%s11599_s30 + $0x8] sm:$0xff] (!%p1279_p9)  ;;  %v1652_v40 = vld [vmem:[%s11599_s30 + $0x10] sm:$0xff] (!%p1279_p9)  ;;  %v1653_v41 = vld [vmem:[%s11599_s30 + $0x18] sm:$0xff] (!%p1279_p9)  ;;  %vm1666_vm5 = vcmask (!%p1279_p9), 261120   ;;  %vm1756_vm6 = vcmask (!%p1279_p9), 64512   ;;  %vm2063_vm7 = vcmask (!%p1279_p9), 36864  }
  0x82   : > { %9092 = vmatprep.subr.bf16.mxu0 (!%p1279_p9), %v9091_v5  ;;  %v9103_v39 = vpack.c.bf16 (!%p1279_p9), %v1651_v38, %v1650_v37  ;;  %v9106_v42 = vpack.c.bf16 (!%p1279_p9), %v1653_v41, %v1652_v40  ;;  %v7828_v47 = vld [vmem:[%s11602_s19] ss:$0 sm:$0xff] (!%p1279_p9)  ;;  %vm2114_vm8 = vcmask (!%p1279_p9), 1044480   ;;  %vm2110_vm9 = vcmask (!%p1279_p9), 39936   ;;  %s11621_s14 = smov (!%p1279_p9), 112   ;;  %s11623_s25 = smov (!%p1279_p9), 104   ;;  %vm10580_vm15 = vmpackc.low (!%p1279_p9), %vm1756_vm6, %vm1756_vm6 }
  0x83   : > { %v7829_v49 = vld [vmem:[%s11600_s24] ss:$0 sm:$0xff] (!%p1279_p9)  ;;  %vm2432_vm10 = vcmask (!%p1279_p9), 195584   ;;  %vm4004_vm13 = vcmask (!%p1279_p9), 1043456   ;;  %vm4112_vm14 = vcmask (!%p1279_p9), 253952   ;;  %s11646_s26 = sld [smem:[#allocation40_spill]] (!%p1279_p9) }
  0x84   : > { %v7830_v52 = vld [vmem:[%s11601_s6] ss:$0 sm:$0xff] (!%p1279_p9)  ;;  %s11647_s11 = sld [smem:[#allocation43_spill]] (!%p1279_p9) }
  0x85   : > { %s10135_s2 = scalar_select %p1408_p10, %s10100_s0, 1  ;;  %9094 = vmatpush3.bf16.msra.mxu0 %v9091_v5  ;;  %v7824_v13 = vld [vmem:[%s11612_s29] ss:$0 sm:$0xff] }
  0x86   : > { %9096 = vmatprep.subr.bf16.mxu0 %v9095_v8  ;;  %v1611_v24 = vld [vmem:[%s11614_s3] sm:$0x1]  ;;  %s11530_s3 = smov 112   ;;  %s11627_s29 = smov 16  }
  0x87   : > { %s10138_s16 = sshll.u32 %s10135_s2, 4  ;;  %s7821_s23 = sshll.u32 %s10135_s2, 2  ;;  %v1612_v25 = vld [vmem:[%s11615_s8] sm:$0x1] }
  0x88   : > { %s1412_s22 = scalar_lea.vmem %s11611_s5, %s10138_s16  ;;  %v1613_v26 = vadd.f32 %v1612_v25, %v1611_v24  ;;  %s11516_s5 = smov 96  }
  0x89   : > { %v1435_v9 = vld [vmem:[%s1412_s22] sm:$0xff]  ;;  %9098 = vmatpush3.bf16.msra.mxu0 %v9095_v8  ;;  %v1436_v10 = vld [vmem:[%s1412_s22 + $0x8] sm:$0xff]  ;;  %s1426_s22 = scalar_lea.vmem %s11613_s17, %s7821_s23  ;;  %s11520_s23 = smov 104  }
  0x8a   : > { %8402 = vmatprep.mubr.msk.f32.mxu0 %vm1450_vm0, %v1435_v9  ;;  %8433 = vmatprep.subr.mxu0 %v9831_v12  ;;  %v1536_v23 = vld [vmem:[%s1426_s22] sm:$0xf]  ;;  %s11522_s22 = smov 120   ;;  %s11620_s8 = sld [smem:[#allocation26_spill]] }
  0x8b   : > { %s11622_s17 = smov 120   ;;  %s11648_s18 = smov %s11647_s11 }
  0x8c   : > { %8403 = vmatmul.mubr.msk.f32.vlgmr.msra.gmra.mrb[0].mxu0 %vm1450_vm0, %v1436_v10 }
  0x8d   : > { %8435 = vmatprep.mubr.msk.f32.mxu0 %vm9830_vm1, %v9831_v12 }
 0x15f   : > { %v8404_v14 = vpop.f32.mrb[0].mxu0 }
 0x160   : > { %v1529_v16 = vadd.f32 %v8404_v14, %v7824_v13  ;;  %v1523_v17 = vpop.f32.mrb[1].mxu0 }
 0x161   : > { %v1524_v19 = vadd.f32 %v7824_v13, %v1523_v17 }
 0x162   : > { %v1535_v20 = vadd.f32 %v1533_v15, %v1529_v16 }
 0x163   : > { %v1534_v21 = vadd.f32 %v1532_v18, %v1524_v19 }
 0x165   : > { %v9100_v22 = vpack.c.bf16 %v1535_v20, %v1534_v21 }
 0x167   : > { %9101 = vmatpush3.bf16.msra.mxu1 %v9100_v22 }
 0x168   : > { %9102 = vmatprep.subr.bf16.mxu1 %v9829_v11 }
 0x16a   : > { %8410 = vmatmul.mubr.msk.f32.vlgmr.msra.gmra.mrb[0].mxu1 %vm1537_vm2, %v1536_v23 }
 0x16b   : > { %8420 = vmatprep.mubr.msk.f32.mxu1 %vm9830_vm1, %v9831_v12  ;;  %9104 = vmatpush3.bf16.msra.mxu1 %v9103_v39 }
 0x16c   : > { %9105 = vmatprep.subr.bf16.mxu1 %v9829_v11 }
 0x16f   : > { %9107 = vmatpush3.bf16.msra.mxu1 %v9106_v42 }
 0x170   : > { %8423 = vmatprep.subr.mxu1 %v9831_v12 }
 0x23d   : > { %v1607_v27 = vpop.f32.mrb[0].mxu1 }
 0x23e   : > { %v1615_v28 = vrot.slane %v1607_v27, 7  ;;  %v8411_v29 = vpop.f32.mrb[1].mxu1 }
 0x240   : > { %v10162_v30 = vsel %vm1617_vm3, %v1613_v26, %v1615_v28 }
 0x241   : > { %v1622_v31 = vsel %vm1621_vm4, %v10162_v30, 0.0 }
 0x242   : > { %1623 = vadd.xlane.f32.xlu0 %v1622_v31 }
 0x2cf   : > { %v1624_v32 = vpop.xlane.xlu0 %1623 }
 0x2d0   : > { %v1626_v33 = vmul.f32 0.03125, %v1624_v32 }
 0x2d2   : > { %v1627_v34 = vsub.f32 %v10162_v30, %v1626_v33 }
 0x2d4   : > { %v1628_v35 = vmul.f32 %v1627_v34, %v1627_v34 }
 0x2d6   : > { %v1629_v36 = vsel %vm1621_vm4, %v1628_v35, 0.0 }
 0x2d7   : > { %1630 = vadd.xlane.f32.xlu0 %v1629_v36 }
 0x364   : > { %v1631_v43 = vpop.xlane.xlu0 %1630 }
 0x365   : > { %v1632_v44 = vmul.f32 0.03125, %v1631_v43 }
 0x367   : > { %v1633_v45 = vadd.f32 1e-05, %v1632_v44 }
 0x369   : > { %9520 = vrsqrt.f32 %v1633_v45 }
 0x373   : > { %v9521_v46 = vpop.eup %9520 }
 0x374   : > { %v1635_v48 = vmul.f32 %v9521_v46, %v1627_v34 }
 0x376   : > { %v1642_v50 = vmul.f32 %v7828_v47, %v1635_v48 }
 0x378   : > { %v1649_v51 = vadd.f32 %v7829_v49, %v1642_v50 }
 0x37a   : > { %8421 = vmatmul.mubr.msk.f32.vlgmr.msra.gmra.mrb[2].mxu1 %vm1666_vm5, %v1649_v51 }
 0x37b   : > { %8425 = vmatprep.mubr.msk.f32.mxu1 %vm9830_vm1, %v9831_v12 }
 0x44d   : > { %v1736_v53 = vpop.f32.mrb[2].mxu1 }
 0x44e   : > { %v1737_v54 = vadd.f32 %v7830_v52, %v1736_v53  ;;  %v8422_v55 = vpop.f32.mrb[3].mxu1 }
 0x450   : > { %1747 = vrot.lane.b32.xlu0 %v1737_v54, %s11520_s23  ;;  %1741 = vrot.lane.b32.xlu1 %v1737_v54, %s11522_s22  ;;  %v1750_v60 = vmul.f32 0.35355338, %v1737_v54  ;;  %s11526_s23 = smov 16   ;;  %s11524_s22 = smov 24  }
 0x454   : > { %1744 = vrot.lane.b32.xlu1 %v1737_v54, %s11530_s3  ;;  %s11619_s3 = sld [smem:[#allocation24_spill]] }
 0x458   : > { %1754 = vrot.lane.b32.xlu1 %v1737_v54, %s11516_s5 }
 0x4c2   : > { %v10184_v56 = vpop.permute.xlu1 %1741  ;;  %v10192_v58 = vpop.permute.xlu0 %1747 }
 0x4c3   : > { %1832 = vrot.lane.b32.xlu1 %v10184_v56, %s11516_s5  ;;  %v1751_v62 = vmul.f32 0.35355338, %v10184_v56  ;;  %v1753_v2 = vmul.f32 0.35355338, %v10192_v58 }
 0x4c6   : > { %v10188_v57 = vpop.permute.xlu1 %1744 }
 0x4c7   : > { %1909 = vrot.lane.b32.xlu1 %v10188_v57, %s11516_s5  ;;  %v1752_v0 = vmul.f32 0.35355338, %v10188_v57 }
 0x4ca   : > { %v1755_v59 = vpop.permute.xlu1 %1754 }
 0x4cb   : > { %1986 = vrot.lane.b32.xlu1 %v10192_v58, %s11516_s5  ;;  %8424 = vmatpush3.xpose.msk.msra.mxu1 %vm1756_vm6, %v1755_v59  ;;  %s11518_s5 = smov 64   ;;  %v1657_v59 = vld [vmem:[%s11597_s12 + $0x10] sm:$0xff] }
 0x4cc   : > { %8428 = vmatprep.subr.mxu1 %v9831_v12 }
 0x4ce   : > { %8426 = vmatmul.mubr.msk.f32.vlgmr.msra.gmra.mrb[4].mxu1 %vm1756_vm6, %v1750_v60  ;;  %v1658_v60 = vld [vmem:[%s11597_s12 + $0x18] sm:$0xff] }
 0x4cf   : > { %8430 = vmatprep.mubr.msk.f32.mxu1 %vm9830_vm1, %v9831_v12 }
 0x535   : > { %v1833_v61 = vpop.permute.xlu1 %1832 }
 0x536   : > { %8429 = vmatpush3.xpose.msk.msra.mxu1 %vm1756_vm6, %v1833_v61  ;;  %v9112_v61 = vpack.c.bf16 %v1658_v60, %v1657_v59 }
 0x537   : > { %8438 = vmatprep.subr.mxu1 %v9831_v12 }
 0x539   : > { %v1910_v63 = vpop.permute.xlu1 %1909  ;;  %8431 = vmatmul.mubr.msk.f32.vlgmr.msra.gmra.mrb[6].mxu1 %vm1756_vm6, %v1751_v62 }
 0x53a   : > { %8434 = vmatpush3.xpose.msk.msra.mxu0 %vm1756_vm6, %v1910_v63  ;;  %8440 = vmatprep.mubr.msk.f32.mxu1 %vm9830_vm1, %v9831_v12 }
 0x53b   : > { %8443 = vmatprep.subr.mxu0 %v9831_v12 }
 0x53d   : > { %8436 = vmatmul.mubr.msk.f32.vlgmr.msra.gmra.mrb[2].mxu0 %vm1756_vm6, %v1752_v0  ;;  %v1987_v1 = vpop.permute.xlu1 %1986 }
 0x53e   : > { %8439 = vmatpush3.xpose.msk.msra.mxu1 %vm1756_vm6, %v1987_v1  ;;  %8445 = vmatprep.mubr.msk.f32.mxu0 %vm9830_vm1, %v9831_v12 }
 0x53f   : > { %8448 = vmatprep.subr.mxu1 %v9831_v12 }
 0x541   : > { %8441 = vmatmul.mubr.msk.f32.vlgmr.msra.gmra.mrb[8].mxu1 %vm1756_vm6, %v1753_v2 }
 0x542   : > { %8450 = vmatprep.mubr.msk.f32.mxu1 %vm9830_vm1, %v9831_v12 }
 0x5a1   : > { %v1828_v3 = vpop.f32.mrb[4].mxu1 }
 0x5a2   : > { %v8427_v4 = vpop.f32.mrb[5].mxu1  ;;  %v2064_v5 = vsel %vm2063_vm7, %v1828_v3, -inf }
 0x5a3   : > { %2065 = vmax.xlane.f32.xlu1 %v2064_v5 }
 0x60c   : > { %v1905_v6 = vpop.f32.mrb[6].mxu1 }
 0x60d   : > { %v8432_v7 = vpop.f32.mrb[7].mxu1  ;;  %v2067_v8 = vsel %vm2063_vm7, %v1905_v6, -inf }
 0x60e   : > { %2068 = vmax.xlane.f32.xlu0 %v2067_v8 }
 0x610   : > { %v1982_v9 = vpop.f32.mrb[2].mxu0 }
 0x611   : > { %v8437_v10 = vpop.f32.mrb[3].mxu0  ;;  %v2070_v13 = vsel %vm2063_vm7, %v1982_v9, -inf }
 0x612   : > { %2071 = vmax.xlane.f32.xlu1 %v2070_v13  ;;  %v7848_v10 = vld [vmem:[%s11596_s20] ss:$0 sm:$0xff] }
 0x614   : > { %v2059_v14 = vpop.f32.mrb[8].mxu1 }
 0x615   : > { %v8442_v15 = vpop.f32.mrb[9].mxu1  ;;  %v2073_v16 = vsel %vm2063_vm7, %v2059_v14, -inf }
 0x616   : > { %2074 = vmax.xlane.f32.xlu0 %v2073_v16 }
 0x623   : > { %2108 = vrot.lane.b32.xlu1 %v1737_v54, %s11518_s5 }
 0x630   : > { %v2066_v17 = vpop.xlane.xlu1 %2065 }
 0x631   : > { %v2076_v18 = vsub.f32 %v1828_v3, %v2066_v17 }
 0x633   : > { %v2080_v19 = vmul.f32 1.442695, %v2076_v18 }
 0x635   : > { %9522 = vpow2.f32 %v2080_v19 }
 0x63f   : > { %v9523_v20 = vpop.eup %9522 }
 0x640   : > { %v2088_v21 = vsel %vm2063_vm7, %v9523_v20, 0.0 }
 0x647   : > { %2089 = vadd.xlane.f32.xlu1 %v2088_v21 }
 0x69b   : > { %v2069_v22 = vpop.xlane.xlu0 %2068 }
 0x69c   : > { %v2077_v23 = vsub.f32 %v1905_v6, %v2069_v22 }
 0x69e   : > { %v2082_v24 = vmul.f32 1.442695, %v2077_v23  ;;  %v2543_v23 = vld [vmem:[%s11598_s9] sm:$0xff] }
 0x69f   : > { %v2072_v25 = vpop.xlane.xlu1 %2071 }
 0x6a0   : > { %9524 = vpow2.f32 %v2082_v24  ;;  %v2078_v26 = vsub.f32 %v1982_v9, %v2072_v25  ;;  %v2544_v24 = vld [vmem:[%s11598_s9 + $0x8] sm:$0xff] }
 0x6a1   : > { %v9115_v25 = vpack.c.bf16 %v2544_v24, %v2543_v23 }
 0x6a2   : > { %v2084_v27 = vmul.f32 1.442695, %v2078_v26  ;;  %v2546_v26 = vld [vmem:[%s11598_s9 + $0x18] sm:$0xff] }
 0x6a3   : > { %v2109_v28 = vpop.permute.xlu1 %2108  ;;  %v2075_v29 = vpop.xlane.xlu0 %2074 }
 0x6a4   : > { %9526 = vpow2.f32 %v2084_v27  ;;  %v2079_v31 = vsub.f32 %v2059_v14, %v2075_v29  ;;  %8444 = vmatpush3.msk.msra.mxu0 %vm2114_vm8, %v2109_v28 }
 0x6a5   : > { %8453 = vmatprep.subr.mxu0 %v9831_v12 }
 0x6a6   : > { %v2086_v32 = vmul.f32 1.442695, %v2079_v31 }
 0x6a8   : > { %9528 = vpow2.f32 %v2086_v32 }
 0x6aa   : > { %v9525_v33 = vpop.eup %9524 }
 0x6ab   : > { %v2091_v34 = vsel %vm2063_vm7, %v9525_v33, 0.0 }
 0x6ac   : > { %2092 = vadd.xlane.f32.xlu0 %v2091_v34 }
 0x6ae   : > { %v9527_v35 = vpop.eup %9526 }
 0x6af   : > { %v2094_v36 = vsel %vm2063_vm7, %v9527_v35, 0.0 }
 0x6b0   : > { %2095 = vadd.xlane.f32.xlu1 %v2094_v36 }
 0x6b2   : > { %v9529_v37 = vpop.eup %9528 }
 0x6b3   : > { %v2097_v38 = vsel %vm2063_vm7, %v9529_v37, 0.0 }
 0x6b4   : > { %2098 = vadd.xlane.f32.xlu0 %v2097_v38 }
 0x6c1   : > { %2264 = vrot.lane.b32.xlu1 %v10188_v57, %s11518_s5  ;;  %v1656_v57 = vld [vmem:[%s11597_s12 + $0x8] sm:$0xff] }
 0x6c5   : > { %2341 = vrot.lane.b32.xlu1 %v10192_v58, %s11518_s5 }
 0x6ca   : > { %2187 = vrot.lane.b32.xlu0 %v10184_v56, %s11518_s5  ;;  %v1655_v56 = vld [vmem:[%s11597_s12] sm:$0xff]  ;;  %s11528_s5 = smov 8  }
 0x6cb   : > { %v9109_v58 = vpack.c.bf16 %v1656_v57, %v1655_v56 }
 0x6d4   : > { %v2090_v39 = vpop.xlane.xlu1 %2089 }
 0x6d5   : > { %9530 = vrcp.f32 %v2090_v39 }
 0x6df   : > { %v9531_v40 = vpop.eup %9530 }
 0x6e0   : > { %v2104_v41 = vmul.f32 %v9531_v40, %v9523_v20 }
 0x6e2   : > { %8446 = vmatmul.mubr.msk.f32.vlgmr.msra.gmra.mrb[4].mxu0 %vm2110_vm9, %v2104_v41 }
 0x6e3   : > { %8455 = vmatprep.mubr.msk.f32.mxu0 %vm9830_vm1, %v9831_v12 }
 0x739   : > { %v2093_v42 = vpop.xlane.xlu0 %2092 }
 0x73a   : > { %9532 = vrcp.f32 %v2093_v42 }
 0x73d   : > { %v2096_v43 = vpop.xlane.xlu1 %2095 }
 0x73e   : > { %9534 = vrcp.f32 %v2096_v43 }
 0x741   : > { %v2265_v44 = vpop.permute.xlu1 %2264  ;;  %v2099_v45 = vpop.xlane.xlu0 %2098 }
 0x742   : > { %9536 = vrcp.f32 %v2099_v45  ;;  %8454 = vmatpush3.msk.msra.mxu0 %vm2114_vm8, %v2265_v44 }
 0x743   : > { %9108 = vmatprep.subr.bf16.mxu0 %v9829_v11 }
 0x744   : > { %v9533_v46 = vpop.eup %9532 }
 0x745   : > { %v2188_v47 = vpop.permute.xlu0 %2187  ;;  %v2105_v48 = vmul.f32 %v9533_v46, %v9525_v33  ;;  %v2342_v49 = vpop.permute.xlu1 %2341 }
 0x746   : > { %8449 = vmatpush3.msk.msra.mxu1 %vm2114_vm8, %v2188_v47 }
 0x747   : > { %8451 = vmatmul.mubr.msk.f32.vlgmr.msra.gmra.mrb[10].mxu1 %vm2110_vm9, %v2105_v48  ;;  %8458 = vmatprep.subr.mxu1 %v9831_v12 }
 0x748   : > { %v9535_v50 = vpop.eup %9534  ;;  %8459 = vmatpush3.msk.msra.mxu1 %vm2114_vm8, %v2342_v49  ;;  %8460 = vmatprep.mubr.msk.f32.mxu1 %vm9830_vm1, %v9831_v12 }
 0x749   : > { %v2106_v51 = vmul.f32 %v9535_v50, %v9527_v35  ;;  %9114 = vmatprep.subr.bf16.mxu1 %v9829_v11 }
 0x74b   : > { %8456 = vmatmul.mubr.msk.f32.vlgmr.msra.gmra.mrb[6].mxu0 %vm2110_vm9, %v2106_v51 }
 0x74c   : > { %v9537_v52 = vpop.eup %9536  ;;  %8471 = vmatprep.mubr.msk.f32.mxu0 %vm9830_vm1, %v9831_v12  ;;  %9110 = vmatpush3.bf16.msra.mxu0 %v9109_v58 }
 0x74d   : > { %v2107_v53 = vmul.f32 %v9537_v52, %v9529_v37  ;;  %9111 = vmatprep.subr.bf16.mxu0 %v9829_v11 }
 0x74f   : > { %8461 = vmatmul.mubr.msk.f32.vlgmr.msra.gmra.mrb[12].mxu1 %vm2110_vm9, %v2107_v53 }
 0x750   : > { %8482 = vmatprep.mubr.msk.f32.mxu1 %vm9830_vm1, %v9831_v12  ;;  %9113 = vmatpush3.bf16.msra.mxu0 %v9112_v61 }
 0x751   : > { %9120 = vmatprep.subr.bf16.mxu0 %v9829_v11  ;;  %9116 = vmatpush3.bf16.msra.mxu1 %v9115_v25  ;;  %v9840_v25 = vmov 1.0  }
 0x752   : > { %9117 = vmatprep.subr.bf16.mxu1 %v9829_v11 }
 0x7b5   : > { %v2183_v54 = vpop.f32.mrb[4].mxu0 }
 0x7b6   : > { %v8447_v55 = vpop.f32.mrb[5].mxu0 }
 0x81a   : > { %v2260_v62 = vpop.f32.mrb[10].mxu1 }
 0x81b   : > { %2419 = vrot.lane.b32.xlu0 %v2260_v62, %s11528_s5  ;;  %v8452_v63 = vpop.f32.mrb[11].mxu1  ;;  %s11618_s5 = sld [smem:[#allocation25_spill]]  ;;  %v7852_v62 = vld [vmem:[%s11619_s3] ss:$0 sm:$0xff] }
 0x81e   : > { %v2337_v0 = vpop.f32.mrb[6].mxu0 }
 0x81f   : > { %2423 = vrot.lane.b32.xlu1 %v2337_v0, %s11526_s23  ;;  %v8457_v1 = vpop.f32.mrb[7].mxu0  ;;  %s11617_s23 = sld [smem:[#allocation22_spill]] }
 0x821   : > { %v2654_v38 = vld [vmem:[%s11618_s5] sm:$0xff]  ;;  %v2655_v39 = vld [vmem:[%s11618_s5 + $0x8] sm:$0xff]  ;;  %v2656_v41 = vld [vmem:[%s11618_s5 + $0x10] sm:$0xff] }
 0x822   : > { %v2414_v2 = vpop.f32.mrb[12].mxu1  ;;  %v9121_v40 = vpack.c.bf16 %v2655_v39, %v2654_v38  ;;  %v2657_v42 = vld [vmem:[%s11618_s5 + $0x18] sm:$0xff]  ;;  %v2658_v44 = vld [vmem:[%s11618_s5 + $0x20] sm:$0xff]  ;;  %v2659_v45 = vld [vmem:[%s11618_s5 + $0x28] sm:$0xff] }
 0x823   : > { %2427 = vrot.lane.b32.xlu0 %v2414_v2, %s11524_s22  ;;  %v8462_v3 = vpop.f32.mrb[13].mxu1  ;;  %s11616_s22 = sld [smem:[#allocation21_spill]]  ;;  %v9124_v43 = vpack.c.bf16 %v2657_v42, %v2656_v41  ;;  %v9127_v46 = vpack.c.bf16 %v2659_v45, %v2658_v44  ;;  %v2660_v47 = vld [vmem:[%s11618_s5 + $0x30] sm:$0xff]  ;;  %v2661_v48 = vld [vmem:[%s11618_s5 + $0x38] sm:$0xff]  ;;  %v2662_v50 = vld [vmem:[%s11618_s5 + $0x40] sm:$0xff] }
 0x824   : > { %v9130_v49 = vpack.c.bf16 %v2661_v48, %v2660_v47  ;;  %v2663_v51 = vld [vmem:[%s11618_s5 + $0x48] sm:$0xff]  ;;  %v2664_v53 = vld [vmem:[%s11618_s5 + $0x50] sm:$0xff]  ;;  %v2666_v56 = vld [vmem:[%s11618_s5 + $0x60] sm:$0xff] }
 0x825   : > { %v7851_v35 = vld [vmem:[%s11617_s23] ss:$0 sm:$0xff]  ;;  %v9133_v52 = vpack.c.bf16 %v2663_v51, %v2662_v50  ;;  %v2667_v57 = vld [vmem:[%s11618_s5 + $0x68] sm:$0xff]  ;;  %v2668_v59 = vld [vmem:[%s11618_s5 + $0x70] sm:$0xff] }
 0x826   : > { %v9139_v58 = vpack.c.bf16 %v2667_v57, %v2666_v56  ;;  %v2669_v60 = vld [vmem:[%s11618_s5 + $0x78] sm:$0xff]  ;;  %v7859_v42 = vld [vmem:[%s11599_s30 + $0x20] sm:$0xff] }
 0x827   : > { %v9142_v61 = vpack.c.bf16 %v2669_v60, %v2668_v59  ;;  %v7862_v45 = vld [vmem:[%s11599_s30 + $0x38] sm:$0xff]  ;;  %v7857_v51 = vld [vmem:[%s11602_s19 + $0x1] ss:$0 sm:$0xff]  ;;  %s11624_s19 = smov 96  }
 0x828   : > { %v7869_v56 = vld [vmem:[%s11601_s6 + $0x1] ss:$0 sm:$0xff]  ;;  %s11625_s6 = smov 64  }
 0x829   : > { %v7850_v33 = vld [vmem:[%s11616_s22] ss:$0 sm:$0xff] }
 0x88d   : > { %v2420_v4 = vpop.permute.xlu0 %2419 }
 0x88e   : > { %v2430_v6 = vsel %vm1756_vm6, %v2183_v54, %v2420_v4  ;;  %v2665_v54 = vld [vmem:[%s11618_s5 + $0x58] sm:$0xff] }
 0x88f   : > { %v9136_v55 = vpack.c.bf16 %v2665_v54, %v2664_v53  ;;  %v7858_v53 = vld [vmem:[%s11600_s24 + $0x1] ss:$0 sm:$0xff]  ;;  %s11626_s24 = smov 8  }
 0x891   : > { %v2424_v5 = vpop.permute.xlu1 %2423 }
 0x892   : > { %v2431_v7 = vsel %vm1537_vm2, %v2430_v6, %v2424_v5 }
 0x895   : > { %v2428_v8 = vpop.permute.xlu0 %2427 }
 0x896   : > { %v2433_v9 = vsel %vm2432_vm10, %v2431_v7, %v2428_v8 }
 0x897   : > { %8472 = vmatmul.mubr.msk.f32.vlgmr.msra.gmra.mrb[8].mxu0 %vm1666_vm5, %v2433_v9 }
 0x898   : > { %8517 = vmatprep.mubr.msk.f32.mxu0 %vm9830_vm1, %v9831_v12  ;;  %9122 = vmatpush3.bf16.msra.mxu0 %v9121_v40 }
 0x899   : > { %9123 = vmatprep.subr.bf16.mxu0 %v9829_v11 }
 0x89c   : > { %9125 = vmatpush3.bf16.msra.mxu0 %v9124_v43  ;;  %v7860_v43 = vld [vmem:[%s11599_s30 + $0x28] sm:$0xff] }
 0x89d   : > { %9126 = vmatprep.subr.bf16.mxu0 %v9829_v11  ;;  %v9145_v44 = vpack.c.bf16 %v7860_v43, %v7859_v42 }
 0x8a0   : > { %9128 = vmatpush3.bf16.msra.mxu0 %v9127_v46 }
 0x8a1   : > { %9129 = vmatprep.subr.bf16.mxu0 %v9829_v11 }
 0x8a4   : > { %9131 = vmatpush3.bf16.msra.mxu0 %v9130_v49 }
 0x8a5   : > { %9132 = vmatprep.subr.bf16.mxu0 %v9829_v11 }
 0x8a8   : > { %9134 = vmatpush3.bf16.msra.mxu0 %v9133_v52 }
 0x8a9   : > { %9135 = vmatprep.subr.bf16.mxu0 %v9829_v11 }
 0x8ac   : > { %9137 = vmatpush3.bf16.msra.mxu0 %v9136_v55 }
 0x8ad   : > { %9138 = vmatprep.subr.bf16.mxu0 %v9829_v11 }
 0x8b0   : > { %9140 = vmatpush3.bf16.msra.mxu0 %v9139_v58 }
 0x8b1   : > { %9141 = vmatprep.subr.bf16.mxu0 %v9829_v11 }
 0x8b4   : > { %9143 = vmatpush3.bf16.msra.mxu0 %v9142_v61 }
 0x8b5   : > { %8561 = vmatprep.subr.mxu0 %v9831_v12 }
 0x96a   : > { %v2509_v13 = vpop.f32.mrb[8].mxu0 }
 0x96b   : > { %v2510_v14 = vadd.f32 %v7848_v10, %v2509_v13  ;;  %v8473_v15 = vpop.f32.mrb[9].mxu0 }
 0x96d   : > { %v10271_v16 = vadd.f32 %v2510_v14, %v10162_v30  ;;  %v2545_v30 = vld [vmem:[%s11598_s9 + $0x10] sm:$0xff] }
 0x96e   : > { %v9118_v27 = vpack.c.bf16 %v2546_v26, %v2545_v30 }
 0x96f   : > { %v2516_v17 = vsel %vm1621_vm4, %v10271_v16, 0.0 }
 0x970   : > { %2517 = vadd.xlane.f32.xlu1 %v2516_v17  ;;  %9119 = vmatpush3.bf16.msra.mxu1 %v9118_v27 }
 0x971   : > { %9144 = vmatprep.subr.bf16.mxu1 %v9829_v11 }
 0x9fd   : > { %v2518_v18 = vpop.xlane.xlu1 %2517 }
 0x9fe   : > { %v2519_v19 = vmul.f32 0.03125, %v2518_v18 }
 0xa00   : > { %v2520_v20 = vsub.f32 %v10271_v16, %v2519_v19 }
 0xa02   : > { %v2521_v21 = vmul.f32 %v2520_v20, %v2520_v20 }
 0xa04   : > { %v2522_v22 = vsel %vm1621_vm4, %v2521_v21, 0.0 }
 0xa05   : > { %2523 = vadd.xlane.f32.xlu0 %v2522_v22 }
 0xa92   : > { %v2524_v28 = vpop.xlane.xlu0 %2523 }
 0xa93   : > { %v2525_v29 = vmul.f32 0.03125, %v2524_v28 }
 0xa95   : > { %v2526_v31 = vadd.f32 1e-05, %v2525_v29 }
 0xa97   : > { %9538 = vrsqrt.f32 %v2526_v31  ;;  %v7854_v31 = vld [vmem:[%s11620_s8] ss:$0 sm:$0xff] }
 0xaa1   : > { %v9539_v32 = vpop.eup %9538 }
 0xaa2   : > { %v2528_v34 = vmul.f32 %v9539_v32, %v2520_v20 }
 0xaa4   : > { %v2535_v36 = vmul.f32 %v7850_v33, %v2528_v34 }
 0xaa6   : > { %v2542_v37 = vadd.f32 %v7851_v35, %v2535_v36 }
 0xaa8   : > { %8483 = vmatmul.mubr.msk.f32.vlgmr.msra.gmra.mrb[14].mxu1 %vm1666_vm5, %v2542_v37 }
 0xaa9   : > { %8528 = vmatprep.mubr.msk.f32.mxu1 %vm9830_vm1, %v9831_v12  ;;  %9146 = vmatpush3.bf16.msra.mxu1 %v9145_v44 }
 0xaaa   : > { %9147 = vmatprep.subr.bf16.mxu1 %v9829_v11 }
 0xb7b   : > { %v2623_v63 = vpop.f32.mrb[14].mxu1 }
 0xb7c   : > { %v2624_v0 = vadd.f32 %v7852_v62, %v2623_v63  ;;  %v8484_v1 = vpop.f32.mrb[15].mxu1 }
 0xb7e   : > { %v2628_v2 = vmul.f32 0.70710677, %v2624_v0  ;;  %v2627_v27 = vmul.f32 0.5, %v2624_v0 }
 0xb80   : > { %v2631_v3 = vand.u32 2147483647, %v2628_v2  ;;  %vm2629_vm11 = vcmp.lt.f32.partialorder %v2628_v2, 0.0 }
 0xb81   : > { %v2630_v30 = vsel %vm2629_vm11, -1.0, %v9840_v25 }
 0xb82   : > { %v2632_v4 = vmul.f32 0.3275911, %v2631_v3  ;;  %v2645_v6 = vsub.f32 0.0, %v2631_v3 }
 0xb84   : > { %v2633_v5 = vadd.f32 1.0, %v2632_v4  ;;  %v2646_v8 = vmul.f32 %v2645_v6, %v2631_v3 }
 0xb86   : > { %9540 = vrcp.f32 %v2633_v5  ;;  %v2647_v13 = vmul.f32 1.442695, %v2646_v8 }
 0xb88   : > { %9542 = vpow2.f32 %v2647_v13 }
 0xb90   : > { %v9541_v7 = vpop.eup %9540 }
 0xb91   : > { %v2636_v9 = vmul.f32 1.0614054, %v9541_v7 }
 0xb92   : > { %v9543_v22 = vpop.eup %9542 }
 0xb93   : > { %v2637_v10 = vadd.f32 -1.4531521, %v2636_v9 }
 0xb95   : > { %v2638_v14 = vmul.f32 %v9541_v7, %v2637_v10 }
 0xb97   : > { %v2639_v15 = vadd.f32 1.4214138, %v2638_v14 }
 0xb99   : > { %v2640_v17 = vmul.f32 %v9541_v7, %v2639_v15 }
 0xb9b   : > { %v2641_v18 = vadd.f32 -0.28449672, %v2640_v17 }
 0xb9d   : > { %v2642_v19 = vmul.f32 %v9541_v7, %v2641_v18 }
 0xb9f   : > { %v2643_v20 = vadd.f32 0.2548296, %v2642_v19 }
 0xba1   : > { %v2644_v21 = vmul.f32 %v9541_v7, %v2643_v20 }
 0xba3   : > { %v2649_v23 = vmul.f32 %v9543_v22, %v2644_v21 }
 0xba5   : > { %v2650_v24 = vsub.f32 1.0, %v2649_v23 }
 0xba7   : > { %v2651_v26 = vmul.f32 %v2650_v24, %v2630_v30 }
 0xba9   : > { %v2652_v28 = vadd.f32 1.0, %v2651_v26 }
 0xbab   : > { %v2653_v29 = vmul.f32 %v2652_v28, %v2627_v27 }
 0xbad   : > { %8518 = vmatmul.mubr.f32.vlgmr.msra.gmra.mrb[10].mxu0 %v2653_v29 }
 0xbae   : > { %8563 = vmatprep.mubr.msk.f32.mxu0 %vm9830_vm1, %v9831_v12 }
 0xc80   : > { %v2743_v32 = vpop.f32.mrb[10].mxu0 }
 0xc81   : > { %v2744_v33 = vadd.f32 %v7854_v31, %v2743_v32  ;;  %v8519_v34 = vpop.f32.mrb[11].mxu0 }
 0xc83   : > { %v10318_v35 = vadd.f32 %v2744_v33, %v10271_v16  ;;  %v7861_v16 = vld [vmem:[%s11599_s30 + $0x30] sm:$0xff]  ;;  %s11628_s30 = smov 24  }
 0xc84   : > { %v9148_v46 = vpack.c.bf16 %v7862_v45, %v7861_v16 }
 0xc85   : > { %v2752_v36 = vsel %vm1621_vm4, %v10318_v35, 0.0 }
 0xc86   : > { %2753 = vadd.xlane.f32.xlu0 %v2752_v36  ;;  %9149 = vmatpush3.bf16.msra.mxu1 %v9148_v46 }
 0xc87   : > { %8531 = vmatprep.subr.mxu1 %v9831_v12 }
 0xd13   : > { %v2754_v37 = vpop.xlane.xlu0 %2753 }
 0xd14   : > { %v2755_v38 = vmul.f32 0.03125, %v2754_v37 }
 0xd16   : > { %v2756_v39 = vsub.f32 %v10318_v35, %v2755_v38 }
 0xd18   : > { %v2757_v40 = vmul.f32 %v2756_v39, %v2756_v39 }
 0xd1a   : > { %v2758_v41 = vsel %vm1621_vm4, %v2757_v40, 0.0 }
 0xd1b   : > { %2759 = vadd.xlane.f32.xlu1 %v2758_v41 }
 0xda8   : > { %v2760_v47 = vpop.xlane.xlu1 %2759 }
 0xda9   : > { %v2761_v48 = vmul.f32 0.03125, %v2760_v47 }
 0xdab   : > { %v2762_v49 = vadd.f32 1e-05, %v2761_v48 }
 0xdad   : > { %9544 = vrsqrt.f32 %v2762_v49 }
 0xdb7   : > { %v9545_v50 = vpop.eup %9544 }
 0xdb8   : > { %v2764_v52 = vmul.f32 %v9545_v50, %v2756_v39 }
 0xdba   : > { %v2771_v54 = vmul.f32 %v7857_v51, %v2764_v52 }
 0xdbc   : > { %v2778_v55 = vadd.f32 %v7858_v53, %v2771_v54 }
 0xdbe   : > { %8529 = vmatmul.mubr.msk.f32.vlgmr.msra.gmra.mrb[16].mxu1 %vm1666_vm5, %v2778_v55 }
 0xdbf   : > { %8533 = vmatprep.mubr.msk.f32.mxu1 %vm9830_vm1, %v9831_v12 }
 0xe91   : > { %v2868_v57 = vpop.f32.mrb[16].mxu1 }
 0xe92   : > { %v2869_v58 = vadd.f32 %v7869_v56, %v2868_v57  ;;  %v8530_v59 = vpop.f32.mrb[17].mxu1 }
 0xe94   : > { %2876 = vrot.lane.b32.xlu1 %v2869_v58, %s11621_s14  ;;  %2873 = vrot.lane.b32.xlu0 %v2869_v58, %s11622_s17  ;;  %v2882_v0 = vmul.f32 0.35355338, %v2869_v58 }
 0xe98   : > { %2879 = vrot.lane.b32.xlu1 %v2869_v58, %s11623_s25  ;;  %2886 = vrot.lane.b32.xlu0 %v2869_v58, %s11624_s19 }
 0xf06   : > { %v10340_v60 = vpop.permute.xlu1 %2876  ;;  %v10342_v61 = vpop.permute.xlu0 %2873 }
 0xf07   : > { %3040 = vrot.lane.b32.xlu0 %v10340_v60, %s11624_s19  ;;  %2963 = vrot.lane.b32.xlu1 %v10342_v61, %s11624_s19  ;;  %v2883_v2 = vmul.f32 0.35355338, %v10342_v61  ;;  %v2884_v4 = vmul.f32 0.35355338, %v10340_v60 }
 0xf0a   : > { %v10348_v62 = vpop.permute.xlu1 %2879  ;;  %v2887_v63 = vpop.permute.xlu0 %2886 }
 0xf0b   : > { %3117 = vrot.lane.b32.xlu1 %v10348_v62, %s11624_s19  ;;  %8532 = vmatpush3.xpose.msk.msra.mxu1 %vm1756_vm6, %v2887_v63  ;;  %v2885_v6 = vmul.f32 0.35355338, %v10348_v62 }
 0xf0c   : > { %8536 = vmatprep.subr.mxu1 %v9831_v12 }
 0xf0e   : > { %8534 = vmatmul.mubr.msk.f32.vlgmr.msra.gmra.mrb[18].mxu1 %vm1756_vm6, %v2882_v0  ;;  %v7866_v0 = vld [vmem:[%s11597_s12 + $0x30] sm:$0xff] }
 0xf0f   : > { %8538 = vmatprep.mubr.msk.f32.mxu1 %vm9830_vm1, %v9831_v12 }
 0xf79   : > { %v2964_v1 = vpop.permute.xlu1 %2963  ;;  %v3041_v3 = vpop.permute.xlu0 %3040 }
 0xf7a   : > { %8537 = vmatpush3.xpose.msk.msra.mxu1 %vm1756_vm6, %v2964_v1  ;;  %v7867_v1 = vld [vmem:[%s11597_s12 + $0x38] sm:$0xff] }
 0xf7b   : > { %8541 = vmatprep.subr.mxu1 %v9831_v12 }
 0xf7d   : > { %8539 = vmatmul.mubr.msk.f32.vlgmr.msra.gmra.mrb[20].mxu1 %vm1756_vm6, %v2883_v2  ;;  %v3118_v5 = vpop.permute.xlu1 %3117  ;;  %v9154_v2 = vpack.c.bf16 %v7867_v1, %v7866_v0  ;;  %v7914_v1 = vld [vmem:[%s11618_s5 + $0xf0] sm:$0xff] }
 0xf7e   : > { %8542 = vmatpush3.xpose.msk.msra.mxu1 %vm1756_vm6, %v3041_v3  ;;  %8543 = vmatprep.mubr.msk.f32.mxu1 %vm9830_vm1, %v9831_v12 }
 0xf7f   : > { %8546 = vmatprep.subr.mxu1 %v9831_v12 }
 0xf81   : > { %8544 = vmatmul.mubr.msk.f32.vlgmr.msra.gmra.mrb[22].mxu1 %vm1756_vm6, %v2884_v4 }
 0xf82   : > { %8547 = vmatpush3.xpose.msk.msra.mxu1 %vm1756_vm6, %v3118_v5  ;;  %8548 = vmatprep.mubr.msk.f32.mxu1 %vm9830_vm1, %v9831_v12 }
 0xf83   : > { %8551 = vmatprep.subr.mxu1 %v9831_v12 }
 0xf85   : > { %8549 = vmatmul.mubr.msk.f32.vlgmr.msra.gmra.mrb[24].mxu1 %vm1756_vm6, %v2885_v6 }
 0xf86   : > { %8553 = vmatprep.mubr.msk.f32.mxu1 %vm9830_vm1, %v9831_v12 }
 0xfe1   : > { %v2959_v7 = vpop.f32.mrb[18].mxu1 }
 0xfe2   : > { %v8535_v8 = vpop.f32.mrb[19].mxu1  ;;  %v3194_v9 = vsel %vm2063_vm7, %v2959_v7, -inf }
 0xfe3   : > { %3195 = vmax.xlane.f32.xlu0 %v3194_v9 }
0x1050   : > { %v3036_v10 = vpop.f32.mrb[20].mxu1 }
0x1051   : > { %v8540_v13 = vpop.f32.mrb[21].mxu1  ;;  %v3197_v14 = vsel %vm2063_vm7, %v3036_v10, -inf }
0x1052   : > { %3198 = vmax.xlane.f32.xlu1 %v3197_v14 }
0x1054   : > { %v3113_v15 = vpop.f32.mrb[22].mxu1 }
0x1055   : > { %v8545_v17 = vpop.f32.mrb[23].mxu1  ;;  %v3200_v18 = vsel %vm2063_vm7, %v3113_v15, -inf }
0x1056   : > { %3201 = vmax.xlane.f32.xlu0 %v3200_v18  ;;  %v7887_v18 = vld [vmem:[%s11596_s20 + $0x1] ss:$0 sm:$0xff]  ;;  %s11634_s20 = sld [smem:[#allocation31_spill]] }
0x1058   : > { %v3190_v19 = vpop.f32.mrb[24].mxu1 }
0x1059   : > { %v8550_v20 = vpop.f32.mrb[25].mxu1  ;;  %v3203_v21 = vsel %vm2063_vm7, %v3190_v19, -inf }
0x105a   : > { %3204 = vmax.xlane.f32.xlu0 %v3203_v21 }
0x1063   : > { %3238 = vrot.lane.b32.xlu1 %v2869_v58, %s11625_s6 }
0x1070   : > { %v3196_v22 = vpop.xlane.xlu0 %3195 }
0x1071   : > { %v3206_v23 = vsub.f32 %v2959_v7, %v3196_v22 }
0x1073   : > { %v3210_v24 = vmul.f32 1.442695, %v3206_v23 }
0x1075   : > { %9546 = vpow2.f32 %v3210_v24 }
0x107f   : > { %v9547_v30 = vpop.eup %9546 }
0x1080   : > { %v3218_v26 = vsel %vm2063_vm7, %v9547_v30, 0.0 }
0x1087   : > { %3219 = vadd.xlane.f32.xlu1 %v3218_v26 }
0x10df   : > { %v3199_v27 = vpop.xlane.xlu1 %3198 }
0x10e0   : > { %v3207_v28 = vsub.f32 %v3036_v10, %v3199_v27 }
0x10e2   : > { %v3212_v29 = vmul.f32 1.442695, %v3207_v28 }
0x10e3   : > { %v3239_v31 = vpop.permute.xlu1 %3238  ;;  %v3202_v32 = vpop.xlane.xlu0 %3201 }
0x10e4   : > { %9548 = vpow2.f32 %v3212_v29  ;;  %v3208_v33 = vsub.f32 %v3113_v15, %v3202_v32  ;;  %8552 = vmatpush3.msk.msra.mxu1 %vm2114_vm8, %v3239_v31  ;;  %v7893_v29 = vld [vmem:[%s11598_s9 + $0x20] sm:$0xff]  ;;  %v7894_v31 = vld [vmem:[%s11598_s9 + $0x28] sm:$0xff] }
0x10e5   : > { %8556 = vmatprep.subr.mxu1 %v9831_v12  ;;  %v9157_v32 = vpack.c.bf16 %v7894_v31, %v7893_v29 }
0x10e6   : > { %v3214_v34 = vmul.f32 1.442695, %v3208_v33  ;;  %v7896_v33 = vld [vmem:[%s11598_s9 + $0x38] sm:$0xff] }
0x10e7   : > { %v3205_v36 = vpop.xlane.xlu0 %3204 }
0x10e8   : > { %9550 = vpow2.f32 %v3214_v34  ;;  %v3209_v37 = vsub.f32 %v3190_v19, %v3205_v36 }
0x10ea   : > { %v3216_v38 = vmul.f32 1.442695, %v3209_v37 }
0x10ec   : > { %9552 = vpow2.f32 %v3216_v38 }
0x10ee   : > { %v9549_v39 = vpop.eup %9548 }
0x10ef   : > { %v3221_v40 = vsel %vm2063_vm7, %v9549_v39, 0.0 }
0x10f0   : > { %3222 = vadd.xlane.f32.xlu0 %v3221_v40  ;;  %v7891_v40 = vld [vmem:[%s11616_s22 + $0x1] ss:$0 sm:$0xff] }
0x10f2   : > { %v9551_v41 = vpop.eup %9550 }
0x10f3   : > { %v3224_v42 = vsel %vm2063_vm7, %v9551_v41, 0.0 }
0x10f4   : > { %3225 = vadd.xlane.f32.xlu1 %v3224_v42  ;;  %v7892_v42 = vld [vmem:[%s11617_s23 + $0x1] ss:$0 sm:$0xff]  ;;  %s11645_s23 = sld [smem:[#allocation39_spill]] }
0x10f6   : > { %v9553_v43 = vpop.eup %9552 }
0x10f7   : > { %v3227_v44 = vsel %vm2063_vm7, %v9553_v43, 0.0  ;;  %vm4722_vm7 = vcmask 131072  }
0x10f8   : > { %3228 = vadd.xlane.f32.xlu0 %v3227_v44 }
0x1105   : > { %3392 = vrot.lane.b32.xlu1 %v10340_v60, %s11625_s6 }
0x1109   : > { %3469 = vrot.lane.b32.xlu1 %v10348_v62, %s11625_s6  ;;  %v7865_v62 = vld [vmem:[%s11597_s12 + $0x28] sm:$0xff] }
0x110e   : > { %3315 = vrot.lane.b32.xlu0 %v10342_v61, %s11625_s6  ;;  %v7864_v61 = vld [vmem:[%s11597_s12 + $0x20] sm:$0xff]  ;;  %s11633_s12 = sld [smem:[#allocation30_spill]] }
0x110f   : > { %v9151_v63 = vpack.c.bf16 %v7865_v62, %v7864_v61  ;;  %v7912_v62 = vld [vmem:[%s11618_s5 + $0xe0] sm:$0xff] }
0x1114   : > { %v3220_v16 = vpop.xlane.xlu1 %3219 }
0x1115   : > { %9554 = vrcp.f32 %v3220_v16  ;;  %v7900_v16 = vld [vmem:[%s11618_s5 + $0x80] sm:$0xff] }
0x111f   : > { %v9555_v45 = vpop.eup %9554 }
0x1120   : > { %v3234_v46 = vmul.f32 %v9555_v45, %v9547_v30  ;;  %v7901_v45 = vld [vmem:[%s11618_s5 + $0x88] sm:$0xff] }
0x1122   : > { %8554 = vmatmul.mubr.msk.f32.vlgmr.msra.gmra.mrb[26].mxu1 %vm2110_vm9, %v3234_v46  ;;  %v9163_v46 = vpack.c.bf16 %v7901_v45, %v7900_v16 }
0x1123   : > { %8558 = vmatprep.mubr.msk.f32.mxu1 %vm9830_vm1, %v9831_v12 }
0x117d   : > { %v3223_v47 = vpop.xlane.xlu0 %3222 }
0x117e   : > { %9556 = vrcp.f32 %v3223_v47  ;;  %v7902_v47 = vld [vmem:[%s11618_s5 + $0x90] sm:$0xff] }
0x1181   : > { %v3226_v48 = vpop.xlane.xlu1 %3225 }
0x1182   : > { %9558 = vrcp.f32 %v3226_v48  ;;  %v7903_v48 = vld [vmem:[%s11618_s5 + $0x98] sm:$0xff] }
0x1185   : > { %v3393_v49 = vpop.permute.xlu1 %3392  ;;  %v3229_v50 = vpop.xlane.xlu0 %3228 }
0x1186   : > { %9560 = vrcp.f32 %v3229_v50  ;;  %8562 = vmatpush3.msk.msra.mxu0 %vm2114_vm8, %v3393_v49  ;;  %v9166_v49 = vpack.c.bf16 %v7903_v48, %v7902_v47  ;;  %v7904_v50 = vld [vmem:[%s11618_s5 + $0xa0] sm:$0xff] }
0x1187   : > { %9150 = vmatprep.subr.bf16.mxu0 %v9829_v11 }
0x1188   : > { %v9557_v51 = vpop.eup %9556 }
0x1189   : > { %v3316_v52 = vpop.permute.xlu0 %3315  ;;  %v3235_v53 = vmul.f32 %v9557_v51, %v9549_v39  ;;  %v3470_v54 = vpop.permute.xlu1 %3469  ;;  %v7905_v51 = vld [vmem:[%s11618_s5 + $0xa8] sm:$0xff] }
0x118a   : > { %8557 = vmatpush3.msk.msra.mxu1 %vm2114_vm8, %v3316_v52  ;;  %v9169_v52 = vpack.c.bf16 %v7905_v51, %v7904_v50 }
0x118b   : > { %8559 = vmatmul.mubr.msk.f32.vlgmr.msra.gmra.mrb[28].mxu1 %vm2110_vm9, %v3235_v53  ;;  %8566 = vmatprep.subr.mxu1 %v9831_v12  ;;  %v7906_v53 = vld [vmem:[%s11618_s5 + $0xb0] sm:$0xff] }
0x118c   : > { %v9559_v55 = vpop.eup %9558  ;;  %8567 = vmatpush3.msk.msra.mxu1 %vm2114_vm8, %v3470_v54  ;;  %8568 = vmatprep.mubr.msk.f32.mxu1 %vm9830_vm1, %v9831_v12  ;;  %v7907_v54 = vld [vmem:[%s11618_s5 + $0xb8] sm:$0xff] }
0x118d   : > { %v3236_v56 = vmul.f32 %v9559_v55, %v9551_v41  ;;  %9156 = vmatprep.subr.bf16.mxu1 %v9829_v11  ;;  %v9172_v55 = vpack.c.bf16 %v7907_v54, %v7906_v53 }
0x118f   : > { %8564 = vmatmul.mubr.msk.f32.vlgmr.msra.gmra.mrb[12].mxu0 %vm2110_vm9, %v3236_v56  ;;  %v7908_v56 = vld [vmem:[%s11618_s5 + $0xc0] sm:$0xff] }
0x1190   : > { %v9561_v57 = vpop.eup %9560  ;;  %8579 = vmatprep.mubr.msk.f32.mxu0 %vm9830_vm1, %v9831_v12  ;;  %9152 = vmatpush3.bf16.msra.mxu0 %v9151_v63  ;;  %v7913_v63 = vld [vmem:[%s11618_s5 + $0xe8] sm:$0xff] }
0x1191   : > { %v3237_v58 = vmul.f32 %v9561_v57, %v9553_v43  ;;  %9153 = vmatprep.subr.bf16.mxu0 %v9829_v11  ;;  %v7909_v57 = vld [vmem:[%s11618_s5 + $0xc8] sm:$0xff]  ;;  %v9181_v0 = vpack.c.bf16 %v7913_v63, %v7912_v62  ;;  %v7920_v63 = vld [vmem:[%s11633_s12] ss:$0 sm:$0xff]  ;;  %s11639_s12 = sld [smem:[#allocation36_spill]] }
0x1193   : > { %8569 = vmatmul.mubr.msk.f32.vlgmr.msra.gmra.mrb[30].mxu1 %vm2110_vm9, %v3237_v58  ;;  %v9175_v58 = vpack.c.bf16 %v7909_v57, %v7908_v56 }
0x1194   : > { %8590 = vmatprep.mubr.msk.f32.mxu1 %vm9830_vm1, %v9831_v12  ;;  %9155 = vmatpush3.bf16.msra.mxu0 %v9154_v2  ;;  %v7915_v2 = vld [vmem:[%s11618_s5 + $0xf8] sm:$0xff] }
0x1195   : > { %9162 = vmatprep.subr.bf16.mxu0 %v9829_v11  ;;  %9158 = vmatpush3.bf16.msra.mxu1 %v9157_v32 }
0x1196   : > { %9159 = vmatprep.subr.bf16.mxu1 %v9829_v11 }
0x11f5   : > { %v3311_v59 = vpop.f32.mrb[26].mxu1 }
0x11f6   : > { %v8555_v60 = vpop.f32.mrb[27].mxu1 }
0x11f7   : > { %v7911_v60 = vld [vmem:[%s11618_s5 + $0xd8] sm:$0xff] }
0x125e   : > { %v3388_v3 = vpop.f32.mrb[28].mxu1 }
0x125f   : > { %3547 = vrot.lane.b32.xlu0 %v3388_v3, %s11626_s24  ;;  %v8560_v4 = vpop.f32.mrb[29].mxu1  ;;  %v9184_v3 = vpack.c.bf16 %v7915_v2, %v7914_v1 }
0x1260   : > { %v7898_v4 = vld [vmem:[%s11619_s3 + $0x1] ss:$0 sm:$0xff]  ;;  %s11629_s3 = sld [smem:[#allocation29_spill]] }
0x1262   : > { %v3465_v5 = vpop.f32.mrb[12].mxu0 }
0x1263   : > { %3551 = vrot.lane.b32.xlu1 %v3465_v5, %s11627_s29  ;;  %v8565_v6 = vpop.f32.mrb[13].mxu0 }
0x1266   : > { %v3542_v7 = vpop.f32.mrb[30].mxu1  ;;  %v3910_v48 = vld [vmem:[%s11629_s3] sm:$0xff]  ;;  %v3913_v51 = vld [vmem:[%s11629_s3 + $0x18] sm:$0xff] }
0x1267   : > { %3555 = vrot.lane.b32.xlu0 %v3542_v7, %s11628_s30  ;;  %v8570_v8 = vpop.f32.mrb[31].mxu1 }
0x12d1   : > { %v3548_v9 = vpop.permute.xlu0 %3547 }
0x12d2   : > { %v3558_v13 = vsel %vm1756_vm6, %v3311_v59, %v3548_v9  ;;  %v7910_v59 = vld [vmem:[%s11618_s5 + $0xd0] sm:$0xff]  ;;  %s11630_s5 = sld [smem:[#allocation27_spill]] }
0x12d3   : > { %v9178_v61 = vpack.c.bf16 %v7911_v60, %v7910_v59 }
0x12d5   : > { %v3552_v10 = vpop.permute.xlu1 %3551 }
0x12d6   : > { %v3559_v14 = vsel %vm1537_vm2, %v3558_v13, %v3552_v10 }
0x12d8   : > { %v7918_v57 = vld [vmem:[%s11630_s5] ss:$0 sm:$0xff]  ;;  %s11636_s5 = sld [smem:[#allocation35_spill]] }
0x12d9   : > { %v3556_v15 = vpop.permute.xlu0 %3555 }
0x12da   : > { %v3560_v17 = vsel %vm2432_vm10, %v3559_v14, %v3556_v15 }
0x12db   : > { %8580 = vmatmul.mubr.msk.f32.vlgmr.msra.gmra.mrb[14].mxu0 %vm1666_vm5, %v3560_v17 }
0x12dc   : > { %8625 = vmatprep.mubr.msk.f32.mxu0 %vm9830_vm1, %v9831_v12  ;;  %9164 = vmatpush3.bf16.msra.mxu0 %v9163_v46 }
0x12dd   : > { %9165 = vmatprep.subr.bf16.mxu0 %v9829_v11 }
0x12e0   : > { %9167 = vmatpush3.bf16.msra.mxu0 %v9166_v49  ;;  %v3911_v49 = vld [vmem:[%s11629_s3 + $0x8] sm:$0xff] }
0x12e1   : > { %9168 = vmatprep.subr.bf16.mxu0 %v9829_v11  ;;  %v9187_v50 = vpack.c.bf16 %v3911_v49, %v3910_v48 }
0x12e4   : > { %9170 = vmatpush3.bf16.msra.mxu0 %v9169_v52 }
0x12e5   : > { %9171 = vmatprep.subr.bf16.mxu0 %v9829_v11 }
0x12e8   : > { %9173 = vmatpush3.bf16.msra.mxu0 %v9172_v55 }
0x12e9   : > { %9174 = vmatprep.subr.bf16.mxu0 %v9829_v11 }
0x12ec   : > { %9176 = vmatpush3.bf16.msra.mxu0 %v9175_v58 }
0x12ed   : > { %9177 = vmatprep.subr.bf16.mxu0 %v9829_v11 }
0x12f0   : > { %9179 = vmatpush3.bf16.msra.mxu0 %v9178_v61 }
0x12f1   : > { %9180 = vmatprep.subr.bf16.mxu0 %v9829_v11 }
0x12f4   : > { %9182 = vmatpush3.bf16.msra.mxu0 %v9181_v0 }
0x12f5   : > { %9183 = vmatprep.subr.bf16.mxu0 %v9829_v11 }
0x12f8   : > { %9185 = vmatpush3.bf16.msra.mxu0 %v9184_v3  ;;  %v7922_v3 = vld [vmem:[%s11634_s20] ss:$0 sm:$0xff]  ;;  %s11642_s20 = sld [smem:[#allocation37_spill]] }
0x12f9   : > { %9206 = vmatprep.subr.bf16.mxu0 %v9829_v11 }
0x13ae   : > { %v3636_v19 = vpop.f32.mrb[14].mxu0 }
0x13af   : > { %v3637_v20 = vadd.f32 %v7887_v18, %v3636_v19  ;;  %v8581_v21 = vpop.f32.mrb[15].mxu0 }
0x13b1   : > { %v10427_v22 = vadd.f32 %v3637_v20, %v10318_v35  ;;  %v7895_v35 = vld [vmem:[%s11598_s9 + $0x30] sm:$0xff]  ;;  %s11632_s9 = sld [smem:[#allocation9_spill]] }
0x13b2   : > { %v9160_v34 = vpack.c.bf16 %v7896_v33, %v7895_v35 }
0x13b3   : > { %v3645_v23 = vsel %vm1621_vm4, %v10427_v22, 0.0 }
0x13b4   : > { %3646 = vadd.xlane.f32.xlu1 %v3645_v23  ;;  %9161 = vmatpush3.bf16.msra.mxu1 %v9160_v34 }
0x13b5   : > { %9186 = vmatprep.subr.bf16.mxu1 %v9829_v11 }
0x13b7   : > { %s1431_s22 = scalar_lea.vmem %s11632_s9, %s10138_s16  ;;  %s11637_s9 = sld [smem:[#allocation33_spill]] }
0x13b8   : > { %v4006_v62 = vld [vmem:[%s1431_s22] sm:$0xff] }
0x1441   : > { %v3647_v24 = vpop.xlane.xlu1 %3646 }
0x1442   : > { %v3648_v30 = vmul.f32 0.03125, %v3647_v24 }
0x1444   : > { %v3649_v26 = vsub.f32 %v10427_v22, %v3648_v30 }
0x1446   : > { %v3650_v27 = vmul.f32 %v3649_v26, %v3649_v26 }
0x1448   : > { %v3651_v28 = vsel %vm1621_vm4, %v3650_v27, 0.0 }
0x1449   : > { %3652 = vadd.xlane.f32.xlu0 %v3651_v28 }
0x14d6   : > { %v3653_v36 = vpop.xlane.xlu0 %3652 }
0x14d7   : > { %v3654_v37 = vmul.f32 0.03125, %v3653_v36 }
0x14d9   : > { %v3655_v38 = vadd.f32 1e-05, %v3654_v37 }
0x14db   : > { %9562 = vrsqrt.f32 %v3655_v38  ;;  %v7917_v38 = vld [vmem:[%s11620_s8 + $0x1] ss:$0 sm:$0xff]  ;;  %s11631_s8 = sld [smem:[#allocation28_spill]] }
0x14e1   : > { %v7919_v59 = vld [vmem:[%s11631_s8] ss:$0 sm:$0xff]  ;;  %s11638_s8 = sld [smem:[#allocation34_spill]] }
0x14e5   : > { %v9563_v39 = vpop.eup %9562 }
0x14e6   : > { %v3657_v41 = vmul.f32 %v9563_v39, %v3649_v26 }
0x14e8   : > { %v3664_v43 = vmul.f32 %v7891_v40, %v3657_v41 }
0x14ea   : > { %v3671_v44 = vadd.f32 %v7892_v42, %v3664_v43 }
0x14ec   : > { %8591 = vmatmul.mubr.msk.f32.vlgmr.msra.gmra.mrb[32].mxu1 %vm1666_vm5, %v3671_v44 }
0x14ed   : > { %8636 = vmatprep.mubr.msk.f32.mxu1 %vm9830_vm1, %v9831_v12  ;;  %9188 = vmatpush3.bf16.msra.mxu1 %v9187_v50 }
0x14ee   : > { %9189 = vmatprep.subr.bf16.mxu1 %v9829_v11 }
0x15bf   : > { %v3754_v5 = vpop.f32.mrb[32].mxu1 }
0x15c0   : > { %v3755_v6 = vadd.f32 %v7898_v4, %v3754_v5  ;;  %v8592_v7 = vpop.f32.mrb[33].mxu1 }
0x15c1   : > { %v4007_v7 = vld [vmem:[%s1431_s22 + $0x8] sm:$0xff]  ;;  %s11643_s22 = sld [smem:[#allocation38_spill]] }
0x15c2   : > { %v3759_v8 = vmul.f32 0.70710677, %v3755_v6  ;;  %v3758_v34 = vmul.f32 0.5, %v3755_v6 }
0x15c4   : > { %v3762_v9 = vand.u32 2147483647, %v3759_v8  ;;  %vm3760_vm12 = vcmp.lt.f32.partialorder %v3759_v8, 0.0 }
0x15c5   : > { %v3761_v35 = vsel %vm3760_vm12, -1.0, %v9840_v25  ;;  %vm7590_vm12 = vcmask 7168  }
0x15c6   : > { %v3763_v10 = vmul.f32 0.3275911, %v3762_v9  ;;  %v3776_v14 = vsub.f32 0.0, %v3762_v9 }
0x15c8   : > { %v3764_v13 = vadd.f32 1.0, %v3763_v10  ;;  %v3777_v17 = vmul.f32 %v3776_v14, %v3762_v9 }
0x15ca   : > { %9564 = vrcp.f32 %v3764_v13  ;;  %v3778_v20 = vmul.f32 1.442695, %v3777_v17 }
0x15cc   : > { %9566 = vpow2.f32 %v3778_v20 }
0x15d4   : > { %v9565_v15 = vpop.eup %9564 }
0x15d5   : > { %v3767_v18 = vmul.f32 1.0614054, %v9565_v15 }
0x15d6   : > { %v9567_v29 = vpop.eup %9566 }
0x15d7   : > { %v3768_v19 = vadd.f32 -1.4531521, %v3767_v18 }
0x15d9   : > { %v3769_v21 = vmul.f32 %v9565_v15, %v3768_v19 }
0x15db   : > { %v3770_v23 = vadd.f32 1.4214138, %v3769_v21 }
0x15dd   : > { %v3771_v24 = vmul.f32 %v9565_v15, %v3770_v23 }
0x15df   : > { %v3772_v30 = vadd.f32 -0.28449672, %v3771_v24 }
0x15e1   : > { %v3773_v26 = vmul.f32 %v9565_v15, %v3772_v30 }
0x15e3   : > { %v3774_v27 = vadd.f32 0.2548296, %v3773_v26 }
0x15e5   : > { %v3775_v28 = vmul.f32 %v9565_v15, %v3774_v27 }
0x15e7   : > { %v3780_v31 = vmul.f32 %v9567_v29, %v3775_v28 }
0x15e9   : > { %v3781_v32 = vsub.f32 1.0, %v3780_v31 }
0x15eb   : > { %v3782_v33 = vmul.f32 %v3781_v32, %v3761_v35 }
0x15ed   : > { %v3783_v36 = vadd.f32 1.0, %v3782_v33 }
0x15ef   : > { %v3784_v37 = vmul.f32 %v3783_v36, %v3758_v34 }
0x15f1   : > { %8626 = vmatmul.mubr.f32.vlgmr.msra.gmra.mrb[16].mxu0 %v3784_v37 }
0x15f2   : > { %8684 = vmatprep.mubr.msk.f32.mxu0 %vm9830_vm1, %v9831_v12 }
0x16c4   : > { %v3876_v39 = vpop.f32.mrb[16].mxu0 }
0x16c5   : > { %v3877_v40 = vadd.f32 %v7917_v38, %v3876_v39  ;;  %v8627_v41 = vpop.f32.mrb[17].mxu0 }
0x16c7   : > { %v3880_v42 = vadd.f32 %v3877_v40, %v10427_v22  ;;  %v3912_v22 = vld [vmem:[%s11629_s3 + $0x10] sm:$0xff]  ;;  %s11635_s3 = sld [smem:[#allocation32_spill]] }
0x16c8   : > { %v9190_v52 = vpack.c.bf16 %v3913_v51, %v3912_v22 }
0x16c9   : > { %v3883_v43 = vsel %vm1621_vm4, %v3880_v42, 0.0 }
0x16ca   : > { %3884 = vadd.xlane.f32.xlu0 %v3883_v43  ;;  %9191 = vmatpush3.bf16.msra.mxu1 %v9190_v52  ;;  %v4164_v43 = vld [vmem:[%s11636_s5] sm:$0xff] }
0x16cd   : > { %v4098_v14 = vld [vmem:[%s11635_s3] sm:$0xff]  ;;  %v4099_v15 = vld [vmem:[%s11635_s3 + $0x8] sm:$0xff]  ;;  %v4100_v17 = vld [vmem:[%s11635_s3 + $0x10] sm:$0x1]  ;;  %s11644_s3 = sld [smem:[#allocation41_spill]] }
0x1757   : > { %v3885_v44 = vpop.xlane.xlu0 %3884 }
0x1758   : > { %v3886_v16 = vmul.f32 0.03125, %v3885_v44  ;;  %v4165_v44 = vld [vmem:[%s11636_s5 + $0x8] sm:$0xff] }
0x175a   : > { %v3887_v45 = vsub.f32 %v3880_v42, %v3886_v16  ;;  %v9197_v16 = vpack.c.bf16 %v4165_v44, %v4164_v43 }
0x175c   : > { %v3888_v46 = vmul.f32 %v3887_v45, %v3887_v45 }
0x175e   : > { %v3889_v47 = vsel %vm1621_vm4, %v3888_v46, 0.0  ;;  %v4167_v46 = vld [vmem:[%s11636_s5 + $0x18] sm:$0xff]  ;;  %vm4715_vm4 = vcmask 138240  }
0x175f   : > { %3890 = vadd.xlane.f32.xlu1 %v3889_v47 }
0x17ec   : > { %v3891_v53 = vpop.xlane.xlu1 %3890 }
0x17ed   : > { %v3892_v54 = vmul.f32 0.03125, %v3891_v53 }
0x17ef   : > { %v3893_v55 = vadd.f32 1e-05, %v3892_v54 }
0x17f1   : > { %9568 = vrsqrt.f32 %v3893_v55 }
0x17fb   : > { %v9569_v56 = vpop.eup %9568 }
0x17fc   : > { %v3895_v58 = vmul.f32 %v9569_v56, %v3887_v45  ;;  %v4166_v45 = vld [vmem:[%s11636_s5 + $0x10] sm:$0xff] }
0x17fd   : > { %v9200_v47 = vpack.c.bf16 %v4167_v46, %v4166_v45 }
0x17fe   : > { %v3902_v60 = vmul.f32 %v7918_v57, %v3895_v58  ;;  %v7925_v58 = vld [vmem:[%s11637_s9] ss:$0 sm:$0xff] }
0x1800   : > { %v3909_v61 = vadd.f32 %v7919_v59, %v3902_v60 }
0x1802   : > { %8637 = vmatmul.mubr.msk.f32.vlgmr.msra.gmra.mrb[34].mxu1 %vm1666_vm5, %v3909_v61  ;;  %v7926_v61 = vld [vmem:[%s11638_s8] ss:$0 sm:$0xff] }
0x1803   : > { %8643 = vmatprep.mubr.msk.f32.mxu1 %vm1537_vm2, %v4006_v62 }
0x18d5   : > { %v3990_v0 = vpop.f32.mrb[34].mxu1 }
0x18d6   : > { %v3991_v1 = vadd.f32 %v7920_v63, %v3990_v0  ;;  %v8638_v2 = vpop.f32.mrb[35].mxu1 }
0x18d8   : > { %v4002_v4 = vrot.slane %v3991_v1, 1 }
0x18da   : > { %v4005_v5 = vsel %vm4004_vm13, %v4002_v4, %v7922_v3 }
0x18db   : > { %v9192_v6 = vpack.c.bf16 %v7922_v3, %v4005_v5 }
0x18dd   : > { %9193 = vmatprep.subr.bf16.mxu1 %v9192_v6 }
0x18de   : > { %9195 = vmatpush3.bf16.msra.mxu1 %v9192_v6  ;;  %v7927_v6 = vld [vmem:[%s11639_s12] ss:$0 sm:$0xff] }
0x18df   : > { %9196 = vmatprep.subr.bf16.mxu1 %v9829_v11 }
0x18e1   : > { %8644 = vmatmul.mubr.msk.f32.vlgmr.msra.gmra.mrb[36].mxu1 %vm1537_vm2, %v4007_v7 }
0x18e2   : > { %8654 = vmatprep.mubr.msk.f32.mxu1 %vm9830_vm1, %v9831_v12  ;;  %9198 = vmatpush3.bf16.msra.mxu1 %v9197_v16 }
0x18e3   : > { %9199 = vmatprep.subr.bf16.mxu1 %v9829_v11 }
0x18e6   : > { %9201 = vmatpush3.bf16.msra.mxu1 %v9200_v47 }
0x18e7   : > { %9202 = vmatprep.subr.bf16.mxu1 %v9829_v11 }
0x19b4   : > { %v8645_v8 = vpop.f32.mrb[36].mxu1 }
0x19b5   : > { %v4092_v9 = vrot.slane %v8645_v8, 7  ;;  %v4080_v10 = vpop.f32.mrb[37].mxu1 }
0x19b6   : > { %v4091_v13 = vrot.slane %v4080_v10, 7 }
0x19b7   : > { %v10502_v23 = vadd.f32 %v4100_v17, %v4092_v9 }
0x19b8   : > { %v4093_v18 = vsel %vm1617_vm3, %v4091_v13, %v4092_v9  ;;  %v4097_v19 = vsel %vm1617_vm3, %v3991_v1, %v4091_v13 }
0x19b9   : > { %v10498_v20 = vadd.f32 %v4098_v14, %v4097_v19  ;;  %v10500_v21 = vadd.f32 %v4099_v15, %v4093_v18  ;;  %v4113_v26 = vsel %vm4112_vm14, %v10502_v23, 0.0 }
0x19bb   : > { %v4106_v24 = vsel %vm1666_vm5, %v10498_v20, 0.0  ;;  %v4109_v30 = vsel %vm1666_vm5, %v10500_v21, 0.0 }
0x19bc   : > { %4107 = vadd.xlane.f32.xlu0 %v4106_v24  ;;  %4110 = vadd.xlane.f32.xlu1 %v4109_v30 }
0x19c0   : > { %4114 = vadd.xlane.f32.xlu0 %v4113_v26 }
0x1a49   : > { %v4108_v27 = vpop.xlane.xlu0 %4107  ;;  %v4111_v28 = vpop.xlane.xlu1 %4110 }
0x1a4a   : > { %v4116_v29 = vmul.f32 0.03125, %v4108_v27  ;;  %v4117_v31 = vmul.f32 0.03125, %v4111_v28 }
0x1a4c   : > { %v4119_v32 = vsub.f32 %v10498_v20, %v4116_v29  ;;  %v4120_v35 = vsub.f32 %v10500_v21, %v4117_v31 }
0x1a4d   : > { %v4115_v33 = vpop.xlane.xlu0 %4114 }
0x1a4e   : > { %v4118_v34 = vmul.f32 0.03125, %v4115_v33  ;;  %v4122_v36 = vmul.f32 %v4119_v32, %v4119_v32  ;;  %v4123_v37 = vmul.f32 %v4120_v35, %v4120_v35 }
0x1a50   : > { %v4121_v38 = vsub.f32 %v10502_v23, %v4118_v34  ;;  %v4125_v39 = vsel %vm1666_vm5, %v4122_v36, 0.0  ;;  %v4128_v40 = vsel %vm1666_vm5, %v4123_v37, 0.0 }
0x1a51   : > { %4126 = vadd.xlane.f32.xlu1 %v4125_v39  ;;  %4129 = vadd.xlane.f32.xlu0 %v4128_v40 }
0x1a52   : > { %v4124_v41 = vmul.f32 %v4121_v38, %v4121_v38 }
0x1a54   : > { %v4131_v42 = vsel %vm4112_vm14, %v4124_v41, 0.0 }
0x1a55   : > { %4132 = vadd.xlane.f32.xlu1 %v4131_v42 }
0x1ade   : > { %v4130_v48 = vpop.xlane.xlu0 %4129  ;;  %v4127_v49 = vpop.xlane.xlu1 %4126 }
0x1adf   : > { %v4135_v50 = vmul.f32 0.03125, %v4130_v48  ;;  %v4134_v22 = vmul.f32 0.03125, %v4127_v49 }
0x1ae1   : > { %v4138_v51 = vadd.f32 1e-05, %v4135_v50  ;;  %v4137_v52 = vadd.f32 1e-05, %v4134_v22 }
0x1ae2   : > { %v4133_v53 = vpop.xlane.xlu1 %4132 }
0x1ae3   : > { %9570 = vrsqrt.f32 %v4138_v51  ;;  %v4136_v54 = vmul.f32 0.03125, %v4133_v53 }
0x1ae4   : > { %9572 = vrsqrt.f32 %v4137_v52 }
0x1ae5   : > { %v4139_v55 = vadd.f32 1e-05, %v4136_v54 }
0x1ae7   : > { %9574 = vrsqrt.f32 %v4139_v55 }
0x1aed   : > { %v9571_v56 = vpop.eup %9570 }
0x1aee   : > { %v9573_v57 = vpop.eup %9572  ;;  %v4144_v60 = vmul.f32 %v9571_v56, %v4120_v35 }
0x1aef   : > { %v4143_v59 = vmul.f32 %v9573_v57, %v4119_v32 }
0x1af0   : > { %v4153_v1 = vmul.f32 %v7925_v58, %v4144_v60 }
0x1af1   : > { %v9575_v62 = vpop.eup %9574  ;;  %v4152_v63 = vmul.f32 %v7925_v58, %v4143_v59 }
0x1af2   : > { %v4145_v2 = vmul.f32 %v9575_v62, %v4121_v38  ;;  %v4162_v3 = vadd.f32 %v7926_v61, %v4153_v1 }
0x1af3   : > { %v4161_v0 = vadd.f32 %v7926_v61, %v4152_v63 }
0x1af4   : > { %v4154_v4 = vmul.f32 %v7925_v58, %v4145_v2 }
0x1af5   : > { %8655 = vmatmul.mubr.msk.f32.vlgmr.msra.gmra.mrb[38].mxu1 %vm1666_vm5, %v4161_v0 }
0x1af6   : > { %8657 = vmatprep.mubr.msk.f32.mxu1 %vm9830_vm1, %v9831_v12  ;;  %v4163_v5 = vadd.f32 %v7926_v61, %v4154_v4 }
0x1af9   : > { %8658 = vmatmul.mubr.msk.f32.gmra.mrb[40].mxu1 %vm1666_vm5, %v4162_v3 }
0x1afa   : > { %8660 = vmatprep.mubr.msk.f32.mxu1 %vm9830_vm1, %v9831_v12 }
0x1afd   : > { %8661 = vmatmul.mubr.msk.f32.gmra.mrb[42].mxu1 %vm1666_vm5, %v4163_v5 }
0x1afe   : > { %8669 = vmatprep.mubr.msk.f32.mxu1 %vm9830_vm1, %v9831_v12 }
0x1bc8   : > { %v4255_v7 = vpop.f32.mrb[38].mxu1 }
0x1bc9   : > { %v4256_v8 = vadd.f32 %v7927_v6, %v4255_v7  ;;  %v8656_v9 = vpop.f32.mrb[39].mxu1 }
0x1bcb   : > { %4272 = vrot.lane.b32.xlu0 %v4256_v8, %s11622_s17  ;;  %v4299_v43 = vmul.f32 0.35355338, %v4256_v8 }
0x1bcc   : > { %v4260_v10 = vpop.f32.mrb[40].mxu1 }
0x1bcd   : > { %v4261_v13 = vadd.f32 %v7927_v6, %v4260_v10  ;;  %v8659_v14 = vpop.f32.mrb[41].mxu1 }
0x1bcf   : > { %4281 = vrot.lane.b32.xlu0 %v4256_v8, %s11621_s14  ;;  %4274 = vrot.lane.b32.xlu1 %v4261_v13, %s11622_s17  ;;  %v9440_v15 = vpack.i.bf16 %v4261_v13, %v4256_v8  ;;  %v4300_v44 = vmul.f32 0.35355338, %v4261_v13 }
0x1bd0   : > { %v4265_v17 = vpop.f32.mrb[42].mxu1 }
0x1bd1   : > { %v8662_v18 = vpop.f32.mrb[43].mxu1  ;;  %v10539_v19 = vadd.f32 %v7927_v6, %v4265_v17 }
0x1bd3   : > { %4290 = vrot.lane.b32.xlu0 %v4256_v8, %s11623_s25  ;;  %4283 = vrot.lane.b32.xlu1 %v4261_v13, %s11621_s14  ;;  %v4301_v16 = vmul.f32 0.35355338, %v10539_v19 }
0x1bd7   : > { %4285 = vrot.lane.b32.xlu0 %v10539_v19, %s11621_s14  ;;  %4276 = vrot.lane.b32.xlu1 %v10539_v19, %s11622_s17 }
0x1bdb   : > { %9441 = vrot.lane.b32.xlu0 %v9440_v15, %s11624_s19  ;;  %4292 = vrot.lane.b32.xlu1 %v4261_v13, %s11623_s25 }
0x1bdf   : > { %4315 = vrot.lane.b32.xlu0 %v10539_v19, %s11624_s19  ;;  %4294 = vrot.lane.b32.xlu1 %v10539_v19, %s11623_s25 }
0x1c3d   : > { %v4273_v24 = vpop.permute.xlu0 %4272 }
0x1c3e   : > { %v4302_v54 = vmul.f32 0.35355338, %v4273_v24 }
0x1c41   : > { %v10551_v30 = vpop.permute.xlu0 %4281  ;;  %v4275_v26 = vpop.permute.xlu1 %4274 }
0x1c42   : > { %v9445_v27 = vpack.i.bf16 %v4275_v26, %v4273_v24  ;;  %v4305_v60 = vmul.f32 0.35355338, %v10551_v30  ;;  %v4303_v61 = vmul.f32 0.35355338, %v4275_v26 }
0x1c44   : > { %9446 = vrot.lane.b32.xlu1 %v9445_v27, %s11624_s19 }
0x1c45   : > { %v10554_v28 = vpop.permute.xlu0 %4290  ;;  %v10556_v29 = vpop.permute.xlu1 %4283 }
0x1c46   : > { %v10560_v31 = vpack.i.bf16 %v10556_v29, %v10551_v30  ;;  %v4306_v0 = vmul.f32 0.35355338, %v10556_v29  ;;  %v4308_v8 = vmul.f32 0.35355338, %v10554_v28 }
0x1c48   : > { %9451 = vrot.lane.b32.xlu0 %v10560_v31, %s11624_s19 }
0x1c49   : > { %v10564_v32 = vpop.permute.xlu0 %4285  ;;  %v10566_v35 = vpop.permute.xlu1 %4276 }
0x1c4a   : > { %4416 = vrot.lane.b32.xlu1 %v10566_v35, %s11624_s19  ;;  %v4304_v1 = vmul.f32 0.35355338, %v10566_v35  ;;  %v4307_v7 = vmul.f32 0.35355338, %v10564_v32 }
0x1c4c   : > { %4517 = vrot.lane.b32.xlu0 %v10564_v32, %s11624_s19 }
0x1c4d   : > { %v9442_v33 = vpop.permute.xlu0 %9441  ;;  %v10572_v34 = vpop.permute.xlu1 %4292 }
0x1c4e   : > { %v9444_v36 = vunpack.i.h.bf16 %v9442_v33  ;;  %v9443_v37 = vunpack.i.l.bf16 %v9442_v33  ;;  %v10576_v38 = vpack.i.bf16 %v10572_v34, %v10554_v28  ;;  %v4309_v10 = vmul.f32 0.35355338, %v10572_v34 }
0x1c50   : > { %v9203_v40 = vpack.c.bf16 %v9444_v36, %v9443_v37  ;;  %9466 = vrot.lane.b32.xlu0 %v9445_v27, %s11625_s6  ;;  %9456 = vrot.lane.b32.xlu1 %v10576_v38, %s11624_s19 }
0x1c51   : > { %v10590_v41 = vpop.permute.xlu1 %4294  ;;  %v4316_v42 = vpop.permute.xlu0 %4315 }
0x1c52   : > { %9205 = vmatpush3.bf16.xpose.msk.msra.mxu1 %vm10580_vm15, %v9203_v40  ;;  %v4310_v13 = vmul.f32 0.35355338, %v10590_v41 }
0x1c53   : > { %8667 = vmatprep.subr.mxu1 %v9831_v12 }
0x1c54   : > { %4618 = vrot.lane.b32.xlu1 %v10590_v41, %s11624_s19 }
0x1c58   : > { %9461 = vrot.lane.b32.xlu1 %v9440_v15, %s11625_s6 }
0x1c5a   : > { %8668 = vmatpush3.xpose.msk.msra.mxu1 %vm1756_vm6, %v4316_v42 }
0x1c5b   : > { %9210 = vmatprep.subr.bf16.mxu1 %v9829_v11 }
0x1c5d   : > { %8670 = vmatmul.mubr.msk.f32.vlgmr.msra.gmra.mrb[44].mxu1 %vm1756_vm6, %v4299_v43 }
0x1c5e   : > { %8672 = vmatprep.mubr.msk.f32.mxu1 %vm9830_vm1, %v9831_v12 }
0x1c61   : > { %8673 = vmatmul.mubr.msk.f32.gmra.mrb[46].mxu1 %vm1756_vm6, %v4300_v44 }
0x1c62   : > { %8675 = vmatprep.mubr.msk.f32.mxu1 %vm9830_vm1, %v9831_v12 }
0x1c65   : > { %8676 = vmatmul.mubr.msk.f32.gmra.mrb[48].mxu1 %vm1756_vm6, %v4301_v16 }
0x1c66   : > { %8699 = vmatprep.mubr.msk.f32.mxu1 %vm9830_vm1, %v9831_v12 }
0x1cb6   : > { %v9447_v45 = vpop.permute.xlu1 %9446 }
0x1cb7   : > { %v9449_v46 = vunpack.i.h.bf16 %v9447_v45  ;;  %v9448_v47 = vunpack.i.l.bf16 %v9447_v45 }
0x1cb9   : > { %v9207_v48 = vpack.c.bf16 %v9449_v46, %v9448_v47 }
0x1cba   : > { %v9452_v49 = vpop.permute.xlu0 %9451 }
0x1cbb   : > { %v9454_v50 = vunpack.i.h.bf16 %v9452_v49  ;;  %v9453_v22 = vunpack.i.l.bf16 %v9452_v49  ;;  %9209 = vmatpush3.bf16.xpose.msk.msra.mxu0 %vm10580_vm15, %v9207_v48 }
0x1cbc   : > { %8682 = vmatprep.subr.mxu0 %v9831_v12  ;;  %v4417_v52 = vpop.permute.xlu1 %4416 }
0x1cbd   : > { %v9211_v51 = vpack.c.bf16 %v9454_v50, %v9453_v22 }
0x1cbe   : > { %v4518_v57 = vpop.permute.xlu0 %4517 }
0x1cbf   : > { %9213 = vmatpush3.bf16.xpose.msk.msra.mxu1 %vm10580_vm15, %v9211_v51 }
0x1cc0   : > { %8697 = vmatprep.subr.mxu1 %v9831_v12 }
0x1cc2   : > { %v9457_v53 = vpop.permute.xlu1 %9456  ;;  %v9467_v62 = vpop.permute.xlu0 %9466 }
0x1cc3   : > { %8683 = vmatpush3.xpose.msk.msra.mxu0 %vm1756_vm6, %v4417_v52  ;;  %v9459_v55 = vunpack.i.h.bf16 %v9457_v53  ;;  %v9458_v56 = vunpack.i.l.bf16 %v9457_v53  ;;  %v9469_v4 = vunpack.i.h.bf16 %v9467_v62  ;;  %v9468_v5 = vunpack.i.l.bf16 %v9467_v62 }
0x1cc4   : > { %9214 = vmatprep.subr.bf16.mxu0 %v9829_v11 }
0x1cc5   : > { %v9215_v58 = vpack.c.bf16 %v9459_v55, %v9458_v56  ;;  %v9222_v9 = vpack.c.bf16 %v9469_v4, %v9468_v5 }
0x1cc6   : > { %8685 = vmatmul.mubr.msk.f32.vlgmr.msra.gmra.mrb[18].mxu0 %vm1756_vm6, %v4302_v54  ;;  %v4619_v59 = vpop.permute.xlu1 %4618 }
0x1cc7   : > { %8698 = vmatpush3.xpose.msk.msra.mxu1 %vm1756_vm6, %v4518_v57  ;;  %8687 = vmatprep.mubr.msk.f32.mxu0 %vm9830_vm1, %v9831_v12 }
0x1cc8   : > { %9217 = vmatpush3.bf16.xpose.msk.msra.mxu0 %vm10580_vm15, %v9215_v58  ;;  %9218 = vmatprep.subr.bf16.mxu1 %v9829_v11 }
0x1cc9   : > { %8712 = vmatprep.subr.mxu0 %v9831_v12 }
0x1cca   : > { %8700 = vmatmul.mubr.msk.f32.vlgmr.msra.gmra.mrb[50].mxu1 %vm1756_vm6, %v4305_v60  ;;  %8688 = vmatmul.mubr.msk.f32.gmra.mrb[20].mxu0 %vm1756_vm6, %v4303_v61  ;;  %v9462_v63 = vpop.permute.xlu1 %9461 }
0x1ccb   : > { %8690 = vmatprep.mubr.msk.f32.mxu0 %vm9830_vm1, %v9831_v12  ;;  %8702 = vmatprep.mubr.msk.f32.mxu1 %vm9830_vm1, %v9831_v12  ;;  %v9464_v2 = vunpack.i.h.bf16 %v9462_v63  ;;  %v9463_v3 = vunpack.i.l.bf16 %v9462_v63 }
0x1ccd   : > { %v9219_v6 = vpack.c.bf16 %v9464_v2, %v9463_v3 }
0x1cce   : > { %8691 = vmatmul.mubr.msk.f32.gmra.mrb[22].mxu0 %vm1756_vm6, %v4304_v1  ;;  %8703 = vmatmul.mubr.msk.f32.gmra.mrb[52].mxu1 %vm1756_vm6, %v4306_v0 }
0x1ccf   : > { %8705 = vmatprep.mubr.msk.f32.mxu1 %vm9830_vm1, %v9831_v12  ;;  %8714 = vmatprep.mubr.msk.f32.mxu0 %vm9830_vm1, %v9831_v12 }
0x1cd0   : > { %8713 = vmatpush3.xpose.msk.msra.mxu0 %vm1756_vm6, %v4619_v59  ;;  %9220 = vmatpush3.bf16.msra.mxu1 %v9219_v6 }
0x1cd1   : > { %9221 = vmatprep.subr.bf16.mxu0 %v9829_v11  ;;  %8727 = vmatprep.subr.mxu1 %v9831_v12 }
0x1cd2   : > { %8706 = vmatmul.mubr.msk.f32.gmra.mrb[54].mxu1 %vm1756_vm6, %v4307_v7 }
0x1cd3   : > { %8715 = vmatmul.mubr.msk.f32.vlgmr.msra.gmra.mrb[24].mxu0 %vm1756_vm6, %v4308_v8  ;;  %8729 = vmatprep.mubr.msk.f32.mxu1 %vm9830_vm1, %v9831_v12 }
0x1cd4   : > { %9223 = vmatpush3.bf16.msra.mxu0 %v9222_v9  ;;  %8717 = vmatprep.mubr.msk.f32.mxu0 %vm9830_vm1, %v9831_v12 }
0x1cd5   : > { %8742 = vmatprep.subr.mxu0 %v9831_v12 }
0x1cd7   : > { %8718 = vmatmul.mubr.msk.f32.gmra.mrb[26].mxu0 %vm1756_vm6, %v4309_v10 }
0x1cd8   : > { %8720 = vmatprep.mubr.msk.f32.mxu0 %vm9830_vm1, %v9831_v12 }
0x1cdb   : > { %8721 = vmatmul.mubr.msk.f32.gmra.mrb[28].mxu0 %vm1756_vm6, %v4310_v13 }
0x1cdc   : > { %8744 = vmatprep.mubr.msk.f32.mxu0 %vm9830_vm1, %v9831_v12 }
0x1d30   : > { %v4398_v14 = vpop.f32.mrb[44].mxu1 }
0x1d31   : > { %v8671_v15 = vpop.f32.mrb[45].mxu1  ;;  %v4716_v17 = vsel %vm4715_vm4, %v4398_v14, -inf }
0x1d32   : > { %4717 = vmax.xlane.f32.xlu0 %v4716_v17 }
0x1d34   : > { %v4403_v18 = vpop.f32.mrb[46].mxu1 }
0x1d35   : > { %v8674_v24 = vpop.f32.mrb[47].mxu1  ;;  %v4719_v30 = vsel %vm4715_vm4, %v4403_v18, -inf }
0x1d36   : > { %4720 = vmax.xlane.f32.xlu0 %v4719_v30 }
0x1d38   : > { %v4408_v26 = vpop.f32.mrb[48].mxu1 }
0x1d39   : > { %v8677_v27 = vpop.f32.mrb[49].mxu1  ;;  %v4723_v28 = vsel %vm4722_vm7, %v4408_v26, -inf }
0x1d3a   : > { %4724 = vmax.xlane.f32.xlu1 %v4723_v28 }
0x1d99   : > { %v4499_v29 = vpop.f32.mrb[18].mxu0 }
0x1d9a   : > { %v8686_v33 = vpop.f32.mrb[19].mxu0  ;;  %v4726_v34 = vsel %vm4715_vm4, %v4499_v29, -inf }
0x1d9b   : > { %4727 = vmax.xlane.f32.xlu1 %v4726_v34 }
0x1d9d   : > { %v10662_v36 = vpop.f32.mrb[20].mxu0  ;;  %v4600_v37 = vpop.f32.mrb[50].mxu1 }
0x1d9e   : > { %v8689_v40 = vpop.f32.mrb[21].mxu0  ;;  %v8701_v42 = vpop.f32.mrb[51].mxu1  ;;  %v4735_v43 = vsel %vm4715_vm4, %v4600_v37, -inf  ;;  %v4729_v44 = vsel %vm4715_vm4, %v10662_v36, -inf }
0x1d9f   : > { %4736 = vmax.xlane.f32.xlu1 %v4735_v43  ;;  %4730 = vmax.xlane.f32.xlu0 %v4729_v44 }
0x1da1   : > { %v10667_v16 = vpop.f32.mrb[22].mxu0  ;;  %v4605_v45 = vpop.f32.mrb[52].mxu1 }
0x1da2   : > { %v8692_v46 = vpop.f32.mrb[23].mxu0  ;;  %v8704_v47 = vpop.f32.mrb[53].mxu1  ;;  %v4738_v48 = vsel %vm4715_vm4, %v4605_v45, -inf  ;;  %v4732_v49 = vsel %vm4722_vm7, %v10667_v16, -inf }
0x1da3   : > { %4739 = vmax.xlane.f32.xlu1 %v4738_v48  ;;  %4733 = vmax.xlane.f32.xlu0 %v4732_v49 }
0x1da5   : > { %v10672_v50 = vpop.f32.mrb[54].mxu1 }
0x1da6   : > { %v10674_v22 = vpop.f32.mrb[24].mxu0  ;;  %v8707_v51 = vpop.f32.mrb[55].mxu1  ;;  %v4741_v52 = vsel %vm4722_vm7, %v10672_v50, -inf }
0x1da7   : > { %v8716_v53 = vpop.f32.mrb[25].mxu0  ;;  %4742 = vmax.xlane.f32.xlu1 %v4741_v52  ;;  %v4744_v54 = vsel %vm4715_vm4, %v10674_v22, -inf }
0x1da8   : > { %4745 = vmax.xlane.f32.xlu0 %v4744_v54 }
0x1daa   : > { %v10680_v55 = vpop.f32.mrb[26].mxu0 }
0x1dab   : > { %v8719_v56 = vpop.f32.mrb[27].mxu0  ;;  %v4747_v57 = vsel %vm4715_vm4, %v10680_v55, -inf }
0x1dac   : > { %4748 = vmax.xlane.f32.xlu0 %v4747_v57 }
0x1dae   : > { %v10684_v58 = vpop.f32.mrb[28].mxu0 }
0x1daf   : > { %v8722_v59 = vpop.f32.mrb[29].mxu0  ;;  %v4750_v60 = vsel %vm4722_vm7, %v10684_v58, -inf }
0x1db0   : > { %4751 = vmax.xlane.f32.xlu0 %v4750_v60 }
0x1db8   : > { %4952 = vrot.lane.b32.xlu1 %v10566_v35, %s11625_s6 }
0x1dbf   : > { %v4718_v61 = vpop.xlane.xlu0 %4717 }
0x1dc0   : > { %v4753_v62 = vsub.f32 %v4398_v14, %v4718_v61 }
0x1dc2   : > { %v4765_v0 = vmul.f32 1.442695, %v4753_v62 }
0x1dc3   : > { %v4721_v63 = vpop.xlane.xlu0 %4720 }
0x1dc4   : > { %v4754_v1 = vsub.f32 %v4403_v18, %v4721_v63  ;;  %9576 = vpow2.f32 %v4765_v0 }
0x1dc6   : > { %4853 = vrot.lane.b32.xlu0 %v10539_v19, %s11625_s6  ;;  %v4767_v3 = vmul.f32 1.442695, %v4754_v1 }
0x1dc7   : > { %v4725_v2 = vpop.xlane.xlu1 %4724 }
0x1dc8   : > { %v4755_v4 = vsub.f32 %v4408_v26, %v4725_v2  ;;  %9578 = vpow2.f32 %v4767_v3 }
0x1dca   : > { %v4769_v5 = vmul.f32 1.442695, %v4755_v4 }
0x1dcc   : > { %9580 = vpow2.f32 %v4769_v5 }
0x1dce   : > { %v10692_v6 = vpop.eup %9576 }
0x1dcf   : > { %v4789_v35 = vsel %vm4715_vm4, %v10692_v6, 0.0 }
0x1dd2   : > { %v10696_v7 = vpop.eup %9578 }
0x1dd3   : > { %v4792_v19 = vsel %vm4715_vm4, %v10696_v7, 0.0 }
0x1dd6   : > { %v10700_v8 = vpop.eup %9580 }
0x1dd7   : > { %v4795_v9 = vsel %vm4722_vm7, %v10700_v8, 0.0 }
0x1ddc   : > { %4790 = vadd.xlane.f32.xlu1 %v4789_v35 }
0x1de0   : > { %4793 = vadd.xlane.f32.xlu1 %v4792_v19 }
0x1de4   : > { %4796 = vadd.xlane.f32.xlu1 %v4795_v9 }
0x1e28   : > { %v4728_v10 = vpop.xlane.xlu1 %4727 }
0x1e29   : > { %v4756_v13 = vsub.f32 %v4499_v29, %v4728_v10 }
0x1e2b   : > { %v4771_v14 = vmul.f32 1.442695, %v4756_v13 }
0x1e2c   : > { %v4737_v15 = vpop.xlane.xlu1 %4736  ;;  %v4731_v17 = vpop.xlane.xlu0 %4730 }
0x1e2d   : > { %9582 = vpow2.f32 %v4771_v14  ;;  %v4759_v18 = vsub.f32 %v4600_v37, %v4737_v15  ;;  %v4757_v24 = vsub.f32 %v10662_v36, %v4731_v17 }
0x1e2f   : > { %v4777_v30 = vmul.f32 1.442695, %v4759_v18  ;;  %v4773_v26 = vmul.f32 1.442695, %v4757_v24 }
0x1e30   : > { %v4740_v27 = vpop.xlane.xlu1 %4739  ;;  %v4734_v28 = vpop.xlane.xlu0 %4733 }
0x1e31   : > { %9584 = vpow2.f32 %v4777_v30  ;;  %v4760_v33 = vsub.f32 %v4605_v45, %v4740_v27  ;;  %v4758_v34 = vsub.f32 %v10667_v16, %v4734_v28 }
0x1e32   : > { %9586 = vpow2.f32 %v4773_v26 }
0x1e33   : > { %v4779_v40 = vmul.f32 1.442695, %v4760_v33  ;;  %v4775_v42 = vmul.f32 1.442695, %v4758_v34 }
0x1e34   : > { %v4743_v43 = vpop.xlane.xlu1 %4742 }
0x1e35   : > { %9588 = vpow2.f32 %v4779_v40  ;;  %v4761_v29 = vsub.f32 %v10672_v50, %v4743_v43  ;;  %v4746_v44 = vpop.xlane.xlu0 %4745 }
0x1e36   : > { %9590 = vpow2.f32 %v4775_v42  ;;  %v4762_v37 = vsub.f32 %v10674_v22, %v4746_v44 }
0x1e37   : > { %v10708_v36 = vpop.eup %9582  ;;  %v4781_v46 = vmul.f32 1.442695, %v4761_v29 }
0x1e38   : > { %v4783_v47 = vmul.f32 1.442695, %v4762_v37  ;;  %v4953_v48 = vpop.permute.xlu1 %4952  ;;  %v4798_v45 = vsel %vm4715_vm4, %v10708_v36, 0.0 }
0x1e39   : > { %9592 = vpow2.f32 %v4781_v46  ;;  %v4749_v16 = vpop.xlane.xlu0 %4748  ;;  %8743 = vmatpush3.msk.msra.mxu0 %vm1617_vm3, %v4953_v48  ;;  %4799 = vadd.xlane.f32.xlu0 %v4798_v45 }
0x1e3a   : > { %9594 = vpow2.f32 %v4783_v47  ;;  %v4763_v49 = vsub.f32 %v10680_v55, %v4749_v16  ;;  %9227 = vmatprep.subr.bf16.mxu0 %v9829_v11 }
0x1e3b   : > { %v10715_v50 = vpop.eup %9584 }
0x1e3c   : > { %v10717_v22 = vpop.eup %9586  ;;  %v4785_v51 = vmul.f32 1.442695, %v4763_v49  ;;  %v4807_v52 = vsel %vm4715_vm4, %v10715_v50, 0.0 }
0x1e3d   : > { %v4752_v53 = vpop.xlane.xlu0 %4751  ;;  %4808 = vadd.xlane.f32.xlu1 %v4807_v52  ;;  %v4801_v54 = vsel %vm4715_vm4, %v10717_v22, 0.0 }
0x1e3e   : > { %9596 = vpow2.f32 %v4785_v51  ;;  %v4764_v56 = vsub.f32 %v10684_v58, %v4752_v53  ;;  %4802 = vadd.xlane.f32.xlu0 %v4801_v54 }
0x1e3f   : > { %v10724_v55 = vpop.eup %9588 }
0x1e40   : > { %v10726_v57 = vpop.eup %9590  ;;  %v4787_v59 = vmul.f32 1.442695, %v4764_v56  ;;  %v4810_v60 = vsel %vm4715_vm4, %v10724_v55, 0.0 }
0x1e41   : > { %v4854_v61 = vpop.permute.xlu0 %4853  ;;  %4811 = vadd.xlane.f32.xlu1 %v4810_v60  ;;  %v4804_v62 = vsel %vm4722_vm7, %v10726_v57, 0.0 }
0x1e42   : > { %9598 = vpow2.f32 %v4787_v59  ;;  %4805 = vadd.xlane.f32.xlu0 %v4804_v62  ;;  %8728 = vmatpush3.msk.msra.mxu1 %vm1617_vm3, %v4854_v61 }
0x1e43   : > { %v10733_v63 = vpop.eup %9592  ;;  %9224 = vmatprep.subr.bf16.mxu1 %v9829_v11 }
0x1e44   : > { %v10736_v58 = vpop.eup %9594  ;;  %v4813_v0 = vsel %vm4722_vm7, %v10733_v63, 0.0 }
0x1e45   : > { %4814 = vadd.xlane.f32.xlu1 %v4813_v0  ;;  %v4816_v1 = vsel %vm4715_vm4, %v10736_v58, 0.0 }
0x1e46   : > { %4817 = vadd.xlane.f32.xlu0 %v4816_v1 }
0x1e48   : > { %v10742_v2 = vpop.eup %9596 }
0x1e49   : > { %v4819_v3 = vsel %vm4715_vm4, %v10742_v2, 0.0 }
0x1e4a   : > { %4820 = vadd.xlane.f32.xlu0 %v4819_v3  ;;  %v4169_v3 = vld [vmem:[%s11642_s20] sm:$0xff] }
0x1e4c   : > { %v10746_v4 = vpop.eup %9598 }
0x1e4d   : > { %v4822_v5 = vsel %vm4722_vm7, %v10746_v4, 0.0 }
0x1e4e   : > { %4823 = vadd.xlane.f32.xlu0 %v4822_v5  ;;  %v4171_v5 = vld [vmem:[%s11642_s20 + $0x10] sm:$0xff] }
0x1e56   : > { %9476 = vrot.lane.b32.xlu1 %v10576_v38, %s11625_s6 }
0x1e5a   : > { %5051 = vrot.lane.b32.xlu1 %v10564_v32, %s11625_s6 }
0x1e5e   : > { %5150 = vrot.lane.b32.xlu1 %v10590_v41, %s11625_s6 }
0x1e64   : > { %9471 = vrot.lane.b32.xlu0 %v10560_v31, %s11625_s6 }
0x1e69   : > { %v4791_v35 = vpop.xlane.xlu1 %4790 }
0x1e6a   : > { %9600 = vrcp.f32 %v4791_v35 }
0x1e6d   : > { %v4794_v19 = vpop.xlane.xlu1 %4793 }
0x1e6e   : > { %9602 = vrcp.f32 %v4794_v19  ;;  %v4172_v19 = vld [vmem:[%s11642_s20 + $0x18] sm:$0xff] }
0x1e71   : > { %v4797_v9 = vpop.xlane.xlu1 %4796 }
0x1e72   : > { %9604 = vrcp.f32 %v4797_v9  ;;  %v9234_v9 = vpack.c.bf16 %v4172_v19, %v4171_v5 }
0x1e74   : > { %v9601_v10 = vpop.eup %9600 }
0x1e75   : > { %v4837_v13 = vmul.f32 %v9601_v10, %v10692_v6 }
0x1e77   : > { %8730 = vmatmul.mubr.msk.f32.vlgmr.msra.gmra.mrb[56].mxu1 %vm4715_vm4, %v4837_v13 }
0x1e78   : > { %v9603_v38 = vpop.eup %9602  ;;  %8732 = vmatprep.mubr.msk.f32.mxu1 %vm9830_vm1, %v9831_v12 }
0x1e79   : > { %v4838_v32 = vmul.f32 %v9603_v38, %v10696_v7 }
0x1e7b   : > { %8733 = vmatmul.mubr.msk.f32.gmra.mrb[58].mxu1 %vm4715_vm4, %v4838_v32 }
0x1e7c   : > { %v9605_v31 = vpop.eup %9604  ;;  %8735 = vmatprep.mubr.msk.f32.mxu1 %vm9830_vm1, %v9831_v12 }
0x1e7d   : > { %v4839_v41 = vmul.f32 %v9605_v31, %v10700_v8 }
0x1e7f   : > { %8736 = vmatmul.mubr.msk.f32.gmra.mrb[60].mxu1 %vm4715_vm4, %v4839_v41 }
0x1e80   : > { %8759 = vmatprep.mubr.msk.f32.mxu1 %vm9830_vm1, %v9831_v12 }
0x1ec6   : > { %v4800_v6 = vpop.xlane.xlu0 %4799 }
0x1ec7   : > { %9606 = vrcp.f32 %v4800_v6 }
0x1eca   : > { %v4809_v14 = vpop.xlane.xlu1 %4808 }
0x1ecb   : > { %v4803_v15 = vpop.xlane.xlu0 %4802 }
0x1ecc   : > { %9608 = vrcp.f32 %v4803_v15 }
0x1ece   : > { %v4812_v17 = vpop.xlane.xlu1 %4811 }
0x1ecf   : > { %v4806_v7 = vpop.xlane.xlu0 %4805 }
0x1ed0   : > { %9610 = vrcp.f32 %v4806_v7 }
0x1ed1   : > { %v9607_v18 = vpop.eup %9606 }
0x1ed2   : > { %v4840_v24 = vmul.f32 %v9607_v18, %v10708_v36  ;;  %v4815_v30 = vpop.xlane.xlu1 %4814 }
0x1ed3   : > { %v4818_v26 = vpop.xlane.xlu0 %4817 }
0x1ed4   : > { %9612 = vrcp.f32 %v4818_v26  ;;  %8745 = vmatmul.mubr.msk.f32.vlgmr.msra.gmra.mrb[30].mxu0 %vm4715_vm4, %v4840_v24 }
0x1ed5   : > { %8747 = vmatprep.mubr.msk.f32.mxu0 %vm9830_vm1, %v9831_v12 }
0x1ed6   : > { %v9609_v8 = vpop.eup %9608  ;;  %v9477_v27 = vpop.permute.xlu1 %9476 }
0x1ed7   : > { %v9479_v28 = vunpack.i.h.bf16 %v9477_v27  ;;  %v9478_v33 = vunpack.i.l.bf16 %v9477_v27  ;;  %v4821_v34 = vpop.xlane.xlu0 %4820  ;;  %v4841_v40 = vmul.f32 %v9609_v8, %v10717_v22 }
0x1ed8   : > { %9614 = vrcp.f32 %v4821_v34 }
0x1ed9   : > { %v9228_v42 = vpack.c.bf16 %v9479_v28, %v9478_v33  ;;  %8748 = vmatmul.mubr.msk.f32.gmra.mrb[32].mxu0 %vm4715_vm4, %v4841_v40  ;;  %9616 = vrcp.f32 %v4809_v14 }
0x1eda   : > { %v9611_v43 = vpop.eup %9610  ;;  %v5052_v29 = vpop.permute.xlu1 %5051  ;;  %8750 = vmatprep.mubr.msk.f32.mxu0 %vm9830_vm1, %v9831_v12 }
0x1edb   : > { %v4824_v44 = vpop.xlane.xlu0 %4823  ;;  %9229 = vmatpush3.bf16.msra.mxu0 %v9228_v42  ;;  %v4842_v37 = vmul.f32 %v9611_v43, %v10726_v57 }
0x1edc   : > { %9618 = vrcp.f32 %v4824_v44  ;;  %8772 = vmatprep.subr.mxu0 %v9831_v12 }
0x1edd   : > { %8751 = vmatmul.mubr.msk.f32.gmra.mrb[34].mxu0 %vm4715_vm4, %v4842_v37  ;;  %9620 = vrcp.f32 %v4812_v17 }
0x1ede   : > { %v9613_v36 = vpop.eup %9612  ;;  %v5151_v46 = vpop.permute.xlu1 %5150  ;;  %8774 = vmatprep.mubr.msk.f32.mxu0 %vm9830_vm1, %v9831_v12  ;;  %9622 = vrcp.f32 %v4815_v30 }
0x1edf   : > { %v4846_v47 = vmul.f32 %v9613_v36, %v10736_v58  ;;  %v9472_v48 = vpop.permute.xlu0 %9471  ;;  %8773 = vmatpush3.msk.msra.mxu0 %vm1617_vm3, %v5151_v46 }
0x1ee0   : > { %v9474_v45 = vunpack.i.h.bf16 %v9472_v48  ;;  %v9473_v16 = vunpack.i.l.bf16 %v9472_v48  ;;  %9236 = vmatprep.subr.bf16.mxu0 %v9829_v11 }
0x1ee1   : > { %8775 = vmatmul.mubr.msk.f32.vlgmr.msra.gmra.mrb[36].mxu0 %vm4715_vm4, %v4846_v47 }
0x1ee2   : > { %v9615_v49 = vpop.eup %9614  ;;  %v9225_v22 = vpack.c.bf16 %v9474_v45, %v9473_v16  ;;  %8777 = vmatprep.mubr.msk.f32.mxu0 %vm9830_vm1, %v9831_v12 }
0x1ee3   : > { %v4847_v51 = vmul.f32 %v9615_v49, %v10742_v2  ;;  %v9617_v52 = vpop.eup %9616 }
0x1ee4   : > { %9226 = vmatpush3.bf16.msra.mxu1 %v9225_v22  ;;  %v4843_v54 = vmul.f32 %v9617_v52, %v10715_v50 }
0x1ee5   : > { %8778 = vmatmul.mubr.msk.f32.gmra.mrb[38].mxu0 %vm4715_vm4, %v4847_v51  ;;  %8757 = vmatprep.subr.mxu1 %v9831_v12  ;;  %v7971_v51 = vld [vmem:[%s11643_s22] ss:$0 sm:$0xff] }
0x1ee6   : > { %v9619_v53 = vpop.eup %9618  ;;  %8780 = vmatprep.mubr.msk.f32.mxu0 %vm9830_vm1, %v9831_v12 }
0x1ee7   : > { %v4848_v56 = vmul.f32 %v9619_v53, %v10746_v4  ;;  %v9621_v57 = vpop.eup %9620  ;;  %v4170_v4 = vld [vmem:[%s11642_s20 + $0x8] sm:$0xff] }
0x1ee8   : > { %8758 = vmatpush3.msk.msra.mxu1 %vm1617_vm3, %v5052_v29  ;;  %v4844_v59 = vmul.f32 %v9621_v57, %v10724_v55  ;;  %v9623_v50 = vpop.eup %9622 }
0x1ee9   : > { %8760 = vmatmul.mubr.msk.f32.vlgmr.msra.gmra.mrb[62].mxu1 %vm4715_vm4, %v4843_v54  ;;  %8781 = vmatmul.mubr.msk.f32.gmra.mrb[40].mxu0 %vm4715_vm4, %v4848_v56  ;;  %v4845_v60 = vmul.f32 %v9623_v50, %v10733_v63  ;;  %v9231_v63 = vpack.c.bf16 %v4170_v4, %v4169_v3 }
0x1eea   : > { %8762 = vmatprep.mubr.msk.f32.mxu1 %vm9830_vm1, %v9831_v12  ;;  %9230 = vmatprep.subr.bf16.mxu1 %v9829_v11 }
0x1eeb   : > { %8808 = vmatprep.mubr.msk.f32.mxu0 %vm9830_vm1, %v9831_v12  ;;  %9232 = vmatpush3.bf16.msra.mxu1 %v9231_v63 }
0x1eec   : > { %9233 = vmatprep.subr.bf16.mxu1 %v9829_v11 }
0x1eed   : > { %8763 = vmatmul.mubr.msk.f32.gmra.mrb[64].mxu1 %vm4715_vm4, %v4844_v59 }
0x1eee   : > { %8765 = vmatprep.mubr.msk.f32.mxu1 %vm9830_vm1, %v9831_v12 }
0x1eef   : > { %9235 = vmatpush3.bf16.msra.mxu1 %v9234_v9 }
0x1ef0   : > { %9242 = vmatprep.subr.bf16.mxu1 %v9829_v11 }
0x1ef1   : > { %8766 = vmatmul.mubr.msk.f32.gmra.mrb[66].mxu1 %vm4715_vm4, %v4845_v60 }
0x1ef2   : > { %8791 = vmatprep.mubr.msk.f32.mxu1 %vm9830_vm1, %v9831_v12 }
0x1f4a   : > { %v4934_v55 = vpop.f32.mrb[56].mxu1 }
0x1f4b   : > { %v8731_v61 = vpop.f32.mrb[57].mxu1 }
0x1f4e   : > { %v4939_v62 = vpop.f32.mrb[58].mxu1 }
0x1f4f   : > { %v8734_v58 = vpop.f32.mrb[59].mxu1 }
0x1f52   : > { %v4944_v0 = vpop.f32.mrb[60].mxu1 }
0x1f53   : > { %v8737_v1 = vpop.f32.mrb[61].mxu1 }
0x1fa7   : > { %v5033_v2 = vpop.f32.mrb[30].mxu0 }
0x1fa8   : > { %5248 = vrot.lane.b32.xlu0 %v5033_v2, %s11626_s24  ;;  %v8746_v35 = vpop.f32.mrb[31].mxu0 }
0x1fac   : > { %v5038_v10 = vpop.f32.mrb[32].mxu0 }
0x1fad   : > { %v8749_v13 = vpop.f32.mrb[33].mxu0 }
0x1fb0   : > { %v5043_v38 = vpop.f32.mrb[34].mxu0 }
0x1fb1   : > { %v8752_v32 = vpop.f32.mrb[35].mxu0 }
0x1fb4   : > { %v5231_v31 = vpop.f32.mrb[36].mxu0 }
0x1fb5   : > { %5272 = vrot.lane.b32.xlu0 %v5231_v31, %s11628_s30  ;;  %v8776_v41 = vpop.f32.mrb[37].mxu0 }
0x1fb6   : > { %v5447_v41 = vld [vmem:[%s11644_s3] sm:$0xff] }
0x1fb8   : > { %v5236_v6 = vpop.f32.mrb[38].mxu0 }
0x1fb9   : > { %v8779_v14 = vpop.f32.mrb[39].mxu0 }
0x1fbc   : > { %v5132_v15 = vpop.f32.mrb[62].mxu1  ;;  %v5241_v17 = vpop.f32.mrb[40].mxu0 }
0x1fbd   : > { %5260 = vrot.lane.b32.xlu1 %v5132_v15, %s11627_s29  ;;  %v8761_v7 = vpop.f32.mrb[63].mxu1  ;;  %v8782_v18 = vpop.f32.mrb[41].mxu0  ;;  %v5449_v15 = vld [vmem:[%s11644_s3 + $0x10] sm:$0xff] }
0x1fc0   : > { %v5137_v24 = vpop.f32.mrb[64].mxu1 }
0x1fc1   : > { %v8764_v30 = vpop.f32.mrb[65].mxu1  ;;  %5250 = vrot.lane.b32.xlu1 %v5038_v10, %s11626_s24  ;;  %5262 = vrot.lane.b32.xlu0 %v5137_v24, %s11627_s29 }
0x1fc4   : > { %v5142_v26 = vpop.f32.mrb[66].mxu1 }
0x1fc5   : > { %v8767_v8 = vpop.f32.mrb[67].mxu1  ;;  %5252 = vrot.lane.b32.xlu0 %v5043_v38, %s11626_s24  ;;  %5274 = vrot.lane.b32.xlu1 %v5236_v6, %s11628_s30  ;;  %v5448_v6 = vld [vmem:[%s11644_s3 + $0x8] sm:$0xff] }
0x1fc6   : > { %v9237_v14 = vpack.c.bf16 %v5448_v6, %v5447_v41 }
0x1fc8   : > { %9238 = vmatpush3.bf16.msra.mxu0 %v9237_v14 }
0x1fc9   : > { %5264 = vrot.lane.b32.xlu1 %v5142_v26, %s11627_s29  ;;  %5276 = vrot.lane.b32.xlu0 %v5241_v17, %s11628_s30  ;;  %v5450_v17 = vld [vmem:[%s11644_s3 + $0x18] sm:$0xff] }
0x1fca   : > { %9239 = vmatprep.subr.bf16.mxu0 %v9829_v11  ;;  %v9240_v7 = vpack.c.bf16 %v5450_v17, %v5449_v15 }
0x1fcc   : > { %9241 = vmatpush3.bf16.msra.mxu0 %v9240_v7 }
0x1fcd   : > { %9266 = vmatprep.subr.bf16.mxu0 %v9829_v11 }
0x201a   : > { %v5249_v27 = vpop.permute.xlu0 %5248 }
0x201b   : > { %v5281_v28 = vsel %vm1756_vm6, %v4934_v55, %v5249_v27 }
0x2027   : > { %v5273_v33 = vpop.permute.xlu0 %5272 }
0x202f   : > { %v5261_v34 = vpop.permute.xlu1 %5260 }
0x2030   : > { %v5284_v40 = vsel %vm1537_vm2, %v5281_v28, %v5261_v34 }
0x2031   : > { %v5287_v42 = vsel %vm2432_vm10, %v5284_v40, %v5273_v33  ;;  %v7975_v40 = vld [vmem:[%s11645_s23] ss:$0 sm:$0xff] }
0x2032   : > { %8792 = vmatmul.mubr.msk.f32.vlgmr.msra.gmra.mrb[68].mxu1 %vm1666_vm5, %v5287_v42 }
0x2033   : > { %v5251_v43 = vpop.permute.xlu1 %5250  ;;  %v5263_v29 = vpop.permute.xlu0 %5262  ;;  %8794 = vmatprep.mubr.msk.f32.mxu1 %vm9830_vm1, %v9831_v12 }
0x2034   : > { %v5282_v44 = vsel %vm1756_vm6, %v4939_v62, %v5251_v43 }
0x2035   : > { %v5285_v37 = vsel %vm1537_vm2, %v5282_v44, %v5263_v29  ;;  %v7976_v29 = vld [vmem:[%s11646_s26] ss:$0 sm:$0xff] }
0x2037   : > { %v5253_v36 = vpop.permute.xlu0 %5252  ;;  %v5275_v46 = vpop.permute.xlu1 %5274 }
0x2038   : > { %v5288_v47 = vsel %vm2432_vm10, %v5285_v37, %v5275_v46  ;;  %v5283_v48 = vsel %vm1756_vm6, %v4944_v0, %v5253_v36 }
0x2039   : > { %8795 = vmatmul.mubr.msk.f32.gmra.mrb[70].mxu1 %vm1666_vm5, %v5288_v47 }
0x203a   : > { %8797 = vmatprep.mubr.msk.f32.mxu1 %vm9830_vm1, %v9831_v12 }
0x203b   : > { %v5265_v45 = vpop.permute.xlu1 %5264  ;;  %v5277_v16 = vpop.permute.xlu0 %5276 }
0x203c   : > { %v5286_v49 = vsel %vm1537_vm2, %v5283_v48, %v5265_v45 }
0x203d   : > { %v5289_v22 = vsel %vm2432_vm10, %v5286_v49, %v5277_v16 }
0x203e   : > { %8798 = vmatmul.mubr.msk.f32.gmra.mrb[72].mxu1 %vm1666_vm5, %v5289_v22 }
0x203f   : > { %8849 = vmatprep.mubr.msk.f32.mxu1 %vm9830_vm1, %v9831_v12 }
0x2105   : > { %v5371_v52 = vpop.f32.mrb[68].mxu1 }
0x2106   : > { %v5372_v53 = vadd.f32 %v7971_v51, %v5371_v52  ;;  %v8793_v54 = vpop.f32.mrb[69].mxu1  ;;  %v5629_v52 = vld [vmem:[%s11648_s18 + $0x8] sm:$0xff] }
0x2107   : > { %v5630_v54 = vld [vmem:[%s11648_s18 + $0x10] sm:$0xff] }
0x2108   : > { %v10847_v56 = vadd.f32 %v5372_v53, %v10498_v20 }
0x210a   : > { %v5390_v57 = vsel %vm1666_vm5, %v10847_v56, 0.0 }
0x210b   : > { %5391 = vadd.xlane.f32.xlu1 %v5390_v57  ;;  %v5631_v57 = vld [vmem:[%s11648_s18 + $0x18] sm:$0xff] }
0x210c   : > { %v5376_v59 = vpop.f32.mrb[70].mxu1 }
0x210d   : > { %v5377_v50 = vadd.f32 %v7971_v51, %v5376_v59  ;;  %v8796_v60 = vpop.f32.mrb[71].mxu1  ;;  %v9246_v59 = vpack.c.bf16 %v5631_v57, %v5630_v54 }
0x210e   : > { %v5633_v60 = vld [vmem:[%s11648_s18 + $0x28] sm:$0xff] }
0x210f   : > { %v10852_v55 = vadd.f32 %v5377_v50, %v10500_v21  ;;  %v5632_v50 = vld [vmem:[%s11648_s18 + $0x20] sm:$0xff] }
0x2111   : > { %v5381_v61 = vpop.f32.mrb[72].mxu1  ;;  %v5393_v62 = vsel %vm1666_vm5, %v10852_v55, 0.0 }
0x2112   : > { %v5382_v58 = vadd.f32 %v7971_v51, %v5381_v61  ;;  %5394 = vadd.xlane.f32.xlu0 %v5393_v62  ;;  %v8799_v0 = vpop.f32.mrb[73].mxu1  ;;  %v5628_v51 = vld [vmem:[%s11647_s11] sm:$0xff]  ;;  %v9249_v61 = vpack.c.bf16 %v5633_v60, %v5632_v50  ;;  %v5634_v62 = vld [vmem:[%s11648_s18 + $0x30] sm:$0xff]  ;;  %s11649_s11 = sld [smem:[#allocation42_spill]] }
0x2113   : > { %v9243_v53 = vpack.c.bf16 %v5629_v52, %v5628_v51 }
0x2114   : > { %v10857_v20 = vadd.f32 %v5382_v58, %v10502_v23  ;;  %v5635_v58 = vld [vmem:[%s11648_s18 + $0x38] sm:$0xff] }
0x2115   : > { %9244 = vmatpush3.bf16.msra.mxu1 %v9243_v53  ;;  %v9252_v0 = vpack.c.bf16 %v5635_v58, %v5634_v62 }
0x2116   : > { %v5396_v1 = vsel %vm4112_vm14, %v10857_v20, 0.0  ;;  %9245 = vmatprep.subr.bf16.mxu1 %v9829_v11 }
0x2117   : > { %5397 = vadd.xlane.f32.xlu0 %v5396_v1  ;;  %v5636_v1 = vld [vmem:[%s11648_s18 + $0x40] sm:$0xff] }
0x2118   : > { %s11650_s1 = smov %s11649_s11 }
0x2119   : > { %9247 = vmatpush3.bf16.msra.mxu1 %v9246_v59 }
0x211a   : > { %9248 = vmatprep.subr.bf16.mxu1 %v9829_v11 }
0x211d   : > { %9250 = vmatpush3.bf16.msra.mxu1 %v9249_v61 }
0x211e   : > { %9251 = vmatprep.subr.bf16.mxu1 %v9829_v11 }
0x2121   : > { %9253 = vmatpush3.bf16.msra.mxu1 %v9252_v0 }
0x2122   : > { %9254 = vmatprep.subr.bf16.mxu1 %v9829_v11 }
0x2198   : > { %v5392_v2 = vpop.xlane.xlu1 %5391 }
0x2199   : > { %v5399_v3 = vmul.f32 0.03125, %v5392_v2  ;;  %v5637_v2 = vld [vmem:[%s11648_s18 + $0x48] sm:$0xff] }
0x219b   : > { %v5402_v4 = vsub.f32 %v10847_v56, %v5399_v3  ;;  %v9255_v3 = vpack.c.bf16 %v5637_v2, %v5636_v1 }
0x219d   : > { %v5405_v21 = vmul.f32 %v5402_v4, %v5402_v4  ;;  %9256 = vmatpush3.bf16.msra.mxu1 %v9255_v3 }
0x219e   : > { %9257 = vmatprep.subr.bf16.mxu1 %v9829_v11 }
0x219f   : > { %v5395_v5 = vpop.xlane.xlu0 %5394  ;;  %v5408_v35 = vsel %vm1666_vm5, %v5405_v21, 0.0  ;;  %v5639_v21 = vld [vmem:[%s11648_s18 + $0x58] sm:$0xff] }
0x21a0   : > { %v5400_v63 = vmul.f32 0.03125, %v5395_v5  ;;  %5409 = vadd.xlane.f32.xlu1 %v5408_v35  ;;  %v5640_v35 = vld [vmem:[%s11648_s18 + $0x60] sm:$0xff] }
0x21a2   : > { %v5403_v23 = vsub.f32 %v10852_v55, %v5400_v63  ;;  %v5641_v63 = vld [vmem:[%s11648_s18 + $0x68] sm:$0xff] }
0x21a4   : > { %v5398_v19 = vpop.xlane.xlu0 %5397  ;;  %v5406_v9 = vmul.f32 %v5403_v23, %v5403_v23 }
0x21a5   : > { %v5401_v10 = vmul.f32 0.03125, %v5398_v19  ;;  %v5642_v19 = vld [vmem:[%s11648_s18 + $0x70] sm:$0xff] }
0x21a6   : > { %v5411_v13 = vsel %vm1666_vm5, %v5406_v9, 0.0  ;;  %v5643_v9 = vld [vmem:[%s11648_s18 + $0x78] sm:$0xff] }
0x21a7   : > { %v5404_v38 = vsub.f32 %v10857_v20, %v5401_v10  ;;  %5412 = vadd.xlane.f32.xlu0 %v5411_v13  ;;  %v9264_v10 = vpack.c.bf16 %v5643_v9, %v5642_v19  ;;  %v7977_v13 = vld [vmem:[%s11649_s11] ss:$0 sm:$0xff]  ;;  %s11651_s11 = sld [smem:[#allocation44_spill]] }
0x21a9   : > { %v5407_v32 = vmul.f32 %v5404_v38, %v5404_v38 }
0x21ab   : > { %v5414_v31 = vsel %vm4112_vm14, %v5407_v32, 0.0 }
0x21ac   : > { %5415 = vadd.xlane.f32.xlu1 %v5414_v31 }
0x21ad   : > { %s11652_s4 = smov %s11651_s11 }
0x222d   : > { %v5410_v18 = vpop.xlane.xlu1 %5409 }
0x222e   : > { %v5417_v24 = vmul.f32 0.03125, %v5410_v18 }
0x2230   : > { %v5420_v30 = vadd.f32 1e-05, %v5417_v24 }
0x2232   : > { %9624 = vrsqrt.f32 %v5420_v30 }
0x2234   : > { %v5413_v26 = vpop.xlane.xlu0 %5412 }
0x2235   : > { %v5418_v8 = vmul.f32 0.03125, %v5413_v26 }
0x2237   : > { %v5421_v27 = vadd.f32 1e-05, %v5418_v8 }
0x2239   : > { %9626 = vrsqrt.f32 %v5421_v27  ;;  %v5416_v28 = vpop.xlane.xlu1 %5415 }
0x223a   : > { %v5419_v33 = vmul.f32 0.03125, %v5416_v28 }
0x223c   : > { %v9625_v34 = vpop.eup %9624  ;;  %v5422_v42 = vadd.f32 1e-05, %v5419_v33 }
0x223d   : > { %v5426_v43 = vmul.f32 %v9625_v34, %v5402_v4  ;;  %v5638_v4 = vld [vmem:[%s11648_s18 + $0x50] sm:$0xff] }
0x223e   : > { %9628 = vrsqrt.f32 %v5422_v42  ;;  %v9258_v5 = vpack.c.bf16 %v5639_v21, %v5638_v4 }
0x223f   : > { %v5435_v44 = vmul.f32 %v7975_v40, %v5426_v43 }
0x2240   : > { %9259 = vmatpush3.bf16.msra.mxu1 %v9258_v5 }
0x2241   : > { %v5444_v37 = vadd.f32 %v7976_v29, %v5435_v44  ;;  %9260 = vmatprep.subr.bf16.mxu1 %v9829_v11 }
0x2243   : > { %v9627_v36 = vpop.eup %9626  ;;  %8809 = vmatmul.mubr.msk.f32.vlgmr.msra.gmra.mrb[42].mxu0 %vm1666_vm5, %v5444_v37 }
0x2244   : > { %8811 = vmatprep.mubr.msk.f32.mxu0 %vm9830_vm1, %v9831_v12  ;;  %v5427_v46 = vmul.f32 %v9627_v36, %v5403_v23  ;;  %v9261_v23 = vpack.c.bf16 %v5641_v63, %v5640_v35 }
0x2246   : > { %v5436_v47 = vmul.f32 %v7975_v40, %v5427_v46  ;;  %9262 = vmatpush3.bf16.msra.mxu1 %v9261_v23 }
0x2247   : > { %9263 = vmatprep.subr.bf16.mxu1 %v9829_v11 }
0x2248   : > { %v9629_v48 = vpop.eup %9628  ;;  %v5445_v45 = vadd.f32 %v7976_v29, %v5436_v47 }
0x2249   : > { %v5428_v16 = vmul.f32 %v9629_v48, %v5404_v38 }
0x224a   : > { %8812 = vmatmul.mubr.msk.f32.gmra.mrb[44].mxu0 %vm1666_vm5, %v5445_v45  ;;  %9265 = vmatpush3.bf16.msra.mxu1 %v9264_v10 }
0x224b   : > { %8814 = vmatprep.mubr.msk.f32.mxu0 %vm9830_vm1, %v9831_v12  ;;  %v5437_v49 = vmul.f32 %v7975_v40, %v5428_v16  ;;  %9276 = vmatprep.subr.bf16.mxu1 %v9829_v11 }
0x224d   : > { %v5446_v22 = vadd.f32 %v7976_v29, %v5437_v49 }
0x224f   : > { %8815 = vmatmul.mubr.msk.f32.gmra.mrb[46].mxu0 %vm1666_vm5, %v5446_v22 }
0x2250   : > { %8866 = vmatprep.mubr.msk.f32.mxu0 %vm9830_vm1, %v9831_v12 }
0x2316   : > { %v5533_v38 = vpop.f32.mrb[42].mxu0 }
0x2317   : > { %v10909_v32 = vadd.f32 %v7977_v13, %v5533_v38  ;;  %v8810_v31 = vpop.f32.mrb[43].mxu0 }
0x2319   : > { %v5550_v41 = vmul.f32 0.70710677, %v10909_v32 }
0x231b   : > { %v5559_v6 = vand.u32 2147483647, %v5550_v41  ;;  %vm5553_vm8 = vcmp.lt.f32.partialorder %v5550_v41, 0.0 }
0x231c   : > { %v5556_v38 = vsel %vm5553_vm8, -1.0, %v9840_v25 }
0x231d   : > { %v5562_v14 = vmul.f32 0.3275911, %v5559_v6  ;;  %v5538_v15 = vpop.f32.mrb[44].mxu0  ;;  %v5601_v40 = vsub.f32 0.0, %v5559_v6 }
0x231e   : > { %v10912_v17 = vadd.f32 %v7977_v13, %v5538_v15  ;;  %v8813_v7 = vpop.f32.mrb[45].mxu0 }
0x231f   : > { %v5565_v18 = vadd.f32 1.0, %v5562_v14  ;;  %v5604_v44 = vmul.f32 %v5601_v40, %v5559_v6 }
0x2320   : > { %v10915_v24 = vmul.f32 0.70710677, %v10912_v17 }
0x2321   : > { %9630 = vrcp.f32 %v5565_v18  ;;  %v5607_v48 = vmul.f32 1.442695, %v5604_v44  ;;  %v5547_v18 = vmul.f32 0.5, %v10909_v32  ;;  %v5548_v44 = vmul.f32 0.5, %v10912_v17 }
0x2322   : > { %v5560_v30 = vand.u32 2147483647, %v10915_v24  ;;  %v5543_v26 = vpop.f32.mrb[46].mxu0  ;;  %vm5554_vm9 = vcmp.lt.f32.partialorder %v10915_v24, 0.0 }
0x2323   : > { %v10918_v8 = vadd.f32 %v7977_v13, %v5543_v26  ;;  %v8816_v27 = vpop.f32.mrb[47].mxu0  ;;  %v5557_v40 = vsel %vm5554_vm9, -1.0, %v9840_v25 }
0x2324   : > { %v5563_v28 = vmul.f32 0.3275911, %v5560_v30  ;;  %v5602_v47 = vsub.f32 0.0, %v5560_v30 }
0x2325   : > { %v10921_v33 = vmul.f32 0.70710677, %v10918_v8 }
0x2326   : > { %v5566_v34 = vadd.f32 1.0, %v5563_v28  ;;  %v5605_v22 = vmul.f32 %v5602_v47, %v5560_v30 }
0x2327   : > { %v5561_v42 = vand.u32 2147483647, %v10921_v33  ;;  %vm5555_vm11 = vcmp.lt.f32.partialorder %v10921_v33, 0.0  ;;  %v7981_v33 = vld [vmem:[%s11651_s11] ss:$0 sm:$0xff] }
0x2328   : > { %9632 = vrcp.f32 %v5566_v34  ;;  %v5609_v59 = vmul.f32 1.442695, %v5605_v22 }
0x2329   : > { %v5564_v43 = vmul.f32 0.3275911, %v5561_v42  ;;  %v5603_v51 = vsub.f32 0.0, %v5561_v42 }
0x232b   : > { %v9631_v29 = vpop.eup %9630  ;;  %v5567_v37 = vadd.f32 1.0, %v5564_v43  ;;  %v5606_v60 = vmul.f32 %v5603_v51, %v5561_v42 }
0x232c   : > { %v5574_v36 = vmul.f32 1.0614054, %v9631_v29 }
0x232d   : > { %9634 = vrcp.f32 %v5567_v37  ;;  %v5611_v3 = vmul.f32 1.442695, %v5606_v60 }
0x232e   : > { %v5577_v46 = vadd.f32 -1.4531521, %v5574_v36  ;;  %9636 = vpow2.f32 %v5607_v48  ;;  %v5558_v36 = vsel %vm5555_vm11, -1.0, %v9840_v25  ;;  %v5549_v48 = vmul.f32 0.5, %v10918_v8 }
0x232f   : > { %9638 = vpow2.f32 %v5609_v59 }
0x2330   : > { %v5580_v45 = vmul.f32 %v9631_v29, %v5577_v46  ;;  %9640 = vpow2.f32 %v5611_v3 }
0x2332   : > { %v9633_v16 = vpop.eup %9632  ;;  %v5583_v49 = vadd.f32 1.4214138, %v5580_v45 }
0x2333   : > { %v5575_v52 = vmul.f32 1.0614054, %v9633_v16 }
0x2334   : > { %v5586_v53 = vmul.f32 %v9631_v29, %v5583_v49 }
0x2335   : > { %v5578_v54 = vadd.f32 -1.4531521, %v5575_v52 }
0x2336   : > { %v5589_v57 = vadd.f32 -0.28449672, %v5586_v53 }
0x2337   : > { %v9635_v50 = vpop.eup %9634  ;;  %v5581_v61 = vmul.f32 %v9633_v16, %v5578_v54 }
0x2338   : > { %v5592_v62 = vmul.f32 %v9631_v29, %v5589_v57  ;;  %v5576_v58 = vmul.f32 1.0614054, %v9635_v50  ;;  %v9637_v35 = vpop.eup %9636 }
0x2339   : > { %v5584_v0 = vadd.f32 1.4214138, %v5581_v61  ;;  %v9639_v7 = vpop.eup %9638 }
0x233a   : > { %v5595_v1 = vadd.f32 0.2548296, %v5592_v62  ;;  %v5579_v2 = vadd.f32 -1.4531521, %v5576_v58  ;;  %v9641_v43 = vpop.eup %9640 }
0x233b   : > { %v5587_v4 = vmul.f32 %v9633_v16, %v5584_v0 }
0x233c   : > { %v5598_v21 = vmul.f32 %v9631_v29, %v5595_v1  ;;  %v5582_v5 = vmul.f32 %v9635_v50, %v5579_v2 }
0x233d   : > { %v5590_v63 = vadd.f32 -0.28449672, %v5587_v4 }
0x233e   : > { %v5613_v23 = vmul.f32 %v9637_v35, %v5598_v21  ;;  %v5585_v19 = vadd.f32 1.4214138, %v5582_v5 }
0x233f   : > { %v5593_v9 = vmul.f32 %v9633_v16, %v5590_v63 }
0x2340   : > { %v5616_v10 = vsub.f32 1.0, %v5613_v23  ;;  %v5588_v13 = vmul.f32 %v9635_v50, %v5585_v19 }
0x2341   : > { %v5596_v31 = vadd.f32 0.2548296, %v5593_v9 }
0x2342   : > { %v5619_v6 = vmul.f32 %v5616_v10, %v5556_v38  ;;  %v5591_v14 = vadd.f32 -0.28449672, %v5588_v13  ;;  %v7986_v10 = vld [vmem:[%s11636_s5 + $0x20] sm:$0xff]  ;;  %v7987_v13 = vld [vmem:[%s11636_s5 + $0x28] sm:$0xff] }
0x2343   : > { %v5599_v15 = vmul.f32 %v9633_v16, %v5596_v31  ;;  %v9267_v38 = vpack.c.bf16 %v7987_v13, %v7986_v10  ;;  %v7988_v31 = vld [vmem:[%s11636_s5 + $0x30] sm:$0xff] }
0x2344   : > { %v5622_v30 = vadd.f32 1.0, %v5619_v6  ;;  %v5594_v26 = vmul.f32 %v9635_v50, %v5591_v14  ;;  %v7989_v6 = vld [vmem:[%s11636_s5 + $0x38] sm:$0xff] }
0x2345   : > { %v5614_v41 = vmul.f32 %v9639_v7, %v5599_v15  ;;  %9268 = vmatpush3.bf16.msra.mxu0 %v9267_v38  ;;  %v9270_v14 = vpack.c.bf16 %v7989_v6, %v7988_v31 }
0x2346   : > { %v5625_v27 = vmul.f32 %v5622_v30, %v5547_v18  ;;  %v5597_v28 = vadd.f32 0.2548296, %v5594_v26  ;;  %9269 = vmatprep.subr.bf16.mxu0 %v9829_v11 }
0x2347   : > { %v5617_v34 = vsub.f32 1.0, %v5614_v41 }
0x2348   : > { %8850 = vmatmul.mubr.f32.vlgmr.msra.gmra.mrb[74].mxu1 %v5625_v27  ;;  %v5600_v42 = vmul.f32 %v9635_v50, %v5597_v28 }
0x2349   : > { %8852 = vmatprep.mubr.msk.f32.mxu1 %vm9830_vm1, %v9831_v12  ;;  %v5620_v29 = vmul.f32 %v5617_v34, %v5557_v40  ;;  %9271 = vmatpush3.bf16.msra.mxu0 %v9270_v14  ;;  %v7984_v40 = vld [vmem:[%s11637_s9 + $0x1] ss:$0 sm:$0xff] }
0x234a   : > { %v5615_v32 = vmul.f32 %v9641_v43, %v5600_v42  ;;  %9272 = vmatprep.subr.bf16.mxu0 %v9829_v11 }
0x234b   : > { %v5623_v24 = vadd.f32 1.0, %v5620_v29  ;;  %v7985_v29 = vld [vmem:[%s11638_s8 + $0x1] ss:$0 sm:$0xff] }
0x234c   : > { %v5618_v37 = vsub.f32 1.0, %v5615_v32 }
0x234d   : > { %v5626_v46 = vmul.f32 %v5623_v24, %v5548_v44 }
0x234e   : > { %v5621_v47 = vmul.f32 %v5618_v37, %v5558_v36 }
0x234f   : > { %8853 = vmatmul.mubr.f32.gmra.mrb[76].mxu1 %v5626_v46 }
0x2350   : > { %8855 = vmatprep.mubr.msk.f32.mxu1 %vm9830_vm1, %v9831_v12  ;;  %v5624_v45 = vadd.f32 1.0, %v5621_v47 }
0x2352   : > { %v5627_v16 = vmul.f32 %v5624_v45, %v5549_v48 }
0x2354   : > { %8856 = vmatmul.mubr.f32.gmra.mrb[78].mxu1 %v5627_v16 }
0x2355   : > { %8896 = vmatprep.mubr.msk.f32.mxu1 %vm9830_vm1, %v9831_v12 }
0x241b   : > { %v5717_v17 = vpop.f32.mrb[74].mxu1 }
0x241c   : > { %v5718_v49 = vadd.f32 %v7981_v33, %v5717_v17  ;;  %v8851_v22 = vpop.f32.mrb[75].mxu1 }
0x241e   : > { %v10940_v51 = vadd.f32 %v5718_v49, %v10847_v56 }
0x2420   : > { %v5738_v52 = vsel %vm1666_vm5, %v10940_v51, 0.0 }
0x2421   : > { %5739 = vadd.xlane.f32.xlu0 %v5738_v52 }
0x2422   : > { %v5722_v8 = vpop.f32.mrb[76].mxu1 }
0x2423   : > { %v5723_v53 = vadd.f32 %v7981_v33, %v5722_v8  ;;  %v8854_v54 = vpop.f32.mrb[77].mxu1 }
0x2425   : > { %v10945_v57 = vadd.f32 %v5723_v53, %v10852_v55 }
0x2427   : > { %v5727_v59 = vpop.f32.mrb[78].mxu1  ;;  %v5741_v50 = vsel %vm1666_vm5, %v10945_v57, 0.0 }
0x2428   : > { %v5728_v60 = vadd.f32 %v7981_v33, %v5727_v59  ;;  %5742 = vadd.xlane.f32.xlu1 %v5741_v50  ;;  %v8857_v61 = vpop.f32.mrb[79].mxu1  ;;  %v7996_v33 = vld [vmem:[%s11639_s12 + $0x1] ss:$0 sm:$0xff] }
0x242a   : > { %v10950_v56 = vadd.f32 %v5728_v60, %v10857_v20 }
0x242c   : > { %v5744_v62 = vsel %vm4112_vm14, %v10950_v56, 0.0 }
0x242d   : > { %5745 = vadd.xlane.f32.xlu0 %v5744_v62 }
0x24ae   : > { %v5740_v58 = vpop.xlane.xlu0 %5739 }
0x24af   : > { %v5747_v0 = vmul.f32 0.03125, %v5740_v58 }
0x24b1   : > { %v5750_v1 = vsub.f32 %v10940_v51, %v5747_v0 }
0x24b3   : > { %v5753_v55 = vmul.f32 %v5750_v1, %v5750_v1 }
0x24b5   : > { %v5743_v2 = vpop.xlane.xlu1 %5742  ;;  %v5756_v3 = vsel %vm1666_vm5, %v5753_v55, 0.0 }
0x24b6   : > { %v5748_v4 = vmul.f32 0.03125, %v5743_v2  ;;  %5757 = vadd.xlane.f32.xlu1 %v5756_v3 }
0x24b8   : > { %v5751_v20 = vsub.f32 %v10945_v57, %v5748_v4 }
0x24ba   : > { %v5746_v21 = vpop.xlane.xlu0 %5745  ;;  %v5754_v5 = vmul.f32 %v5751_v20, %v5751_v20 }
0x24bb   : > { %v5749_v35 = vmul.f32 0.03125, %v5746_v21 }
0x24bc   : > { %v5759_v63 = vsel %vm1666_vm5, %v5754_v5, 0.0 }
0x24bd   : > { %v5752_v23 = vsub.f32 %v10950_v56, %v5749_v35  ;;  %5760 = vadd.xlane.f32.xlu0 %v5759_v63 }
0x24bf   : > { %v5755_v19 = vmul.f32 %v5752_v23, %v5752_v23 }
0x24c1   : > { %v5762_v9 = vsel %vm4112_vm14, %v5755_v19, 0.0 }
0x24c2   : > { %5763 = vadd.xlane.f32.xlu1 %v5762_v9 }
0x2543   : > { %v5758_v15 = vpop.xlane.xlu1 %5757 }
0x2544   : > { %v5765_v7 = vmul.f32 0.03125, %v5758_v15 }
0x2546   : > { %v5768_v18 = vadd.f32 1e-05, %v5765_v7 }
0x2548   : > { %9642 = vrsqrt.f32 %v5768_v18 }
0x254a   : > { %v5761_v30 = vpop.xlane.xlu0 %5760 }
0x254b   : > { %v5766_v26 = vmul.f32 0.03125, %v5761_v30 }
0x254d   : > { %v5769_v41 = vadd.f32 1e-05, %v5766_v26 }
0x254f   : > { %9644 = vrsqrt.f32 %v5769_v41  ;;  %v5764_v27 = vpop.xlane.xlu1 %5763 }
0x2550   : > { %v5767_v28 = vmul.f32 0.03125, %v5764_v27 }
0x2552   : > { %v9643_v34 = vpop.eup %9642  ;;  %v5770_v42 = vadd.f32 1e-05, %v5767_v28 }
0x2553   : > { %v5774_v43 = vmul.f32 %v9643_v34, %v5750_v1 }
0x2554   : > { %9646 = vrsqrt.f32 %v5770_v42 }
0x2555   : > { %v5783_v32 = vmul.f32 %v7984_v40, %v5774_v43 }
0x2557   : > { %v5792_v44 = vadd.f32 %v7985_v29, %v5783_v32 }
0x2559   : > { %v9645_v24 = vpop.eup %9644  ;;  %8867 = vmatmul.mubr.msk.f32.vlgmr.msra.gmra.mrb[48].mxu0 %vm1666_vm5, %v5792_v44 }
0x255a   : > { %8869 = vmatprep.mubr.msk.f32.mxu0 %vm9830_vm1, %v9831_v12  ;;  %v5775_v37 = vmul.f32 %v9645_v24, %v5751_v20 }
0x255c   : > { %v5784_v36 = vmul.f32 %v7984_v40, %v5775_v37 }
0x255e   : > { %v9647_v46 = vpop.eup %9646  ;;  %v5793_v47 = vadd.f32 %v7985_v29, %v5784_v36 }
0x255f   : > { %v5776_v48 = vmul.f32 %v9647_v46, %v5752_v23 }
0x2560   : > { %8870 = vmatmul.mubr.msk.f32.gmra.mrb[50].mxu0 %vm1666_vm5, %v5793_v47 }
0x2561   : > { %8872 = vmatprep.mubr.msk.f32.mxu0 %vm9830_vm1, %v9831_v12  ;;  %v5785_v45 = vmul.f32 %v7984_v40, %v5776_v48 }
0x2563   : > { %v5794_v16 = vadd.f32 %v7985_v29, %v5785_v45 }
0x2565   : > { %8873 = vmatmul.mubr.msk.f32.gmra.mrb[52].mxu0 %vm1666_vm5, %v5794_v16 }
0x2566   : > { %8881 = vmatprep.mubr.msk.f32.mxu0 %vm9830_vm1, %v9831_v12 }
0x262c   : > { %v5890_v17 = vpop.f32.mrb[48].mxu0 }
0x262d   : > { %v5891_v49 = vadd.f32 %v7996_v33, %v5890_v17  ;;  %v8868_v22 = vpop.f32.mrb[49].mxu0 }
0x262f   : > { %5907 = vrot.lane.b32.xlu0 %v5891_v49, %s11622_s17  ;;  %v5934_v10 = vmul.f32 0.35355338, %v5891_v49 }
0x2633   : > { %5916 = vrot.lane.b32.xlu0 %v5891_v49, %s11621_s14  ;;  %v5895_v52 = vpop.f32.mrb[50].mxu0 }
0x2634   : > { %v5896_v8 = vadd.f32 %v7996_v33, %v5895_v52  ;;  %v8871_v53 = vpop.f32.mrb[51].mxu0 }
0x2636   : > { %5909 = vrot.lane.b32.xlu1 %v5896_v8, %s11622_s17  ;;  %v10981_v54 = vpack.i.bf16 %v5896_v8, %v5891_v49  ;;  %v5935_v13 = vmul.f32 0.35355338, %v5896_v8 }
0x2637   : > { %5925 = vrot.lane.b32.xlu0 %v5891_v49, %s11623_s25 }
0x2638   : > { %v5900_v59 = vpop.f32.mrb[52].mxu0 }
0x2639   : > { %v10984_v50 = vadd.f32 %v7996_v33, %v5900_v59  ;;  %v8874_v60 = vpop.f32.mrb[53].mxu0 }
0x263a   : > { %5918 = vrot.lane.b32.xlu1 %v5896_v8, %s11621_s14 }
0x263b   : > { %5920 = vrot.lane.b32.xlu0 %v10984_v50, %s11621_s14  ;;  %v5936_v38 = vmul.f32 0.35355338, %v10984_v50  ;;  %s11656_s14 = sld [smem:[#allocation6_spill]] }
0x263e   : > { %5911 = vrot.lane.b32.xlu1 %v10984_v50, %s11622_s17  ;;  %s11653_s17 = sld [smem:[#allocation45_spill]] }
0x263f   : > { %9481 = vrot.lane.b32.xlu0 %v10981_v54, %s11624_s19 }
0x2642   : > { %5927 = vrot.lane.b32.xlu1 %v5896_v8, %s11623_s25 }
0x2643   : > { %5950 = vrot.lane.b32.xlu0 %v10984_v50, %s11624_s19 }
0x2646   : > { %5929 = vrot.lane.b32.xlu1 %v10984_v50, %s11623_s25  ;;  %s11654_s25 = sld [smem:[#allocation46_spill]] }
0x26a1   : > { %v5908_v61 = vpop.permute.xlu0 %5907 }
0x26a2   : > { %v5937_v40 = vmul.f32 0.35355338, %v5908_v61 }
0x26a5   : > { %v5917_v62 = vpop.permute.xlu0 %5916 }
0x26a6   : > { %v5940_v29 = vmul.f32 0.35355338, %v5917_v62 }
0x26a8   : > { %v5910_v58 = vpop.permute.xlu1 %5909 }
0x26a9   : > { %v10998_v0 = vpack.i.bf16 %v5910_v58, %v5908_v61  ;;  %v11000_v1 = vpop.permute.xlu0 %5925  ;;  %v5938_v32 = vmul.f32 0.35355338, %v5910_v58 }
0x26aa   : > { %v5943_v37 = vmul.f32 0.35355338, %v11000_v1 }
0x26ab   : > { %9486 = vrot.lane.b32.xlu1 %v10998_v0, %s11624_s19 }
0x26ac   : > { %v11004_v55 = vpop.permute.xlu1 %5918 }
0x26ad   : > { %v11007_v2 = vpack.i.bf16 %v11004_v55, %v5917_v62  ;;  %v11009_v3 = vpop.permute.xlu0 %5920  ;;  %v5941_v39 = vmul.f32 0.35355338, %v11004_v55 }
0x26ae   : > { %v5942_v36 = vmul.f32 0.35355338, %v11009_v3 }
0x26af   : > { %9491 = vrot.lane.b32.xlu0 %v11007_v2, %s11624_s19 }
0x26b0   : > { %v11013_v4 = vpop.permute.xlu1 %5911 }
0x26b1   : > { %v9482_v20 = vpop.permute.xlu0 %9481  ;;  %6051 = vrot.lane.b32.xlu1 %v11013_v4, %s11624_s19  ;;  %v5939_v44 = vmul.f32 0.35355338, %v11013_v4 }
0x26b2   : > { %v9484_v21 = vunpack.i.h.bf16 %v9482_v20  ;;  %v9483_v5 = vunpack.i.l.bf16 %v9482_v20 }
0x26b3   : > { %6152 = vrot.lane.b32.xlu0 %v11009_v3, %s11624_s19 }
0x26b4   : > { %v9273_v35 = vpack.c.bf16 %v9484_v21, %v9483_v5  ;;  %v11019_v63 = vpop.permute.xlu1 %5927 }
0x26b5   : > { %v11023_v23 = vpack.i.bf16 %v11019_v63, %v11000_v1  ;;  %v5951_v9 = vpop.permute.xlu0 %5950  ;;  %v5944_v46 = vmul.f32 0.35355338, %v11019_v63 }
0x26b6   : > { %9275 = vmatpush3.bf16.xpose.msk.msra.mxu0 %vm10580_vm15, %v9273_v35 }
0x26b7   : > { %9496 = vrot.lane.b32.xlu1 %v11023_v23, %s11624_s19  ;;  %8879 = vmatprep.subr.mxu0 %v9831_v12 }
0x26b8   : > { %v11030_v19 = vpop.permute.xlu1 %5929 }
0x26b9   : > { %v5945_v47 = vmul.f32 0.35355338, %v11030_v19 }
0x26bb   : > { %6253 = vrot.lane.b32.xlu1 %v11030_v19, %s11624_s19 }
0x26be   : > { %8880 = vmatpush3.xpose.msk.msra.mxu0 %vm1756_vm6, %v5951_v9 }
0x26bf   : > { %9280 = vmatprep.subr.bf16.mxu0 %v9829_v11 }
0x26c1   : > { %8882 = vmatmul.mubr.msk.f32.vlgmr.msra.gmra.mrb[54].mxu0 %vm1756_vm6, %v5934_v10 }
0x26c2   : > { %8884 = vmatprep.mubr.msk.f32.mxu0 %vm9830_vm1, %v9831_v12 }
0x26c5   : > { %8885 = vmatmul.mubr.msk.f32.gmra.mrb[56].mxu0 %vm1756_vm6, %v5935_v13 }
0x26c6   : > { %8887 = vmatprep.mubr.msk.f32.mxu0 %vm9830_vm1, %v9831_v12 }
0x26c9   : > { %8888 = vmatmul.mubr.msk.f32.gmra.mrb[58].mxu0 %vm1756_vm6, %v5936_v38 }
0x26ca   : > { %8911 = vmatprep.mubr.msk.f32.mxu0 %vm9830_vm1, %v9831_v12 }
0x271d   : > { %v9487_v31 = vpop.permute.xlu1 %9486 }
0x271e   : > { %v9489_v6 = vunpack.i.h.bf16 %v9487_v31  ;;  %v9488_v14 = vunpack.i.l.bf16 %v9487_v31 }
0x2720   : > { %v9277_v15 = vpack.c.bf16 %v9489_v6, %v9488_v14 }
0x2721   : > { %v9492_v7 = vpop.permute.xlu0 %9491 }
0x2722   : > { %v9494_v18 = vunpack.i.h.bf16 %v9492_v7  ;;  %v9493_v30 = vunpack.i.l.bf16 %v9492_v7  ;;  %9279 = vmatpush3.bf16.xpose.msk.msra.mxu1 %vm10580_vm15, %v9277_v15 }
0x2723   : > { %8894 = vmatprep.subr.mxu1 %v9831_v12  ;;  %v6052_v41 = vpop.permute.xlu1 %6051 }
0x2724   : > { %v9281_v26 = vpack.c.bf16 %v9494_v18, %v9493_v30 }
0x2725   : > { %v6153_v43 = vpop.permute.xlu0 %6152 }
0x2726   : > { %9283 = vmatpush3.bf16.xpose.msk.msra.mxu0 %vm10580_vm15, %v9281_v26 }
0x2727   : > { %8909 = vmatprep.subr.mxu0 %v9831_v12 }
0x2729   : > { %v9497_v27 = vpop.permute.xlu1 %9496 }
0x272a   : > { %v9499_v28 = vunpack.i.h.bf16 %v9497_v27  ;;  %v9498_v34 = vunpack.i.l.bf16 %v9497_v27  ;;  %8895 = vmatpush3.xpose.msk.msra.mxu1 %vm1756_vm6, %v6052_v41 }
0x272b   : > { %9284 = vmatprep.subr.bf16.mxu1 %v9829_v11 }
0x272c   : > { %v9285_v42 = vpack.c.bf16 %v9499_v28, %v9498_v34 }
0x272d   : > { %8897 = vmatmul.mubr.msk.f32.vlgmr.msra.gmra.mrb[80].mxu1 %vm1756_vm6, %v5937_v40  ;;  %v6254_v24 = vpop.permute.xlu1 %6253 }
0x272e   : > { %8910 = vmatpush3.xpose.msk.msra.mxu0 %vm1756_vm6, %v6153_v43  ;;  %9287 = vmatpush3.bf16.xpose.msk.msra.mxu1 %vm10580_vm15, %v9285_v42 }
0x272f   : > { %8899 = vmatprep.mubr.msk.f32.mxu1 %vm9830_vm1, %v9831_v12  ;;  %8924 = vmatprep.subr.mxu1 %v9831_v12 }
0x2730   : > { %9288 = vmatprep.subr.bf16.mxu0 %v9829_v11 }
0x2731   : > { %8900 = vmatmul.mubr.msk.f32.gmra.mrb[82].mxu1 %vm1756_vm6, %v5938_v32  ;;  %8912 = vmatmul.mubr.msk.f32.vlgmr.msra.gmra.mrb[60].mxu0 %vm1756_vm6, %v5940_v29 }
0x2732   : > { %8902 = vmatprep.mubr.msk.f32.mxu1 %vm9830_vm1, %v9831_v12  ;;  %8914 = vmatprep.mubr.msk.f32.mxu0 %vm9830_vm1, %v9831_v12 }
0x2735   : > { %8903 = vmatmul.mubr.msk.f32.gmra.mrb[84].mxu1 %vm1756_vm6, %v5939_v44  ;;  %8915 = vmatmul.mubr.msk.f32.gmra.mrb[62].mxu0 %vm1756_vm6, %v5941_v39 }
0x2736   : > { %8925 = vmatpush3.xpose.msk.msra.mxu1 %vm1756_vm6, %v6254_v24  ;;  %8917 = vmatprep.mubr.msk.f32.mxu0 %vm9830_vm1, %v9831_v12 }
0x2737   : > { %8926 = vmatprep.mubr.msk.f32.mxu1 %vm9830_vm1, %v9831_v12  ;;  %9291 = vmatprep.subr.bf16.mxu1 %v9829_v11 }
0x2739   : > { %8918 = vmatmul.mubr.msk.f32.gmra.mrb[64].mxu0 %vm1756_vm6, %v5942_v36  ;;  %8927 = vmatmul.mubr.msk.f32.vlgmr.msra.gmra.mrb[86].mxu1 %vm1756_vm6, %v5943_v37 }
0x273a   : > { %8929 = vmatprep.mubr.msk.f32.mxu1 %vm9830_vm1, %v9831_v12  ;;  %8941 = vmatprep.mubr.msk.f32.mxu0 %vm9830_vm1, %v9831_v12 }
0x273d   : > { %8930 = vmatmul.mubr.msk.f32.gmra.mrb[88].mxu1 %vm1756_vm6, %v5944_v46 }
0x273e   : > { %8932 = vmatprep.mubr.msk.f32.mxu1 %vm9830_vm1, %v9831_v12 }
0x2741   : > { %8933 = vmatmul.mubr.msk.f32.gmra.mrb[90].mxu1 %vm1756_vm6, %v5945_v47 }
0x2742   : > { %8956 = vmatprep.mubr.msk.f32.mxu1 %vm9830_vm1, %v9831_v12 }
0x2794   : > { %v6033_v48 = vpop.f32.mrb[54].mxu0 }
0x2795   : > { %v8883_v45 = vpop.f32.mrb[55].mxu0  ;;  %v6350_v16 = vsel %vm4715_vm4, %v6033_v48, -inf }
0x2796   : > { %6351 = vmax.xlane.f32.xlu0 %v6350_v16 }
0x2798   : > { %v6038_v33 = vpop.f32.mrb[56].mxu0 }
0x2799   : > { %v8886_v17 = vpop.f32.mrb[57].mxu0  ;;  %v6353_v49 = vsel %vm4715_vm4, %v6038_v33, -inf }
0x279a   : > { %6354 = vmax.xlane.f32.xlu0 %v6353_v49 }
0x279c   : > { %v6043_v22 = vpop.f32.mrb[58].mxu0 }
0x279d   : > { %v8889_v52 = vpop.f32.mrb[59].mxu0  ;;  %v6356_v8 = vsel %vm4722_vm7, %v6043_v22, -inf }
0x279e   : > { %6357 = vmax.xlane.f32.xlu1 %v6356_v8 }
0x2800   : > { %v11097_v53 = vpop.f32.mrb[80].mxu1 }
0x2801   : > { %v8898_v59 = vpop.f32.mrb[81].mxu1  ;;  %v6359_v60 = vsel %vm4715_vm4, %v11097_v53, -inf }
0x2802   : > { %6360 = vmax.xlane.f32.xlu1 %v6359_v60 }
0x2804   : > { %v11101_v61 = vpop.f32.mrb[82].mxu1  ;;  %v11103_v62 = vpop.f32.mrb[60].mxu0 }
0x2805   : > { %v8901_v58 = vpop.f32.mrb[83].mxu1  ;;  %v8913_v1 = vpop.f32.mrb[61].mxu0  ;;  %v6362_v55 = vsel %vm4715_vm4, %v11101_v61, -inf  ;;  %v6368_v20 = vsel %vm4715_vm4, %v11103_v62, -inf }
0x2806   : > { %6363 = vmax.xlane.f32.xlu0 %v6362_v55  ;;  %6369 = vmax.xlane.f32.xlu1 %v6368_v20 }
0x2808   : > { %v11109_v21 = vpop.f32.mrb[84].mxu1  ;;  %v11111_v5 = vpop.f32.mrb[62].mxu0 }
0x2809   : > { %v8904_v35 = vpop.f32.mrb[85].mxu1  ;;  %v8916_v63 = vpop.f32.mrb[63].mxu0  ;;  %v6365_v9 = vsel %vm4722_vm7, %v11109_v21, -inf  ;;  %v6371_v10 = vsel %vm4715_vm4, %v11111_v5, -inf }
0x280a   : > { %6366 = vmax.xlane.f32.xlu0 %v6365_v9  ;;  %6372 = vmax.xlane.f32.xlu1 %v6371_v10 }
0x280c   : > { %v11117_v13 = vpop.f32.mrb[64].mxu0  ;;  %v11119_v38 = vpop.f32.mrb[86].mxu1 }
0x280d   : > { %v8919_v31 = vpop.f32.mrb[65].mxu0  ;;  %v8928_v6 = vpop.f32.mrb[87].mxu1  ;;  %v6377_v14 = vsel %vm4715_vm4, %v11119_v38, -inf  ;;  %v6374_v15 = vsel %vm4722_vm7, %v11117_v13, -inf }
0x280e   : > { %6378 = vmax.xlane.f32.xlu0 %v6377_v14  ;;  %6375 = vmax.xlane.f32.xlu1 %v6374_v15 }
0x2810   : > { %v11125_v7 = vpop.f32.mrb[88].mxu1 }
0x2811   : > { %v8931_v18 = vpop.f32.mrb[89].mxu1  ;;  %v6380_v30 = vsel %vm4715_vm4, %v11125_v7, -inf }
0x2812   : > { %6381 = vmax.xlane.f32.xlu0 %v6380_v30 }
0x2814   : > { %v11129_v26 = vpop.f32.mrb[90].mxu1 }
0x2815   : > { %v8934_v41 = vpop.f32.mrb[91].mxu1  ;;  %v6383_v27 = vsel %vm4722_vm7, %v11129_v26, -inf }
0x2816   : > { %6384 = vmax.xlane.f32.xlu0 %v6383_v27 }
0x281f   : > { %9506 = vrot.lane.b32.xlu1 %v10998_v0, %s11625_s6 }
0x2823   : > { %6585 = vrot.lane.b32.xlu1 %v11013_v4, %s11625_s6  ;;  %v6352_v28 = vpop.xlane.xlu0 %6351 }
0x2824   : > { %v6386_v34 = vsub.f32 %v6033_v48, %v6352_v28 }
0x2826   : > { %v6398_v42 = vmul.f32 1.442695, %v6386_v34 }
0x2827   : > { %9516 = vrot.lane.b32.xlu1 %v11023_v23, %s11625_s6  ;;  %v6355_v40 = vpop.xlane.xlu0 %6354 }
0x2828   : > { %v6387_v0 = vsub.f32 %v6038_v33, %v6355_v40  ;;  %9648 = vpow2.f32 %v6398_v42 }
0x282a   : > { %v6400_v4 = vmul.f32 1.442695, %v6387_v0 }
0x282b   : > { %v6358_v43 = vpop.xlane.xlu1 %6357 }
0x282c   : > { %9501 = vrot.lane.b32.xlu0 %v10981_v54, %s11625_s6  ;;  %v6388_v29 = vsub.f32 %v6043_v22, %v6358_v43  ;;  %9650 = vpow2.f32 %v6400_v4 }
0x282e   : > { %v6402_v23 = vmul.f32 1.442695, %v6388_v29 }
0x2830   : > { %6486 = vrot.lane.b32.xlu0 %v10984_v50, %s11625_s6  ;;  %9652 = vpow2.f32 %v6402_v23 }
0x2832   : > { %v11145_v32 = vpop.eup %9648 }
0x2833   : > { %v6422_v54 = vsel %vm4715_vm4, %v11145_v32, 0.0 }
0x2834   : > { %9511 = vrot.lane.b32.xlu0 %v11007_v2, %s11625_s6 }
0x2836   : > { %v11149_v50 = vpop.eup %9650 }
0x2837   : > { %v6425_v2 = vsel %vm4715_vm4, %v11149_v50, 0.0 }
0x283a   : > { %v11153_v39 = vpop.eup %9652 }
0x283b   : > { %v6428_v44 = vsel %vm4722_vm7, %v11153_v39, 0.0 }
0x284b   : > { %6423 = vadd.xlane.f32.xlu1 %v6422_v54 }
0x284f   : > { %6426 = vadd.xlane.f32.xlu1 %v6425_v2 }
0x2853   : > { %6429 = vadd.xlane.f32.xlu1 %v6428_v44 }
0x288f   : > { %v6361_v24 = vpop.xlane.xlu1 %6360 }
0x2890   : > { %v6389_v37 = vsub.f32 %v11097_v53, %v6361_v24 }
0x2892   : > { %v6404_v36 = vmul.f32 1.442695, %v6389_v37 }
0x2893   : > { %v6364_v46 = vpop.xlane.xlu0 %6363  ;;  %v6370_v47 = vpop.xlane.xlu1 %6369 }
0x2894   : > { %9654 = vpow2.f32 %v6404_v36  ;;  %v6390_v48 = vsub.f32 %v11101_v61, %v6364_v46  ;;  %v6392_v45 = vsub.f32 %v11103_v62, %v6370_v47 }
0x2896   : > { %v6406_v16 = vmul.f32 1.442695, %v6390_v48  ;;  %v6410_v33 = vmul.f32 1.442695, %v6392_v45 }
0x2897   : > { %v6367_v17 = vpop.xlane.xlu0 %6366  ;;  %v6373_v49 = vpop.xlane.xlu1 %6372 }
0x2898   : > { %9656 = vpow2.f32 %v6406_v16  ;;  %v6391_v22 = vsub.f32 %v11109_v21, %v6367_v17  ;;  %v6393_v52 = vsub.f32 %v11111_v5, %v6373_v49 }
0x2899   : > { %9658 = vpow2.f32 %v6410_v33 }
0x289a   : > { %v6408_v8 = vmul.f32 1.442695, %v6391_v22  ;;  %v6412_v53 = vmul.f32 1.442695, %v6393_v52 }
0x289b   : > { %v6379_v59 = vpop.xlane.xlu0 %6378  ;;  %v6376_v60 = vpop.xlane.xlu1 %6375 }
0x289c   : > { %9660 = vpow2.f32 %v6408_v8  ;;  %v6395_v58 = vsub.f32 %v11119_v38, %v6379_v59  ;;  %v6394_v61 = vsub.f32 %v11117_v13, %v6376_v60 }
0x289d   : > { %9662 = vpow2.f32 %v6412_v53 }
0x289e   : > { %v11164_v62 = vpop.eup %9654  ;;  %v6416_v1 = vmul.f32 1.442695, %v6395_v58  ;;  %v6414_v55 = vmul.f32 1.442695, %v6394_v61 }
0x289f   : > { %v6382_v20 = vpop.xlane.xlu0 %6381  ;;  %v9507_v35 = vpop.permute.xlu1 %9506  ;;  %v6431_v21 = vsel %vm4715_vm4, %v11164_v62, 0.0 }
0x28a0   : > { %9664 = vpow2.f32 %v6416_v1  ;;  %v6396_v5 = vsub.f32 %v11125_v7, %v6382_v20  ;;  %v9509_v63 = vunpack.i.h.bf16 %v9507_v35  ;;  %v9508_v9 = vunpack.i.l.bf16 %v9507_v35  ;;  %6432 = vadd.xlane.f32.xlu0 %v6431_v21 }
0x28a1   : > { %9666 = vpow2.f32 %v6414_v55 }
0x28a2   : > { %v11169_v10 = vpop.eup %9656  ;;  %v6418_v13 = vmul.f32 1.442695, %v6396_v5  ;;  %v9292_v38 = vpack.c.bf16 %v9509_v63, %v9508_v9 }
0x28a3   : > { %v11171_v31 = vpop.eup %9658  ;;  %v6385_v6 = vpop.xlane.xlu0 %6384  ;;  %v6434_v14 = vsel %vm4715_vm4, %v11169_v10, 0.0 }
0x28a4   : > { %9668 = vpow2.f32 %v6418_v13  ;;  %v6397_v15 = vsub.f32 %v11129_v26, %v6385_v6  ;;  %6435 = vadd.xlane.f32.xlu0 %v6434_v14  ;;  %v6440_v7 = vsel %vm4715_vm4, %v11171_v31, 0.0  ;;  %9293 = vmatpush3.bf16.msra.mxu1 %v9292_v38  ;;  %v6586_v27 = vpop.permute.xlu1 %6585 }
0x28a5   : > { %6441 = vadd.xlane.f32.xlu1 %v6440_v7  ;;  %8954 = vmatprep.subr.mxu1 %v9831_v12 }
0x28a6   : > { %v11179_v18 = vpop.eup %9660  ;;  %v6420_v30 = vmul.f32 1.442695, %v6397_v15 }
0x28a7   : > { %v11181_v41 = vpop.eup %9662  ;;  %v9502_v28 = vpop.permute.xlu0 %9501  ;;  %v6437_v34 = vsel %vm4722_vm7, %v11179_v18, 0.0 }
0x28a8   : > { %9670 = vpow2.f32 %v6420_v30  ;;  %v9504_v26 = vunpack.i.h.bf16 %v9502_v28  ;;  %v9503_v40 = vunpack.i.l.bf16 %v9502_v28  ;;  %6438 = vadd.xlane.f32.xlu0 %v6437_v34  ;;  %8955 = vmatpush3.msk.msra.mxu1 %vm1617_vm3, %v6586_v27  ;;  %v6443_v42 = vsel %vm4715_vm4, %v11181_v41, 0.0  ;;  %v9517_v36 = vpop.permute.xlu1 %9516 }
0x28a9   : > { %9297 = vmatprep.subr.bf16.mxu1 %v9829_v11  ;;  %6444 = vadd.xlane.f32.xlu1 %v6443_v42  ;;  %v9519_v60 = vunpack.i.h.bf16 %v9517_v36  ;;  %v9518_v58 = vunpack.i.l.bf16 %v9517_v36  ;;  %v7994_v36 = vld [vmem:[%s11642_s20 + $0x38] sm:$0xff] }
0x28aa   : > { %v11189_v0 = vpop.eup %9664  ;;  %v9289_v43 = vpack.c.bf16 %v9504_v26, %v9503_v40 }
0x28ab   : > { %v11191_v4 = vpop.eup %9666  ;;  %v6449_v29 = vsel %vm4715_vm4, %v11189_v0, 0.0  ;;  %v6487_v2 = vpop.permute.xlu0 %6486  ;;  %v9298_v20 = vpack.c.bf16 %v9519_v60, %v9518_v58 }
0x28ac   : > { %9290 = vmatpush3.bf16.msra.mxu0 %v9289_v43  ;;  %6450 = vadd.xlane.f32.xlu0 %v6449_v29  ;;  %v6446_v23 = vsel %vm4722_vm7, %v11191_v4, 0.0 }
0x28ad   : > { %8939 = vmatprep.subr.mxu0 %v9831_v12  ;;  %6447 = vadd.xlane.f32.xlu1 %v6446_v23  ;;  %v7991_v23 = vld [vmem:[%s11642_s20 + $0x20] sm:$0xff] }
0x28ae   : > { %v11198_v54 = vpop.eup %9668 }
0x28af   : > { %v6452_v44 = vsel %vm4715_vm4, %v11198_v54, 0.0  ;;  %v9512_v48 = vpop.permute.xlu0 %9511 }
0x28b0   : > { %8940 = vmatpush3.msk.msra.mxu0 %vm1617_vm3, %v6487_v2  ;;  %6453 = vadd.xlane.f32.xlu0 %v6452_v44  ;;  %v9514_v16 = vunpack.i.h.bf16 %v9512_v48  ;;  %v9513_v33 = vunpack.i.l.bf16 %v9512_v48 }
0x28b1   : > { %9294 = vmatprep.subr.bf16.mxu0 %v9829_v11 }
0x28b2   : > { %v11204_v24 = vpop.eup %9670  ;;  %v9295_v22 = vpack.c.bf16 %v9514_v16, %v9513_v33 }
0x28b3   : > { %v6455_v37 = vsel %vm4722_vm7, %v11204_v24, 0.0 }
0x28b4   : > { %6456 = vadd.xlane.f32.xlu1 %v6455_v37  ;;  %v7993_v37 = vld [vmem:[%s11642_s20 + $0x30] sm:$0xff] }
0x28c5   : > { %6783 = vrot.lane.b32.xlu1 %v11030_v19, %s11625_s6 }
0x28c6   : > { %6684 = vrot.lane.b32.xlu0 %v11009_v3, %s11625_s6  ;;  %s1400_s6 = sand.u32 1, %s9774_s10  }
0x28c7   : > { %s7814_s11 = sshll.u32 %s1400_s6, 4 }
0x28d8   : > { %v6424_v46 = vpop.xlane.xlu1 %6423 }
0x28d9   : > { %9672 = vrcp.f32 %v6424_v46  ;;  %v9304_v46 = vpack.c.bf16 %v7994_v36, %v7993_v37 }
0x28dc   : > { %v6427_v47 = vpop.xlane.xlu1 %6426 }
0x28dd   : > { %9674 = vrcp.f32 %v6427_v47 }
0x28e0   : > { %v6430_v45 = vpop.xlane.xlu1 %6429 }
0x28e1   : > { %9676 = vrcp.f32 %v6430_v45 }
0x28e3   : > { %v9673_v17 = vpop.eup %9672 }
0x28e4   : > { %v6470_v49 = vmul.f32 %v9673_v17, %v11145_v32 }
0x28e6   : > { %8942 = vmatmul.mubr.msk.f32.vlgmr.msra.gmra.mrb[66].mxu0 %vm4715_vm4, %v6470_v49 }
0x28e7   : > { %v9675_v19 = vpop.eup %9674  ;;  %9296 = vmatpush3.bf16.msra.mxu0 %v9295_v22  ;;  %8944 = vmatprep.mubr.msk.f32.mxu0 %vm9830_vm1, %v9831_v12 }
0x28e8   : > { %v6471_v3 = vmul.f32 %v9675_v19, %v11149_v50  ;;  %8969 = vmatprep.subr.mxu0 %v9831_v12 }
0x28ea   : > { %8945 = vmatmul.mubr.msk.f32.gmra.mrb[68].mxu0 %vm4715_vm4, %v6471_v3 }
0x28eb   : > { %v9677_v52 = vpop.eup %9676  ;;  %8947 = vmatprep.mubr.msk.f32.mxu0 %vm9830_vm1, %v9831_v12 }
0x28ec   : > { %v6472_v32 = vmul.f32 %v9677_v52, %v11153_v39 }
0x28ee   : > { %8948 = vmatmul.mubr.msk.f32.gmra.mrb[70].mxu0 %vm4715_vm4, %v6472_v32 }
0x28ef   : > { %8971 = vmatprep.mubr.msk.f32.mxu0 %vm9830_vm1, %v9831_v12 }
0x292d   : > { %v6433_v8 = vpop.xlane.xlu0 %6432 }
0x292e   : > { %9678 = vrcp.f32 %v6433_v8 }
0x2931   : > { %v6436_v53 = vpop.xlane.xlu0 %6435 }
0x2932   : > { %9680 = vrcp.f32 %v6436_v53  ;;  %v6442_v50 = vpop.xlane.xlu1 %6441 }
0x2933   : > { %9682 = vrcp.f32 %v6442_v50 }
0x2935   : > { %v6439_v59 = vpop.xlane.xlu0 %6438 }
0x2936   : > { %9684 = vrcp.f32 %v6439_v59  ;;  %v6445_v61 = vpop.xlane.xlu1 %6444 }
0x2937   : > { %9686 = vrcp.f32 %v6445_v61 }
0x2938   : > { %v9679_v1 = vpop.eup %9678 }
0x2939   : > { %v6473_v39 = vmul.f32 %v9679_v1, %v11164_v62  ;;  %v6451_v55 = vpop.xlane.xlu0 %6450 }
0x293a   : > { %9688 = vrcp.f32 %v6451_v55  ;;  %v6448_v35 = vpop.xlane.xlu1 %6447 }
0x293b   : > { %8957 = vmatmul.mubr.msk.f32.vlgmr.msra.gmra.mrb[92].mxu1 %vm4715_vm4, %v6473_v39  ;;  %9690 = vrcp.f32 %v6448_v35 }
0x293c   : > { %v9681_v21 = vpop.eup %9680  ;;  %9299 = vmatpush3.bf16.msra.mxu1 %v9298_v20  ;;  %8959 = vmatprep.mubr.msk.f32.mxu1 %vm9830_vm1, %v9831_v12 }
0x293d   : > { %v6454_v5 = vpop.xlane.xlu0 %6453  ;;  %v6474_v63 = vmul.f32 %v9681_v21, %v11169_v10  ;;  %8984 = vmatprep.subr.mxu1 %v9831_v12  ;;  %v9683_v9 = vpop.eup %9682 }
0x293e   : > { %9692 = vrcp.f32 %v6454_v5  ;;  %v6476_v13 = vmul.f32 %v9683_v9, %v11171_v31 }
0x293f   : > { %8960 = vmatmul.mubr.msk.f32.gmra.mrb[94].mxu1 %vm4715_vm4, %v6474_v63 }
0x2940   : > { %v9685_v62 = vpop.eup %9684  ;;  %8962 = vmatprep.mubr.msk.f32.mxu1 %vm9830_vm1, %v9831_v12 }
0x2941   : > { %v6685_v38 = vpop.permute.xlu0 %6684  ;;  %v6457_v6 = vpop.xlane.xlu1 %6456  ;;  %v6475_v14 = vmul.f32 %v9685_v62, %v11179_v18 }
0x2942   : > { %v9687_v15 = vpop.eup %9686  ;;  %9694 = vrcp.f32 %v6457_v6  ;;  %8970 = vmatpush3.msk.msra.mxu0 %vm1617_vm3, %v6685_v38 }
0x2943   : > { %8963 = vmatmul.mubr.msk.f32.gmra.mrb[96].mxu1 %vm4715_vm4, %v6475_v14  ;;  %8972 = vmatmul.mubr.msk.f32.vlgmr.msra.gmra.mrb[72].mxu0 %vm4715_vm4, %v6476_v13  ;;  %v6477_v18 = vmul.f32 %v9687_v15, %v11181_v41 }
0x2944   : > { %v9689_v10 = vpop.eup %9688  ;;  %8974 = vmatprep.mubr.msk.f32.mxu0 %vm9830_vm1, %v9831_v12  ;;  %8986 = vmatprep.mubr.msk.f32.mxu1 %vm9830_vm1, %v9831_v12 }
0x2945   : > { %v6479_v31 = vmul.f32 %v9689_v10, %v11189_v0  ;;  %v6784_v7 = vpop.permute.xlu1 %6783  ;;  %9300 = vmatprep.subr.bf16.mxu0 %v9829_v11  ;;  %v9691_v30 = vpop.eup %9690  ;;  %v8040_v10 = vld [vmem:[%s11643_s22 + $0x1] ss:$0 sm:$0xff] }
0x2946   : > { %8985 = vmatpush3.msk.msra.mxu1 %vm1617_vm3, %v6784_v7  ;;  %v6478_v28 = vmul.f32 %v9691_v30, %v11191_v4 }
0x2947   : > { %8975 = vmatmul.mubr.msk.f32.gmra.mrb[74].mxu0 %vm4715_vm4, %v6477_v18  ;;  %8987 = vmatmul.mubr.msk.f32.vlgmr.msra.gmra.mrb[98].mxu1 %vm4715_vm4, %v6479_v31 }
0x2948   : > { %v9693_v27 = vpop.eup %9692  ;;  %8977 = vmatprep.mubr.msk.f32.mxu0 %vm9830_vm1, %v9831_v12  ;;  %8989 = vmatprep.mubr.msk.f32.mxu1 %vm9830_vm1, %v9831_v12 }
0x2949   : > { %v6480_v41 = vmul.f32 %v9693_v27, %v11198_v54  ;;  %9306 = vmatprep.subr.bf16.mxu1 %v9829_v11  ;;  %v7992_v54 = vld [vmem:[%s11642_s20 + $0x28] sm:$0xff] }
0x294a   : > { %v9301_v2 = vpack.c.bf16 %v7992_v54, %v7991_v23 }
0x294b   : > { %8978 = vmatmul.mubr.msk.f32.gmra.mrb[76].mxu0 %vm4715_vm4, %v6478_v28  ;;  %8990 = vmatmul.mubr.msk.f32.gmra.mrb[100].mxu1 %vm4715_vm4, %v6480_v41 }
0x294c   : > { %v9695_v34 = vpop.eup %9694  ;;  %8992 = vmatprep.mubr.msk.f32.mxu1 %vm9830_vm1, %v9831_v12  ;;  %9003 = vmatprep.mubr.msk.f32.mxu0 %vm9830_vm1, %v9831_v12 }
0x294d   : > { %v6481_v26 = vmul.f32 %v9695_v34, %v11204_v24  ;;  %9302 = vmatpush3.bf16.msra.mxu0 %v9301_v2 }
0x294e   : > { %9303 = vmatprep.subr.bf16.mxu0 %v9829_v11 }
0x294f   : > { %8993 = vmatmul.mubr.msk.f32.gmra.mrb[102].mxu1 %vm4715_vm4, %v6481_v26 }
0x2950   : > { %9020 = vmatprep.mubr.msk.f32.mxu1 %vm9830_vm1, %v9831_v12 }
0x2951   : > { %9305 = vmatpush3.bf16.msra.mxu0 %v9304_v46 }
0x2952   : > { %9312 = vmatprep.subr.bf16.mxu0 %v9829_v11 }
0x29b9   : > { %v6567_v40 = vpop.f32.mrb[66].mxu0 }
0x29ba   : > { %v8943_v42 = vpop.f32.mrb[67].mxu0 }
0x29bd   : > { %v6572_v0 = vpop.f32.mrb[68].mxu0 }
0x29be   : > { %v8946_v43 = vpop.f32.mrb[69].mxu0 }
0x29c1   : > { %v6577_v4 = vpop.f32.mrb[70].mxu0 }
0x29c2   : > { %v8949_v29 = vpop.f32.mrb[71].mxu0 }
0x2a0e   : > { %v6666_v44 = vpop.f32.mrb[92].mxu1 }
0x2a0f   : > { %6881 = vrot.lane.b32.xlu0 %v6666_v44, %s11626_s24  ;;  %v8958_v24 = vpop.f32.mrb[93].mxu1 }
0x2a12   : > { %v6671_v47 = vpop.f32.mrb[94].mxu1 }
0x2a13   : > { %v8961_v48 = vpop.f32.mrb[95].mxu1 }
0x2a16   : > { %v6676_v45 = vpop.f32.mrb[96].mxu1  ;;  %v6765_v16 = vpop.f32.mrb[72].mxu0 }
0x2a17   : > { %v8964_v33 = vpop.f32.mrb[97].mxu1  ;;  %6893 = vrot.lane.b32.xlu1 %v6765_v16, %s11627_s29  ;;  %v8973_v17 = vpop.f32.mrb[73].mxu0 }
0x2a18   : > { %v8048_v33 = vld [vmem:[%s11644_s3 + $0x20] sm:$0xff]  ;;  %v8049_v17 = vld [vmem:[%s11644_s3 + $0x28] sm:$0xff] }
0x2a1a   : > { %v6770_v49 = vpop.f32.mrb[74].mxu0  ;;  %v6864_v22 = vpop.f32.mrb[98].mxu1 }
0x2a1b   : > { %v8988_v19 = vpop.f32.mrb[99].mxu1  ;;  %6883 = vrot.lane.b32.xlu1 %v6671_v47, %s11626_s24  ;;  %6895 = vrot.lane.b32.xlu0 %v6770_v49, %s11627_s29  ;;  %v8976_v3 = vpop.f32.mrb[75].mxu0  ;;  %v9307_v49 = vpack.c.bf16 %v8049_v17, %v8048_v33 }
0x2a1c   : > { %v8051_v19 = vld [vmem:[%s11644_s3 + $0x38] sm:$0xff] }
0x2a1d   : > { %9308 = vmatpush3.bf16.msra.mxu1 %v9307_v49 }
0x2a1e   : > { %v6775_v52 = vpop.f32.mrb[76].mxu0  ;;  %v6869_v32 = vpop.f32.mrb[100].mxu1  ;;  %9309 = vmatprep.subr.bf16.mxu1 %v9829_v11 }
0x2a1f   : > { %v8991_v8 = vpop.f32.mrb[101].mxu1  ;;  %6907 = vrot.lane.b32.xlu1 %v6869_v32, %s11628_s30  ;;  %6905 = vrot.lane.b32.xlu0 %v6864_v22, %s11628_s30  ;;  %v8979_v53 = vpop.f32.mrb[77].mxu0  ;;  %v8050_v22 = vld [vmem:[%s11644_s3 + $0x30] sm:$0xff] }
0x2a20   : > { %v9310_v3 = vpack.c.bf16 %v8051_v19, %v8050_v22 }
0x2a22   : > { %v6874_v50 = vpop.f32.mrb[102].mxu1  ;;  %9311 = vmatpush3.bf16.msra.mxu1 %v9310_v3 }
0x2a23   : > { %v8994_v59 = vpop.f32.mrb[103].mxu1  ;;  %6885 = vrot.lane.b32.xlu0 %v6676_v45, %s11626_s24  ;;  %6897 = vrot.lane.b32.xlu1 %v6775_v52, %s11627_s29  ;;  %s11655_s29 = sld [smem:[#allocation7_spill]] }
0x2a24   : > { %9336 = vmatprep.subr.bf16.mxu1 %v9829_v11 }
0x2a27   : > { %6909 = vrot.lane.b32.xlu0 %v6874_v50, %s11628_s30  ;;  %s1417_s30 = scalar_lea.vmem %s11656_s14, %s10138_s16 }
0x2a29   : > { %s1422_s19 = scalar_lea.vmem %s11655_s29, %s10138_s16  ;;  %s11433_s16 = scalar_lea.vmem [#allocation2], %s7814_s11 }
0x2a2a   : > { %s8090_s29 = sshll.u32 %s10100_s0, 8  ;;  %s9842_s11 = smov [#allocation2]  }
0x2a2b   : > { %s11446_s14 = scalar_lea.hbm %s10072_s21, %s8090_s29 }
0x2a81   : > { %v6882_v60 = vpop.permute.xlu0 %6881 }
0x2a82   : > { %v6914_v39 = vsel %vm1756_vm6, %v6567_v40, %v6882_v60 }
0x2a89   : > { %v6894_v58 = vpop.permute.xlu1 %6893 }
0x2a8a   : > { %v6917_v55 = vsel %vm1537_vm2, %v6914_v39, %v6894_v58  ;;  %v8046_v39 = vld [vmem:[%s11645_s23 + $0x1] ss:$0 sm:$0xff] }
0x2a8d   : > { %v6884_v61 = vpop.permute.xlu1 %6883  ;;  %v6896_v1 = vpop.permute.xlu0 %6895 }
0x2a8e   : > { %v6915_v21 = vsel %vm1756_vm6, %v6572_v0, %v6884_v61 }
0x2a8f   : > { %v6918_v63 = vsel %vm1537_vm2, %v6915_v21, %v6896_v1 }
0x2a91   : > { %v6908_v20 = vpop.permute.xlu1 %6907  ;;  %v6906_v35 = vpop.permute.xlu0 %6905 }
0x2a92   : > { %v6920_v5 = vsel %vm2432_vm10, %v6917_v55, %v6906_v35  ;;  %v6921_v62 = vsel %vm2432_vm10, %v6918_v63, %v6908_v20  ;;  %v8047_v20 = vld [vmem:[%s11646_s26 + $0x1] ss:$0 sm:$0xff] }
0x2a93   : > { %9004 = vmatmul.mubr.msk.f32.vlgmr.msra.gmra.mrb[78].mxu0 %vm1666_vm5, %v6920_v5 }
0x2a94   : > { %9006 = vmatprep.mubr.msk.f32.mxu0 %vm9830_vm1, %v9831_v12 }
0x2a95   : > { %v6886_v9 = vpop.permute.xlu0 %6885  ;;  %v6898_v38 = vpop.permute.xlu1 %6897 }
0x2a96   : > { %v6916_v13 = vsel %vm1756_vm6, %v6577_v4, %v6886_v9 }
0x2a97   : > { %9007 = vmatmul.mubr.msk.f32.gmra.mrb[80].mxu0 %vm1666_vm5, %v6921_v62  ;;  %v6919_v6 = vsel %vm1537_vm2, %v6916_v13, %v6898_v38 }
0x2a98   : > { %9009 = vmatprep.mubr.msk.f32.mxu0 %vm9830_vm1, %v9831_v12 }
0x2a99   : > { %v6910_v14 = vpop.permute.xlu0 %6909 }
0x2a9a   : > { %v6922_v15 = vsel %vm2432_vm10, %v6919_v6, %v6910_v14 }
0x2a9b   : > { %9010 = vmatmul.mubr.msk.f32.gmra.mrb[82].mxu0 %vm1666_vm5, %v6922_v15  ;;  %v8057_v15 = vld [vmem:[%s11648_s18 + $0x80] sm:$0xff] }
0x2a9c   : > { %9061 = vmatprep.mubr.msk.f32.mxu0 %vm9830_vm1, %v9831_v12 }
0x2b66   : > { %v7004_v31 = vpop.f32.mrb[78].mxu0 }
0x2b67   : > { %v7005_v7 = vadd.f32 %v8040_v10, %v7004_v31  ;;  %v9005_v18 = vpop.f32.mrb[79].mxu0 }
0x2b68   : > { %v8060_v18 = vld [vmem:[%s11648_s18 + $0x98] sm:$0xff] }
0x2b69   : > { %v11301_v30 = vadd.f32 %v7005_v7, %v10940_v51  ;;  %v8059_v7 = vld [vmem:[%s11648_s18 + $0x90] sm:$0xff] }
0x2b6a   : > { %v7009_v27 = vpop.f32.mrb[80].mxu0 }
0x2b6b   : > { %v7010_v28 = vadd.f32 %v8040_v10, %v7009_v27  ;;  %v9008_v41 = vpop.f32.mrb[81].mxu0  ;;  %v7025_v34 = vsel %vm1666_vm5, %v11301_v30, 0.0  ;;  %v9316_v27 = vpack.c.bf16 %v8060_v18, %v8059_v7 }
0x2b6c   : > { %7026 = vadd.xlane.f32.xlu1 %v7025_v34  ;;  %v8062_v41 = vld [vmem:[%s11648_s18 + $0xa8] sm:$0xff] }
0x2b6d   : > { %v11306_v26 = vadd.f32 %v7010_v28, %v10945_v57  ;;  %v8061_v28 = vld [vmem:[%s11648_s18 + $0xa0] sm:$0xff] }
0x2b6e   : > { %v7014_v40 = vpop.f32.mrb[82].mxu0  ;;  %v9319_v34 = vpack.c.bf16 %v8062_v41, %v8061_v28 }
0x2b6f   : > { %v7015_v42 = vadd.f32 %v8040_v10, %v7014_v40  ;;  %v9011_v0 = vpop.f32.mrb[83].mxu0  ;;  %v7028_v43 = vsel %vm1666_vm5, %v11306_v26, 0.0  ;;  %v8058_v10 = vld [vmem:[%s11648_s18 + $0x88] sm:$0xff]  ;;  %v8063_v40 = vld [vmem:[%s11648_s18 + $0xb0] sm:$0xff] }
0x2b70   : > { %7029 = vadd.xlane.f32.xlu0 %v7028_v43  ;;  %v9313_v31 = vpack.c.bf16 %v8058_v10, %v8057_v15  ;;  %v8065_v43 = vld [vmem:[%s11648_s18 + $0xc0] sm:$0xff] }
0x2b71   : > { %v11311_v51 = vadd.f32 %v7015_v42, %v10950_v56  ;;  %v8064_v42 = vld [vmem:[%s11648_s18 + $0xb8] sm:$0xff] }
0x2b72   : > { %9314 = vmatpush3.bf16.msra.mxu0 %v9313_v31  ;;  %v9322_v0 = vpack.c.bf16 %v8064_v42, %v8063_v40 }
0x2b73   : > { %v7031_v4 = vsel %vm4112_vm14, %v11311_v51, 0.0  ;;  %9315 = vmatprep.subr.bf16.mxu0 %v9829_v11 }
0x2b74   : > { %7032 = vadd.xlane.f32.xlu0 %v7031_v4  ;;  %v8066_v4 = vld [vmem:[%s11648_s18 + $0xc8] sm:$0xff] }
0x2b76   : > { %9317 = vmatpush3.bf16.msra.mxu0 %v9316_v27 }
0x2b77   : > { %9318 = vmatprep.subr.bf16.mxu0 %v9829_v11 }
0x2b7a   : > { %9320 = vmatpush3.bf16.msra.mxu0 %v9319_v34 }
0x2b7b   : > { %9321 = vmatprep.subr.bf16.mxu0 %v9829_v11 }
0x2b7e   : > { %9323 = vmatpush3.bf16.msra.mxu0 %v9322_v0 }
0x2b7f   : > { %9324 = vmatprep.subr.bf16.mxu0 %v9829_v11 }
0x2bf9   : > { %v7027_v29 = vpop.xlane.xlu1 %7026 }
0x2bfa   : > { %v7034_v23 = vmul.f32 0.03125, %v7027_v29  ;;  %v9325_v29 = vpack.c.bf16 %v8066_v4, %v8065_v43 }
0x2bfc   : > { %v7037_v54 = vsub.f32 %v11301_v30, %v7034_v23  ;;  %9326 = vmatpush3.bf16.msra.mxu0 %v9325_v29  ;;  %v8067_v23 = vld [vmem:[%s11648_s18 + $0xd0] sm:$0xff] }
0x2bfd   : > { %v7030_v57 = vpop.xlane.xlu0 %7029  ;;  %9327 = vmatprep.subr.bf16.mxu0 %v9829_v11 }
0x2bfe   : > { %v7035_v2 = vmul.f32 0.03125, %v7030_v57  ;;  %v7040_v44 = vmul.f32 %v7037_v54, %v7037_v54 }
0x2c00   : > { %v7038_v24 = vsub.f32 %v11306_v26, %v7035_v2  ;;  %v7043_v37 = vsel %vm1666_vm5, %v7040_v44, 0.0  ;;  %v8069_v2 = vld [vmem:[%s11648_s18 + $0xe0] sm:$0xff]  ;;  %v8070_v44 = vld [vmem:[%s11648_s18 + $0xe8] sm:$0xff] }
0x2c01   : > { %7044 = vadd.xlane.f32.xlu1 %v7043_v37  ;;  %v7033_v56 = vpop.xlane.xlu0 %7032  ;;  %v8071_v37 = vld [vmem:[%s11648_s18 + $0xf0] sm:$0xff] }
0x2c02   : > { %v7036_v36 = vmul.f32 0.03125, %v7033_v56  ;;  %v7041_v46 = vmul.f32 %v7038_v24, %v7038_v24  ;;  %v8072_v56 = vld [vmem:[%s11648_s18 + $0xf8] sm:$0xff] }
0x2c04   : > { %v7039_v47 = vsub.f32 %v11311_v51, %v7036_v36  ;;  %v7046_v48 = vsel %vm1666_vm5, %v7041_v46, 0.0  ;;  %v9334_v36 = vpack.c.bf16 %v8072_v56, %v8071_v37  ;;  %v8053_v46 = vld [vmem:[%s11650_s1 + $0x1] ss:$0 sm:$0xff]  ;;  %s9724_s1 = sshll.u32 %s9842_s11, 4  ;;  %s9725_s1 = int_to_ptr.vmem [resolvable:$false] %s9724_s1 }
0x2c05   : > { %7047 = vadd.xlane.f32.xlu0 %v7046_v48 }
0x2c06   : > { %v7042_v45 = vmul.f32 %v7039_v47, %v7039_v47 }
0x2c08   : > { %v7049_v16 = vsel %vm4112_vm14, %v7042_v45, 0.0 }
0x2c09   : > { %7050 = vadd.xlane.f32.xlu1 %v7049_v16 }
0x2c8e   : > { %v7045_v52 = vpop.xlane.xlu1 %7044 }
0x2c8f   : > { %v7052_v32 = vmul.f32 0.03125, %v7045_v52 }
0x2c91   : > { %v7055_v8 = vadd.f32 1e-05, %v7052_v32 }
0x2c92   : > { %v7048_v53 = vpop.xlane.xlu0 %7047 }
0x2c93   : > { %9696 = vrsqrt.f32 %v7055_v8  ;;  %v7053_v50 = vmul.f32 0.03125, %v7048_v53 }
0x2c95   : > { %v7056_v59 = vadd.f32 1e-05, %v7053_v50 }
0x2c96   : > { %v7051_v60 = vpop.xlane.xlu1 %7050 }
0x2c97   : > { %9698 = vrsqrt.f32 %v7056_v59  ;;  %v7054_v58 = vmul.f32 0.03125, %v7051_v60 }
0x2c99   : > { %v7057_v61 = vadd.f32 1e-05, %v7054_v58 }
0x2c9b   : > { %9700 = vrsqrt.f32 %v7057_v61 }
0x2c9d   : > { %v9697_v1 = vpop.eup %9696 }
0x2c9e   : > { %v7061_v55 = vmul.f32 %v9697_v1, %v7037_v54  ;;  %v8068_v54 = vld [vmem:[%s11648_s18 + $0xd8] sm:$0xff] }
0x2c9f   : > { %v9328_v57 = vpack.c.bf16 %v8068_v54, %v8067_v23 }
0x2ca0   : > { %v7070_v35 = vmul.f32 %v8046_v39, %v7061_v55 }
0x2ca1   : > { %v9699_v21 = vpop.eup %9698  ;;  %9329 = vmatpush3.bf16.msra.mxu0 %v9328_v57 }
0x2ca2   : > { %v7079_v5 = vadd.f32 %v8047_v20, %v7070_v35  ;;  %v7062_v63 = vmul.f32 %v9699_v21, %v7038_v24  ;;  %9330 = vmatprep.subr.bf16.mxu0 %v9829_v11  ;;  %v9331_v24 = vpack.c.bf16 %v8070_v44, %v8069_v2 }
0x2ca4   : > { %9021 = vmatmul.mubr.msk.f32.vlgmr.msra.gmra.mrb[104].mxu1 %vm1666_vm5, %v7079_v5  ;;  %v7071_v9 = vmul.f32 %v8046_v39, %v7062_v63 }
0x2ca5   : > { %v9701_v62 = vpop.eup %9700  ;;  %9023 = vmatprep.mubr.msk.f32.mxu1 %vm9830_vm1, %v9831_v12  ;;  %9332 = vmatpush3.bf16.msra.mxu0 %v9331_v24 }
0x2ca6   : > { %v7080_v13 = vadd.f32 %v8047_v20, %v7071_v9  ;;  %v7063_v38 = vmul.f32 %v9701_v62, %v7039_v47  ;;  %9333 = vmatprep.subr.bf16.mxu0 %v9829_v11 }
0x2ca8   : > { %9024 = vmatmul.mubr.msk.f32.gmra.mrb[106].mxu1 %vm1666_vm5, %v7080_v13  ;;  %v7072_v6 = vmul.f32 %v8046_v39, %v7063_v38 }
0x2ca9   : > { %9026 = vmatprep.mubr.msk.f32.mxu1 %vm9830_vm1, %v9831_v12  ;;  %9335 = vmatpush3.bf16.msra.mxu0 %v9334_v36 }
0x2caa   : > { %v7081_v14 = vadd.f32 %v8047_v20, %v7072_v6 }
0x2cac   : > { %9027 = vmatmul.mubr.msk.f32.gmra.mrb[108].mxu1 %vm1666_vm5, %v7081_v14 }
0x2cad   : > { %9078 = vmatprep.mubr.msk.f32.mxu1 %vm9830_vm1, %v9831_v12 }
0x2d77   : > { %v7170_v47 = vpop.f32.mrb[104].mxu1 }
0x2d78   : > { %v11362_v48 = vadd.f32 %v8053_v46, %v7170_v47  ;;  %v9022_v45 = vpop.f32.mrb[105].mxu1 }
0x2d7a   : > { %v11365_v16 = vmul.f32 0.70710677, %v11362_v48 }
0x2d7b   : > { %v7175_v33 = vpop.f32.mrb[106].mxu1 }
0x2d7c   : > { %v7196_v17 = vand.u32 2147483647, %v11365_v16  ;;  %v11368_v49 = vadd.f32 %v8053_v46, %v7175_v33  ;;  %v9025_v22 = vpop.f32.mrb[107].mxu1  ;;  %vm7190_vm2 = vcmp.lt.f32.partialorder %v11365_v16, 0.0 }
0x2d7e   : > { %v7199_v19 = vmul.f32 0.3275911, %v7196_v17  ;;  %v11371_v3 = vmul.f32 0.70710677, %v11368_v49  ;;  %v7238_v39 = vsub.f32 0.0, %v7196_v17 }
0x2d7f   : > { %v7180_v52 = vpop.f32.mrb[108].mxu1 }
0x2d80   : > { %v7202_v32 = vadd.f32 1.0, %v7199_v19  ;;  %v7197_v8 = vand.u32 2147483647, %v11371_v3  ;;  %v9028_v53 = vpop.f32.mrb[109].mxu1  ;;  %v11374_v50 = vadd.f32 %v8053_v46, %v7180_v52  ;;  %v7241_v35 = vmul.f32 %v7238_v39, %v7196_v17 }
0x2d81   : > { %v7193_v17 = vsel %vm7190_vm2, -1.0, %v9840_v25  ;;  %vm7191_vm6 = vcmp.lt.f32.partialorder %v11371_v3, 0.0 }
0x2d82   : > { %9702 = vrcp.f32 %v7202_v32  ;;  %v7200_v59 = vmul.f32 0.3275911, %v7197_v8  ;;  %v11377_v60 = vmul.f32 0.70710677, %v11374_v50  ;;  %v7239_v21 = vsub.f32 0.0, %v7197_v8 }
0x2d83   : > { %v7244_v62 = vmul.f32 1.442695, %v7241_v35  ;;  %v7194_v16 = vsel %vm7191_vm6, -1.0, %v9840_v25 }
0x2d84   : > { %v7203_v58 = vadd.f32 1.0, %v7200_v59  ;;  %v7198_v61 = vand.u32 2147483647, %v11377_v60  ;;  %v7242_v13 = vmul.f32 %v7239_v21, %v7197_v8  ;;  %v7184_v8 = vmul.f32 0.5, %v11362_v48 }
0x2d85   : > { %vm7192_vm10 = vcmp.lt.f32.partialorder %v11377_v60, 0.0 }
0x2d86   : > { %9704 = vrcp.f32 %v7203_v58  ;;  %v7201_v1 = vmul.f32 0.3275911, %v7198_v61  ;;  %v7240_v6 = vsub.f32 0.0, %v7198_v61  ;;  %v7246_v31 = vmul.f32 1.442695, %v7242_v13 }
0x2d87   : > { %v7195_v35 = vsel %vm7192_vm10, -1.0, %v9840_v25 }
0x2d88   : > { %v7204_v55 = vadd.f32 1.0, %v7201_v1  ;;  %v7243_v27 = vmul.f32 %v7240_v6, %v7198_v61 }
0x2d8a   : > { %9706 = vrcp.f32 %v7204_v55  ;;  %v7248_v43 = vmul.f32 1.442695, %v7243_v27 }
0x2d8b   : > { %9708 = vpow2.f32 %v7244_v62 }
0x2d8c   : > { %v9703_v20 = vpop.eup %9702  ;;  %9710 = vpow2.f32 %v7246_v31 }
0x2d8d   : > { %v7211_v5 = vmul.f32 1.0614054, %v9703_v20  ;;  %9712 = vpow2.f32 %v7248_v43 }
0x2d8f   : > { %v7214_v63 = vadd.f32 -1.4531521, %v7211_v5 }
0x2d90   : > { %v9705_v9 = vpop.eup %9704 }
0x2d91   : > { %v7217_v38 = vmul.f32 %v9703_v20, %v7214_v63  ;;  %v7212_v14 = vmul.f32 1.0614054, %v9705_v9  ;;  %v7186_v63 = vmul.f32 0.5, %v11374_v50 }
0x2d93   : > { %v7220_v15 = vadd.f32 1.4214138, %v7217_v38  ;;  %v7215_v10 = vadd.f32 -1.4531521, %v7212_v14 }
0x2d94   : > { %v9707_v7 = vpop.eup %9706 }
0x2d95   : > { %v7223_v18 = vmul.f32 %v9703_v20, %v7220_v15  ;;  %v7218_v28 = vmul.f32 %v9705_v9, %v7215_v10  ;;  %v7213_v41 = vmul.f32 1.0614054, %v9707_v7  ;;  %v9709_v24 = vpop.eup %9708 }
0x2d96   : > { %v9711_v33 = vpop.eup %9710 }
0x2d97   : > { %v7226_v34 = vadd.f32 -0.28449672, %v7223_v18  ;;  %v7221_v40 = vadd.f32 1.4214138, %v7218_v28  ;;  %v7216_v42 = vadd.f32 -1.4531521, %v7213_v41  ;;  %v9713_v61 = vpop.eup %9712 }
0x2d99   : > { %v7229_v0 = vmul.f32 %v9703_v20, %v7226_v34  ;;  %v7224_v4 = vmul.f32 %v9705_v9, %v7221_v40  ;;  %v7219_v29 = vmul.f32 %v9707_v7, %v7216_v42 }
0x2d9b   : > { %v7232_v23 = vadd.f32 0.2548296, %v7229_v0  ;;  %v7227_v54 = vadd.f32 -0.28449672, %v7224_v4  ;;  %v7222_v57 = vadd.f32 1.4214138, %v7219_v29 }
0x2d9d   : > { %v7235_v2 = vmul.f32 %v9703_v20, %v7232_v23  ;;  %v7230_v44 = vmul.f32 %v9705_v9, %v7227_v54  ;;  %v7225_v37 = vmul.f32 %v9707_v7, %v7222_v57  ;;  %v7185_v20 = vmul.f32 0.5, %v11368_v49  ;;  %v8074_v49 = vld [vmem:[%s11652_s4 + $0x1] ss:$0 sm:$0xff] }
0x2d9f   : > { %v7250_v56 = vmul.f32 %v9709_v24, %v7235_v2  ;;  %v7233_v36 = vadd.f32 0.2548296, %v7230_v44  ;;  %v7228_v46 = vadd.f32 -0.28449672, %v7225_v37  ;;  %v7432_v24 = vld [vmem:[%s10062_s27] sm:$0xff]  ;;  %v7433_v37 = vld [vmem:[%s10062_s27 + $0x8] sm:$0xff] }
0x2da1   : > { %v7253_v47 = vsub.f32 1.0, %v7250_v56  ;;  %v7236_v45 = vmul.f32 %v9705_v9, %v7233_v36  ;;  %v7231_v22 = vmul.f32 %v9707_v7, %v7228_v46  ;;  %v9337_v56 = vpack.c.bf16 %v7433_v37, %v7432_v24  ;;  %v7434_v36 = vld [vmem:[%s10062_s27 + $0x10] sm:$0xff]  ;;  %v7435_v46 = vld [vmem:[%s10062_s27 + $0x18] sm:$0xff] }
0x2da3   : > { %v7256_v19 = vmul.f32 %v7253_v47, %v7193_v17  ;;  %v7251_v52 = vmul.f32 %v9711_v33, %v7236_v45  ;;  %v7234_v32 = vadd.f32 0.2548296, %v7231_v22  ;;  %9338 = vmatpush3.bf16.msra.mxu1 %v9337_v56  ;;  %v9340_v47 = vpack.c.bf16 %v7435_v46, %v7434_v36 }
0x2da4   : > { %9339 = vmatprep.subr.bf16.mxu1 %v9829_v11  ;;  %v8075_v11 = vld [vmem:[%s11653_s17] ss:$0 sm:$0xff]  ;;  %s9841_s17 = smov 1  }
0x2da5   : > { %v7259_v53 = vadd.f32 1.0, %v7256_v19  ;;  %v7254_v59 = vsub.f32 1.0, %v7251_v52  ;;  %v7237_v58 = vmul.f32 %v9707_v7, %v7234_v32 }
0x2da7   : > { %v7262_v1 = vmul.f32 %v7259_v53, %v7184_v8  ;;  %v7257_v39 = vmul.f32 %v7254_v59, %v7194_v16  ;;  %v7252_v55 = vmul.f32 %v9713_v61, %v7237_v58  ;;  %9341 = vmatpush3.bf16.msra.mxu1 %v9340_v47  ;;  %v8076_v58 = vld [vmem:[%s11654_s25] ss:$0 sm:$0xff]  ;;  %s7633_s25 = sshll.u32 %s11433_s16, 4  ;;  %s11442_s25 = int_to_ptr.vmem [resolvable:$true] %s7633_s25 }
0x2da8   : > { %p9727_p0 = scmp.lt.s32.totalorder %s11442_s25, %s9725_s1 }
0x2da9   : > { %9062 = vmatmul.mubr.f32.vlgmr.msra.gmra.mrb[84].mxu0 %v7262_v1  ;;  %v7260_v3 = vadd.f32 1.0, %v7257_v39  ;;  %v7255_v48 = vsub.f32 1.0, %v7252_v55 }
0x2daa   : > { %9064 = vmatprep.mubr.msk.f32.mxu0 %vm9830_vm1, %v9831_v12 }
0x2dab   : > { %v7263_v21 = vmul.f32 %v7260_v3, %v7185_v20  ;;  %v7258_v5 = vmul.f32 %v7255_v48, %v7195_v35 }
0x2dad   : > { %9065 = vmatmul.mubr.f32.gmra.mrb[86].mxu0 %v7263_v21  ;;  %v7261_v60 = vadd.f32 1.0, %v7258_v5 }
0x2dae   : > { %9067 = vmatprep.mubr.msk.f32.mxu0 %vm9830_vm1, %v9831_v12 }
0x2daf   : > { %v7264_v9 = vmul.f32 %v7261_v60, %v7186_v63  ;;  %v11422_v63 = vld [vmem:[%s1422_s19] sm:$0xff]  ;;  %v11424_v60 = vld [vmem:[%s1422_s19 + $0x8] sm:$0xff]  ;;  %s11450_s19 = scalar_lea.sflag [#allocation3], %s1400_s6 }
0x2db1   : > { %9068 = vmatmul.mubr.f32.gmra.mrb[88].mxu0 %v7264_v9  ;;  %v7537_v9 = vld [vmem:[%s1417_s30] sm:$0xff] }
0x2e7c   : > { %v7356_v62 = vpop.f32.mrb[84].mxu0 }
0x2e7d   : > { %v7357_v13 = vadd.f32 %v8074_v49, %v7356_v62  ;;  %v9063_v38 = vpop.f32.mrb[85].mxu0  ;;  %v7600_v62 = vsel %vm7590_vm12, %v11422_v63, 0.0 }
0x2e7e   : > { %v7541_v38 = vrot.slane %v7537_v9, 7 }
0x2e7f   : > { %v7370_v6 = vadd.f32 %v7357_v13, %v11301_v30  ;;  %v8077_v13 = vld [vmem:[%s10067_s13] ss:$0 sm:$0xff] }
0x2e80   : > { %v7361_v14 = vpop.f32.mrb[86].mxu0 }
0x2e81   : > { %v7362_v15 = vadd.f32 %v8074_v49, %v7361_v14  ;;  %v9066_v25 = vpop.f32.mrb[87].mxu0  ;;  %v7375_v10 = vsel %vm1666_vm5, %v7370_v6, 0.0 }
0x2e82   : > { %7376 = vadd.xlane.f32.xlu0 %v7375_v10 }
0x2e83   : > { %v7371_v50 = vadd.f32 %v7362_v15, %v11306_v26 }
0x2e84   : > { %v7366_v31 = vpop.f32.mrb[88].mxu0 }
0x2e85   : > { %v7378_v7 = vsel %vm1666_vm5, %v7371_v50, 0.0  ;;  %v7367_v18 = vadd.f32 %v8074_v49, %v7366_v31  ;;  %v9069_v27 = vpop.f32.mrb[89].mxu0  ;;  %v7538_v49 = vld [vmem:[%s1417_s30 + $0x8] sm:$0xff]  ;;  %s9720_s30 = scalar_lea.vmem %s11442_s25, 256 }
0x2e86   : > { %7379 = vadd.xlane.f32.xlu1 %v7378_v7  ;;  %v7542_v14 = vrot.slane %v7538_v49, 7  ;;  %p9721_p11 = scmp.ne.s32.totalorder %s11442_s25, %s9720_s30 }
0x2e87   : > { %v7372_v28 = vadd.f32 %v7367_v18, %v11311_v51 }
0x2e88   : > { %v7543_v7 = vsel %vm1617_vm3, %v7541_v38, %v7542_v14  ;;  %p9722_p12 = pnand %p9721_p11, %p10117_p5 }
0x2e89   : > { %v7381_v41 = vsel %vm4112_vm14, %v7372_v28, 0.0 }
0x2e8a   : > { %7382 = vadd.xlane.f32.xlu0 %v7381_v41  ;;  %p9723_p13 = pneg %p9722_p12 }
0x2f0f   : > { %v7377_v30 = vpop.xlane.xlu0 %7376 }
0x2f10   : > { %v7384_v34 = vmul.f32 0.03125, %v7377_v30 }
0x2f12   : > { %v7387_v40 = vsub.f32 %v7370_v6, %v7384_v34 }
0x2f13   : > { %v7380_v42 = vpop.xlane.xlu1 %7379 }
0x2f14   : > { %v7385_v0 = vmul.f32 0.03125, %v7380_v42  ;;  %v7390_v43 = vmul.f32 %v7387_v40, %v7387_v40 }
0x2f16   : > { %v7388_v26 = vsub.f32 %v7371_v50, %v7385_v0  ;;  %v7393_v4 = vsel %vm1666_vm5, %v7390_v43, 0.0 }
0x2f17   : > { %7394 = vadd.xlane.f32.xlu1 %v7393_v4  ;;  %v7383_v29 = vpop.xlane.xlu0 %7382 }
0x2f18   : > { %v7391_v23 = vmul.f32 %v7388_v26, %v7388_v26  ;;  %v7386_v51 = vmul.f32 0.03125, %v7383_v29 }
0x2f1a   : > { %v7396_v54 = vsel %vm1666_vm5, %v7391_v23, 0.0  ;;  %v7389_v57 = vsub.f32 %v7372_v28, %v7386_v51 }
0x2f1b   : > { %7397 = vadd.xlane.f32.xlu0 %v7396_v54 }
0x2f1c   : > { %v7392_v2 = vmul.f32 %v7389_v57, %v7389_v57 }
0x2f1e   : > { %v7399_v44 = vsel %vm4112_vm14, %v7392_v2, 0.0 }
0x2f1f   : > { %7400 = vadd.xlane.f32.xlu1 %v7399_v44 }
0x2fa4   : > { %v7395_v45 = vpop.xlane.xlu1 %7394 }
0x2fa5   : > { %v7402_v33 = vmul.f32 0.03125, %v7395_v45 }
0x2fa7   : > { %v7405_v17 = vadd.f32 1e-05, %v7402_v33 }
0x2fa8   : > { %v7398_v22 = vpop.xlane.xlu0 %7397 }
0x2fa9   : > { %9714 = vrsqrt.f32 %v7405_v17  ;;  %v7403_v19 = vmul.f32 0.03125, %v7398_v22 }
0x2fab   : > { %v7406_v52 = vadd.f32 1e-05, %v7403_v19 }
0x2fac   : > { %v7401_v32 = vpop.xlane.xlu1 %7400 }
0x2fad   : > { %9716 = vrsqrt.f32 %v7406_v52  ;;  %v7404_v8 = vmul.f32 0.03125, %v7401_v32 }
0x2faf   : > { %v7407_v53 = vadd.f32 1e-05, %v7404_v8 }
0x2fb1   : > { %9718 = vrsqrt.f32 %v7407_v53 }
0x2fb3   : > { %v9715_v59 = vpop.eup %9714 }
0x2fb4   : > { %v7411_v16 = vmul.f32 %v9715_v59, %v7387_v40 }
0x2fb6   : > { %v7420_v61 = vmul.f32 %v8075_v11, %v7411_v16 }
0x2fb7   : > { %v9717_v1 = vpop.eup %9716 }
0x2fb8   : > { %v7429_v39 = vadd.f32 %v8076_v58, %v7420_v61  ;;  %v7412_v55 = vmul.f32 %v9717_v1, %v7388_v26 }
0x2fba   : > { %9079 = vmatmul.mubr.msk.f32.vlgmr.msra.gmra.mrb[110].mxu1 %vm1666_vm5, %v7429_v39  ;;  %v7421_v20 = vmul.f32 %v8075_v11, %v7412_v55 }
0x2fbb   : > { %9081 = vmatprep.mubr.msk.f32.mxu1 %vm9830_vm1, %v9831_v12  ;;  %v9719_v3 = vpop.eup %9718 }
0x2fbc   : > { %v7430_v48 = vadd.f32 %v8076_v58, %v7421_v20  ;;  %v7413_v35 = vmul.f32 %v9719_v3, %v7389_v57 }
0x2fbe   : > { %9082 = vmatmul.mubr.msk.f32.gmra.mrb[112].mxu1 %vm1666_vm5, %v7430_v48  ;;  %v7422_v21 = vmul.f32 %v8075_v11, %v7413_v35 }
0x2fbf   : > { %9084 = vmatprep.mubr.msk.f32.mxu1 %vm9830_vm1, %v9831_v12  ;;  %v7601_v12 = vsel %vm7590_vm12, %v11424_v60, 0.0  ;;  %vm7532_vm1 = vcmask 392193  }
0x2fc0   : > { %v7431_v5 = vadd.f32 %v8076_v58, %v7422_v21  ;;  %v7602_v15 = vadd.f32 %v7601_v12, %v7600_v62 }
0x2fc2   : > { %9085 = vmatmul.mubr.msk.f32.gmra.mrb[114].mxu1 %vm1666_vm5, %v7431_v5  ;;  %v7603_v41 = vrot.slane %v7602_v15, 4  ;;  %vm7535_vm5 = vcmask 385024  }
0x2fc4   : > { %v7604_v0 = vadd.f32 %v7603_v41, %v7602_v15 }
0x2fc6   : > { %v7605_v23 = vrot.slane %v7604_v0, 2 }
0x2fc8   : > { %v7606_v57 = vadd.f32 %v7605_v23, %v7604_v0 }
0x2fca   : > { %v7607_v2 = vrot.slane %v7606_v57, 1 }
0x2fcc   : > { %v7608_v44 = vadd.f32 %v7607_v2, %v7606_v57 }
0x308d   : > { %v7518_v6 = vpop.f32.mrb[110].mxu1 }
0x308e   : > { %v7519_v25 = vadd.f32 %v8077_v13, %v7518_v6  ;;  %v9080_v10 = vpop.f32.mrb[111].mxu1 }
0x3090   : > { %v7547_v50 = vsub.f32 %v7519_v25, %v7541_v38  ;;  %7533 = vst.msk [vmem:[%s11433_s16 - $0x1] sm:$0xfe] %vm7532_vm1, %v7519_v25 }
0x3091   : > { %v7523_v31 = vpop.f32.mrb[112].mxu1 }
0x3092   : > { %v7550_v18 = vmul.f32 %v7547_v50, %v7547_v50  ;;  %v7524_v27 = vadd.f32 %v8077_v13, %v7523_v31  ;;  %v9083_v28 = vpop.f32.mrb[113].mxu1 }
0x3094   : > { %7534 = vst.msk [vmem:[%s11433_s16 + $0x7] sm:$0xff] %vm1450_vm0, %v7524_v27  ;;  %v7548_v30 = vsub.f32 %v7524_v27, %v7543_v7  ;;  %v7553_v34 = vsel %vm7532_vm1, %v7550_v18, 0.0 }
0x3095   : > { %7554 = vadd.xlane.f32.xlu0 %v7553_v34  ;;  %v7528_v42 = vpop.f32.mrb[114].mxu1 }
0x3096   : > { %v7551_v40 = vmul.f32 %v7548_v30, %v7548_v30  ;;  %v7529_v43 = vadd.f32 %v8077_v13, %v7528_v42  ;;  %v9086_v26 = vpop.f32.mrb[115].mxu1 }
0x3098   : > { %v7556_v4 = vsel %vm1450_vm0, %v7551_v40, 0.0  ;;  %v7549_v29 = vsub.f32 %v7529_v43, %v7542_v14  ;;  %7536 = vst.msk [vmem:[%s11433_s16 + $0xf] sm:$0x1] %vm7535_vm5, %v7529_v43  ;;  %s9726_s16 = scalar_lea.vmem %s9725_s1, 512 }
0x3099   : > { %7557 = vadd.xlane.f32.xlu1 %v7556_v4  ;;  %p9728_p1 = scmp.lt.s32.totalorder %s9726_s16, %s9720_s30 }
0x309a   : > { %v7552_v51 = vmul.f32 %v7549_v29, %v7549_v29 }
0x309b   : > { %p9729_p2 = por %p9728_p1, %p9727_p0 }
0x309c   : > { %v7559_v54 = vsel %vm7535_vm5, %v7552_v51, 0.0 }
0x309d   : > { %7560 = vadd.xlane.f32.xlu0 %v7559_v54  ;;  %p9730_p3 = pnand %p9729_p2, %p9723_p13 }
0x30aa   : > { %7610 = vrot.lane.b32.xlu1 %v7608_v44, %s9841_s17 }
0x30ab   : > { %9733 = shalt.err (!%p9730_p3)
}
0x30ac   : > { %s9734_s0 = scalar_lea.hbm %s11446_s14, 256  ;;  %s9738_s6 = scalar_lea.hbm %s10072_s21, 512 }
0x30ad   : > { %p9735_p4 = scmp.ne.s32.totalorder %s11446_s14, %s9734_s0  ;;  %p9739_p9 = scmp.lt.u32.totalorder %s11446_s14, %s10072_s21 }
0x30ae   : > { %p9740_p10 = scmp.lt.u32.totalorder %s9738_s6, %s9734_s0  ;;  %p9742_p12 = scmp.lt.u32.totalorder %s9734_s0, %s11446_s14 }
0x30af   : > { %p9736_p7 = pnand %p9735_p4, %p10117_p5 }
0x30b0   : > { %p9741_p11 = por %p9740_p10, %p9739_p9 }
0x30b1   : > { %p9737_p8 = pneg %p9736_p7 }
0x30b2   : > { %p9743_p0 = por %p9742_p12, %p9741_p11 }
0x30b4   : > { %p9744_p13 = pnand %p9743_p0, %p9737_p8 }
0x30b6   : > { %9747 = shalt.err (!%p9744_p13)
}
0x30b7   : > { %s9843_s1 = smov 128   ;;  %v7571_v24 = vrot.slane %v11424_v60, 7  ;;  %v7570_v56 = vrot.slane %v11422_v63, 7  ;;  %s11657_s28 = sld [smem:[#allocation47_spill]]  ;;  %vm7582_vm0 = vcmask 1046528  }
0x30b8   : > { %9342 = dma.vmem_to_hbm [thread:$0]  (%p10117_p5), %s11442_s25, 256, %s11446_s14, %s11450_s19, %s9843_s1, %s9843_s1, %s11626_s24  }
0x30b9   : > { %v7572_v46 = vsel %vm1617_vm3, %v7570_v56, %v7571_v24  ;;  %vm7614_vm3 = vcmask 8192  }
0x30bd   : > { %s1434_s24 = scalar_lea.vmem %s11657_s28, %s10135_s2 }
0x3122   : > { %v7555_v37 = vpop.xlane.xlu0 %7554 }
0x3123   : > { %v7563_v36 = vmul.f32 0.020833334, %v7555_v37 }
0x3125   : > { %v7576_v17 = vmul.f32 %v7570_v56, %v7563_v36 }
0x3126   : > { %v7558_v47 = vpop.xlane.xlu1 %7557 }
0x3127   : > { %v7564_v45 = vmul.f32 0.020833334, %v7558_v47  ;;  %v7583_v32 = vrot.slane %v7576_v17, 1 }
0x3129   : > { %v7577_v33 = vmul.f32 %v7572_v46, %v7564_v45 }
0x312a   : > { %v7561_v22 = vpop.xlane.xlu0 %7560  ;;  %v7611_v48 = vpop.permute.xlu1 %7610 }
0x312b   : > { %v7584_v19 = vrot.slane %v7577_v33, 1  ;;  %v7565_v52 = vmul.f32 0.020833334, %v7561_v22 }
0x312d   : > { %v7578_v8 = vmul.f32 %v7571_v24, %v7565_v52  ;;  %v7585_v53 = vsel %vm7582_vm0, %v7583_v32, %v7584_v19 }
0x312e   : > { %v7591_v16 = vsel %vm7590_vm12, %v7585_v53, 0.0 }
0x312f   : > { %v7586_v59 = vrot.slane %v7578_v8, 1 }
0x3131   : > { %v7587_v11 = vsel %vm7582_vm0, %v7584_v19, %v7586_v59 }
0x3132   : > { %v7592_v58 = vsel %vm7590_vm12, %v7587_v11, 0.0 }
0x3133   : > { %v7593_v61 = vadd.f32 %v7592_v58, %v7591_v16 }
0x3135   : > { %v7594_v1 = vrot.slane %v7593_v61, 4 }
0x3137   : > { %v7595_v39 = vadd.f32 %v7594_v1, %v7593_v61 }
0x3139   : > { %v7596_v55 = vrot.slane %v7595_v39, 2 }
0x313b   : > { %v7597_v20 = vadd.f32 %v7596_v55, %v7595_v39 }
0x313d   : > { %v7598_v3 = vrot.slane %v7597_v20, 1 }
0x313f   : > { %v7599_v35 = vadd.f32 %v7598_v3, %v7597_v20 }
0x3141   : > { %v7613_v21 = vsel %vm7590_vm12, %v7599_v35, %v7611_v48 }
0x3142   : > { %7615 = vst.msk [vmem:[%s1434_s24] sm:$0x1] %vm7614_vm3, %v7613_v21 }
0x3143 PF: > { %p9348_p5 = scmp.ge.s32.totalorder %s9782_s15, 2  ;;  %s7651_s25 = sand.u32 1, %s9770_s7  }
0x3144   : > { %s7652_s29 = scalar_lea.sflag [#allocation3], %s7651_s25 }
0x3145   : > { %p9345_p1 = pnand %p9348_p5, %p10121_p6 }
0x3147   : > { %9765 = dma.done.wait (!%p9345_p1), %s7652_s29, 256  }
0x3148   : > { %9767 = vsyncadd (!%p9345_p1), %s7652_s29, 4294967040  ;;  %s11659_s15 = sld [smem:[#allocation49_spill]]  ;;  %s11660_s14 = sld [smem:[#allocation48_spill]] }
0x3149   : > { %s11661_s11 = sld [smem:[#allocation50_spill]]  ;;  %s11662_s7 = smov %s9774_s10 }
0x314e   : > { %p102_p2 = scmp.ge.s32.totalorder %s11659_s15, 4   ;;  %s11663_s10 = smov %s11660_s14 }
0x3150   :  { %104 = sbr.rel (!%p102_p2) target bundleno = 109 (0x6d), region = 324 }
0x3157   :  { %7663 = vsyncpa [#allocation3], 1 }
0x3158   :  { %7665 = vsyncpa [#allocation3 + $0x1], 1 }

</bundles_post_ra>
